<compile_context>
chip_gen: v6e
topology: v6e:2x2x1
jax: 0.10.0
libtpu: 0.0.40
codegen_flags: <defaults>
</compile_context>

<pallas_src>
import functools

import jax
import jax.numpy as jnp
from jax import lax
from jax.experimental import pallas as pl
from jax.experimental.pallas import tpu as pltpu


# ----------------------------------------------------------------------------
# Fused kernel: `wps` windows per grid step (all frames, all heads inside).
# Everything is feature-major: tokens (B*n = 128) live on the lane axis.
# ----------------------------------------------------------------------------
def _fa_window_kernel(pack_ref, wproj_ref, wk_ref, wout_ref, bd_ref, g_ref,
                      maskw_ref, x_ref, o_ref, *, n, B, heads, d, c, rank, wps):
    BN = B * n
    f32 = jnp.float32
    bf16 = jnp.bfloat16
    ABt = (((1,), (1,)), ((), ()))   # contract last dims  (A @ B^T)
    AB = (((1,), (0,)), ((), ()))    # native (M,K)@(K,N)

    P = wproj_ref[...]               # (rank + c + heads, c) bf16 : [Wq | Wv | sigma_q rows]
    Wout = wout_ref[...]             # (c, c) bf16
    bout_col = pack_ref[:, 0:1]      # (c, 1) f32
    bq = pack_ref[0:1, 1:2]          # (1, 1)
    bk = pack_ref[1:2, 1:2]          # (1, 1)
    m1_mat = maskw_ref[0]            # (BN, BN) f32: w_m1[j%n] * same-frame * off-diag
    negmask = maskw_ref[1]           # (BN, BN) f32: 0 same frame / -1e30 cross frame

    bigT_all = []                    # per-window feature-major projections
    kext_all = []                    # per-(window, head) token-major k (+ sigma_k column)
    tvec_rows = []                   # per-(window, head) mlp1 outputs, (1, BN)

    # ---- Phase A: projections + mlp1(sim with zeroed diagonal) -------------
    for w in range(wps):                                     # static unroll
        X = x_ref[w]                                         # (BN, c) bf16, token-major
        bigT = lax.dot_general(P, X, ABt, preferred_element_type=f32)   # (rank+c+heads, BN)
        bigT_all.append(bigT)
        for h in range(heads):                               # static unroll
            wk_h = wk_ref[h * 2 * d:(h + 1) * 2 * d, :]      # (2d, c) bf16: [Wk_h ; sig_k row ; 0]
            k_ext = lax.dot_general(X, wk_h, ABt, preferred_element_type=f32)  # (BN, 2d)
            kext_all.append(k_ext)
            qT = bigT[h * d:(h + 1) * d, :]                  # (d, BN) f32
            # simT[j, i] = <k_j, q_i>  (keys on sublanes, queries on lanes)
            simT = lax.dot_general(k_ext[:, 0:d].astype(bf16), qT.astype(bf16),
                                   AB, preferred_element_type=f32)       # (BN, BN)
            # mlp1 over keys with zeroed diagonal, folded into one multiply + sublane reduce
            tvec_rows.append(jnp.sum(simT * m1_mat, axis=0, keepdims=True))  # (1, BN)

    # ---- Phase B: batched threshold MLP (mlp2) for all (window, head) ------
    T = jnp.concatenate(tvec_rows, axis=0)                   # (wps*heads, BN)
    H = lax.dot_general(T.astype(bf16), bd_ref[...], AB,
                        preferred_element_type=f32)          # blockdiag(W1^T, ...) -> h1 per frame
    Hl = jnp.where(H > 0, H, 0.1 * H)                        # LeakyReLU(0.1)
    TH = lax.dot_general(Hl.astype(bf16), g_ref[...], AB,
                         preferred_element_type=f32)         # (wps*heads, BN): theta per query token

    # ---- Phase C: Sigma-scaled attention, masked softmax, output proj ------
    for w in range(wps):
        bigT = bigT_all[w]
        head_outs = []
        for h in range(heads):
            r = w * heads + h
            k_ext = kext_all[r]
            qT = bigT[h * d:(h + 1) * d, :]                              # (d, BN)
            vT = bigT[rank + h * d:rank + (h + 1) * d, :]                # (d, BN)
            sigq_row = bigT[rank + c + h:rank + c + h + 1, :] + bq       # (1, BN)
            sigk_col = k_ext[:, d:d + 1] + bk                            # (BN, 1)
            # sim2T[j, i] = sim[i, j] * sigma_q[i] * sigma_k[j]
            ks = (k_ext[:, 0:d] * sigk_col).astype(bf16)                 # (BN, d)
            qs = (qT * sigq_row).astype(bf16)                            # (d, BN)
            sim2T = lax.dot_general(ks, qs, AB, preferred_element_type=f32)   # (BN, BN)

            # softmax over keys (sublane axis), restricted to same-frame entries
            s_msk = sim2T + negmask
            m = jnp.max(s_msk, axis=0, keepdims=True)                    # (1, BN)
            p = jnp.exp(s_msk - m)
            denom = jnp.sum(p, axis=0, keepdims=True)                    # (1, BN)
            theta = TH[r:r + 1, :]                                       # (1, BN)
            # mask AFTER softmax (no renorm), folded before the divide
            attnT = jnp.where(sim2T > theta, p, 0.0) * pl.reciprocal(denom, approx=True)

            head_outs.append(lax.dot_general(vT.astype(bf16), attnT.astype(bf16),
                                             AB, preferred_element_type=f32))   # (d, BN)

        outT = jnp.concatenate(head_outs, axis=0)                        # (c, BN) sublane concat
        yT = lax.dot_general(Wout, outT.astype(bf16), AB,
                             preferred_element_type=f32) + bout_col      # (c, BN)
        o_ref[w] = yT                                                    # full 128-lane store


def fused_window_attention(xw, params, *, n, B, heads, d, c):
    # xw: (num_windows, B*n, c) -> (num_windows, c, B*n)  (already includes to_out)
    bw, BN, _ = xw.shape
    rank = heads * d
    assert rank == c, "kernel assumes sq_dim == dim (heads_qk == heads_v)"
    wps = 2 if bw % 2 == 0 else 1           # >=2 grid steps (v7x megacore), <=bw/2 steps (v5e/v6e)

    f32 = jnp.float32
    bf16 = jnp.bfloat16

    Wqk = params["w_qk"]                    # (2*rank, c)
    Wq, Wk = Wqk[:rank], Wqk[rank:]
    Wv = params["w_v"]                      # (c, c)
    # Sigma_q folded into the main projection; Sigma_k folded into the per-head k projection.
    sigWq = jnp.einsum("d,hdc->hc", params["w_pc_q"][0], Wq.reshape(heads, d, c))   # (heads, c)
    sigWk = jnp.einsum("d,hdc->hc", params["w_pc_k"][0], Wk.reshape(heads, d, c))   # (heads, c)
    P = jnp.concatenate([Wq, Wv, sigWq], axis=0).astype(bf16)            # (rank + c + heads, c)
    wk_ext = jnp.concatenate([Wk.reshape(heads, d, c),
                              sigWk.reshape(heads, 1, c),
                              jnp.zeros((heads, d - 1, c), f32)], axis=1)
    wk_ext = wk_ext.reshape(heads * 2 * d, c).astype(bf16)               # (2*heads*d, c)
    Wout = params["w_out"].astype(bf16)                                  # (c, c)

    # Remaining tiny params packed into one block: col0 = b_out, [0,1]=bq, [1,1]=bk.
    pack = jnp.zeros((c, 2), f32)
    pack = pack.at[:, 0].set(params["b_out"])
    pack = pack.at[0, 1].set(params["bias_qk"][0])
    pack = pack.at[1, 1].set(params["bias_qk"][1])

    # Frame-structured matrices (both frames share one 128x128 attention tile).
    eyeB = jnp.eye(B, dtype=f32)
    W1 = params["w_mlp2_0"]                                              # (n, n)
    w2 = params["w_mlp2_2"].reshape(n, 1)                                # (n, 1)
    w_m1 = params["w_m1"].reshape(n, 1)                                  # (n, 1)
    bd = jnp.kron(eyeB, W1.T).astype(bf16)                               # (BN, BN)
    g = jnp.kron(eyeB, jnp.tile(w2, (1, n))).astype(bf16)                # (BN, BN)
    m1_mat = jnp.kron(eyeB, jnp.tile(w_m1, (1, n))) * (1.0 - jnp.eye(BN, dtype=f32))
    negmask = (jnp.kron(eyeB, jnp.ones((n, n), f32)) - 1.0) * 1e30       # 0 / -1e30
    maskw = jnp.stack([m1_mat, negmask], axis=0)                         # (2, BN, BN) f32

    kern = functools.partial(_fa_window_kernel, n=n, B=B, heads=heads, d=d, c=c,
                             rank=rank, wps=wps)

    def const2(shape):
        return pl.BlockSpec(shape, lambda i: (0, 0))

    return pl.pallas_call(
        kern,
        out_shape=jax.ShapeDtypeStruct((bw, c, BN), jnp.float32),
        grid=(bw // wps,),
        in_specs=[
            const2((c, 2)),                                   # pack (b_out, bq, bk)
            const2((rank + c + heads, c)),                    # [Wq | Wv | sigma_q rows]
            const2((heads * 2 * d, c)),                       # per-head extended Wk
            const2((c, c)),                                   # W_out
            const2((BN, BN)),                                 # blockdiag(W1^T)
            const2((BN, BN)),                                 # w2 / frame-broadcast matrix
            pl.BlockSpec((2, BN, BN), lambda i: (0, 0, 0)),   # [mlp1 mask, softmax frame mask]
            pl.BlockSpec((wps, BN, c), lambda i: (i, 0, 0)),  # tokens of the step's windows
        ],
        out_specs=pl.BlockSpec((wps, c, BN), lambda i: (i, 0, 0)),
        compiler_params=pltpu.CompilerParams(dimension_semantics=("parallel",)),
    )(pack, P, wk_ext, Wout, bd, g, maskw, xw.astype(bf16))


# ----------------------------------------------------------------------------
# JAX glue: shift roll + window partition / merge (pure layout transforms).
# ----------------------------------------------------------------------------
def fa_forward(x, params, *, window_size=(8, 8), dim_head=8, shift=True):
    b, B, H, W, c = x.shape
    w0, w1 = window_size
    nh, nw = H // w0, W // w1
    heads = c // dim_head
    n = w0 * w1

    # Cast before the layout passes: halves the bytes moved by roll / (un)partition.
    x = x.astype(jnp.bfloat16)
    if shift:
        # TODO(synk): fold the +/-4 roll + window partition into the kernel's DMA/index_map
        # (4 wrap-around rectangles per window) instead of separate XLA layout passes.
        x = jnp.roll(x, shift=(4, 4), axis=(2, 3))

    # 'b B (nh b0) (nw b1) c -> (b nh nw) (B b0 b1) c'  (frame-major token axis)
    xw = x.reshape(b, B, nh, w0, nw, w1, c)
    xw = jnp.transpose(xw, (0, 2, 4, 1, 3, 5, 6))        # (b, nh, nw, B, w0, w1, c)
    xw = xw.reshape(b * nh * nw, B * n, c)

    o = fused_window_attention(xw, params, n=n, B=B, heads=heads, d=dim_head, c=c)

    # (bw, c, B*n) -> 'b B (nh b0) (nw b1) c'
    o = o.reshape(b, nh, nw, c, B, w0, w1)
    o = jnp.transpose(o, (0, 4, 1, 5, 2, 6, 3))          # (b, B, nh, w0, nw, w1, c)
    o = o.reshape(b, B, H, W, c)

    if shift:
        o = jnp.roll(o, shift=(-4, -4), axis=(2, 3))
    return o


def init_params(key, dim, rank, dim_head, n):
    ks = jax.random.split(key, 9)
    s = 0.1
    return {
        "w_qk": s * jax.random.normal(ks[0], (2 * rank, dim), jnp.float32),   # to_qk (no bias)
        "w_v": s * jax.random.normal(ks[1], (dim, dim), jnp.float32),         # to_v (no bias)
        "w_out": s * jax.random.normal(ks[2], (dim, dim), jnp.float32),       # to_out weight
        "b_out": s * jax.random.normal(ks[3], (dim,), jnp.float32),           # to_out bias
        "w_pc_q": s * jax.random.normal(ks[4], (1, dim_head), jnp.float32),   # pc_proj_q
        "w_pc_k": s * jax.random.normal(ks[5], (1, dim_head), jnp.float32),   # pc_proj_k
        "bias_qk": jnp.array([1.0, 1.0], jnp.float32),                        # bias_pc_proj_q/k
        "w_m1": s * jax.random.normal(ks[6], (1, n), jnp.float32),            # mlp1
        "w_mlp2_0": s * jax.random.normal(ks[7], (n, n), jnp.float32),        # mlp2 Linear(n,n)
        "w_mlp2_2": s * jax.random.normal(ks[8], (1, n), jnp.float32),        # mlp2 Linear(n,1)
    }


if __name__ == "__main__":
    key = jax.random.PRNGKey(0)
    # x: (b, B, h, w, c)  with dim = sq_dim = 16, dim_head = 8 -> heads = 2, window 8x8 -> 4 windows
    b, B, H, W, c = 1, 2, 16, 16, 16
    dim_head = 8
    window = (8, 8)
    n = window[0] * window[1]
    rank = c

    kx, kp = jax.random.split(key)
    x = jax.random.normal(kx, (b, B, H, W, c), jnp.float32)
    params = init_params(kp, c, rank, dim_head, n)

    fwd = jax.jit(functools.partial(fa_forward, window_size=window,
                                    dim_head=dim_head, shift=True))
    out = fwd(x, params)
    jax.block_until_ready(out)

    assert out.shape == x.shape and out.dtype == jnp.float32
    assert bool(jnp.all(jnp.isfinite(out)))
    print("KERNEL_OK")
</pallas_src>

<mosaic_0001>
module attributes {stable_mosaic.version = 11 : i64} {
  func.func @_fa_window_kernel(%arg0: i32, %arg1: memref<16x2xf32, #tpu.memory_space<vmem>>, %arg2: memref<34x16xbf16, #tpu.memory_space<vmem>>, %arg3: memref<32x16xbf16, #tpu.memory_space<vmem>>, %arg4: memref<16x16xbf16, #tpu.memory_space<vmem>>, %arg5: memref<128x128xbf16, #tpu.memory_space<vmem>>, %arg6: memref<128x128xbf16, #tpu.memory_space<vmem>>, %arg7: memref<2x128x128xf32, #tpu.memory_space<vmem>>, %arg8: memref<2x128x16xbf16, #tpu.memory_space<vmem>>, %arg9: memref<2x16x128xf32, #tpu.memory_space<vmem>>) attributes {dimension_semantics = [#tpu.dimension_semantics<parallel>], iteration_bounds = array<i64: 2>, scalar_prefetch = 0 : i64, scratch_operands = 0 : i64, tpu.core_type = #tpu.core_type<tc>, window_params = [{pipeline_mode = #tpu.pipeline_mode<synchronous>, transform_indices = @transform_0, window_bounds = array<i64: 16, 2>}, {pipeline_mode = #tpu.pipeline_mode<synchronous>, transform_indices = @transform_1, window_bounds = array<i64: 34, 16>}, {pipeline_mode = #tpu.pipeline_mode<synchronous>, transform_indices = @transform_2, window_bounds = array<i64: 32, 16>}, {pipeline_mode = #tpu.pipeline_mode<synchronous>, transform_indices = @transform_3, window_bounds = array<i64: 16, 16>}, {pipeline_mode = #tpu.pipeline_mode<synchronous>, transform_indices = @transform_4, window_bounds = array<i64: 128, 128>}, {pipeline_mode = #tpu.pipeline_mode<synchronous>, transform_indices = @transform_5, window_bounds = array<i64: 128, 128>}, {pipeline_mode = #tpu.pipeline_mode<synchronous>, transform_indices = @transform_6, window_bounds = array<i64: 2, 128, 128>}, {transform_indices = @transform_7, window_bounds = array<i64: 2, 128, 16>}, {transform_indices = @transform_8, window_bounds = array<i64: 2, 16, 128>}]} {
    %c0 = arith.constant 0 : index
    %c0_0 = arith.constant 0 : index
    %0 = vector.load %arg2[%c0, %c0_0] : memref<34x16xbf16, #tpu.memory_space<vmem>>, vector<34x16xbf16>
    %c0_1 = arith.constant 0 : index
    %c0_2 = arith.constant 0 : index
    %1 = vector.load %arg4[%c0_1, %c0_2] : memref<16x16xbf16, #tpu.memory_space<vmem>>, vector<16x16xbf16>
    %c0_3 = arith.constant 0 : index
    %c0_4 = arith.constant 0 : index
    %2 = vector.load %arg1[%c0_3, %c0_4] : memref<16x2xf32, #tpu.memory_space<vmem>>, vector<16x1xf32>
    %c0_5 = arith.constant 0 : index
    %c1 = arith.constant 1 : index
    %3 = vector.load %arg1[%c0_5, %c1] : memref<16x2xf32, #tpu.memory_space<vmem>>, vector<1x1xf32>
    %c1_6 = arith.constant 1 : index
    %c1_7 = arith.constant 1 : index
    %4 = vector.load %arg1[%c1_6, %c1_7] : memref<16x2xf32, #tpu.memory_space<vmem>>, vector<1x1xf32>
    %c0_8 = arith.constant 0 : index
    %c0_9 = arith.constant 0 : index
    %c0_10 = arith.constant 0 : index
    %5 = vector.load %arg7[%c0_8, %c0_9, %c0_10] : memref<2x128x128xf32, #tpu.memory_space<vmem>>, vector<1x128x128xf32>
    %6 = vector.shape_cast %5 : vector<1x128x128xf32> to vector<128x128xf32>
    %c1_11 = arith.constant 1 : index
    %c0_12 = arith.constant 0 : index
    %c0_13 = arith.constant 0 : index
    %7 = vector.load %arg7[%c1_11, %c0_12, %c0_13] : memref<2x128x128xf32, #tpu.memory_space<vmem>>, vector<1x128x128xf32>
    %8 = vector.shape_cast %7 : vector<1x128x128xf32> to vector<128x128xf32>
    %c0_14 = arith.constant 0 : index
    %c0_15 = arith.constant 0 : index
    %c0_16 = arith.constant 0 : index
    %9 = vector.load %arg8[%c0_14, %c0_15, %c0_16] : memref<2x128x16xbf16, #tpu.memory_space<vmem>>, vector<1x128x16xbf16>
    %10 = vector.shape_cast %9 : vector<1x128x16xbf16> to vector<128x16xbf16>
    %cst = arith.constant dense<0.000000e+00> : vector<34x128xf32>
    %11 = tpu.matmul %0, %10, %cst {dimension_numbers = #tpu.dot_dimension_numbers<[1], [1], [0], [0], [0, 0, 1, 0], [], []>} : vector<34x16xbf16>, vector<128x16xbf16>, vector<34x128xf32> -> vector<34x128xf32>
    %c0_17 = arith.constant 0 : index
    %c0_18 = arith.constant 0 : index
    %12 = vector.load %arg3[%c0_17, %c0_18] : memref<32x16xbf16, #tpu.memory_space<vmem>>, vector<16x16xbf16>
    %cst_19 = arith.constant dense<0.000000e+00> : vector<128x16xf32>
    %13 = tpu.matmul %10, %12, %cst_19 {dimension_numbers = #tpu.dot_dimension_numbers<[1], [1], [0], [0], [0, 0, 1, 0], [], []>} : vector<128x16xbf16>, vector<16x16xbf16>, vector<128x16xf32> -> vector<128x16xf32>
    %14 = vector.extract_strided_slice %11 {offsets = [0, 0], sizes = [8, 128], strides = [1, 1]} : vector<34x128xf32> to vector<8x128xf32>
    %15 = vector.extract_strided_slice %13 {offsets = [0, 0], sizes = [128, 8], strides = [1, 1]} : vector<128x16xf32> to vector<128x8xf32>
    %16 = arith.truncf %15 : vector<128x8xf32> to vector<128x8xbf16>
    %17 = arith.truncf %14 : vector<8x128xf32> to vector<8x128xbf16>
    %cst_20 = arith.constant dense<0.000000e+00> : vector<128x128xf32>
    %18 = tpu.matmul %16, %17, %cst_20 {dimension_numbers = #tpu.dot_dimension_numbers<[1], [0], [0], [1], [0, 0, 1, 1], [], []>} : vector<128x8xbf16>, vector<8x128xbf16>, vector<128x128xf32> -> vector<128x128xf32>
    %19 = arith.mulf %18, %6 : vector<128x128xf32>
    %cst_21 = arith.constant dense<0.000000e+00> : vector<128xf32>
    %20 = vector.multi_reduction <add>, %19, %cst_21 [0] : vector<128x128xf32> to vector<128xf32>
    %21 = vector.shape_cast %20 : vector<128xf32> to vector<1x128xf32>
    %c16 = arith.constant 16 : index
    %c0_22 = arith.constant 0 : index
    %22 = vector.load %arg3[%c16, %c0_22] : memref<32x16xbf16, #tpu.memory_space<vmem>>, vector<16x16xbf16>
    %cst_23 = arith.constant dense<0.000000e+00> : vector<128x16xf32>
    %23 = tpu.matmul %10, %22, %cst_23 {dimension_numbers = #tpu.dot_dimension_numbers<[1], [1], [0], [0], [0, 0, 1, 0], [], []>} : vector<128x16xbf16>, vector<16x16xbf16>, vector<128x16xf32> -> vector<128x16xf32>
    %24 = vector.extract_strided_slice %11 {offsets = [8, 0], sizes = [8, 128], strides = [1, 1]} : vector<34x128xf32> to vector<8x128xf32>
    %25 = vector.extract_strided_slice %23 {offsets = [0, 0], sizes = [128, 8], strides = [1, 1]} : vector<128x16xf32> to vector<128x8xf32>
    %26 = arith.truncf %25 : vector<128x8xf32> to vector<128x8xbf16>
    %27 = arith.truncf %24 : vector<8x128xf32> to vector<8x128xbf16>
    %cst_24 = arith.constant dense<0.000000e+00> : vector<128x128xf32>
    %28 = tpu.matmul %26, %27, %cst_24 {dimension_numbers = #tpu.dot_dimension_numbers<[1], [0], [0], [1], [0, 0, 1, 1], [], []>} : vector<128x8xbf16>, vector<8x128xbf16>, vector<128x128xf32> -> vector<128x128xf32>
    %29 = arith.mulf %28, %6 : vector<128x128xf32>
    %cst_25 = arith.constant dense<0.000000e+00> : vector<128xf32>
    %30 = vector.multi_reduction <add>, %29, %cst_25 [0] : vector<128x128xf32> to vector<128xf32>
    %31 = vector.shape_cast %30 : vector<128xf32> to vector<1x128xf32>
    %c1_26 = arith.constant 1 : index
    %c0_27 = arith.constant 0 : index
    %c0_28 = arith.constant 0 : index
    %32 = vector.load %arg8[%c1_26, %c0_27, %c0_28] : memref<2x128x16xbf16, #tpu.memory_space<vmem>>, vector<1x128x16xbf16>
    %33 = vector.shape_cast %32 : vector<1x128x16xbf16> to vector<128x16xbf16>
    %cst_29 = arith.constant dense<0.000000e+00> : vector<34x128xf32>
    %34 = tpu.matmul %0, %33, %cst_29 {dimension_numbers = #tpu.dot_dimension_numbers<[1], [1], [0], [0], [0, 0, 1, 0], [], []>} : vector<34x16xbf16>, vector<128x16xbf16>, vector<34x128xf32> -> vector<34x128xf32>
    %c0_30 = arith.constant 0 : index
    %c0_31 = arith.constant 0 : index
    %35 = vector.load %arg3[%c0_30, %c0_31] : memref<32x16xbf16, #tpu.memory_space<vmem>>, vector<16x16xbf16>
    %cst_32 = arith.constant dense<0.000000e+00> : vector<128x16xf32>
    %36 = tpu.matmul %33, %35, %cst_32 {dimension_numbers = #tpu.dot_dimension_numbers<[1], [1], [0], [0], [0, 0, 1, 0], [], []>} : vector<128x16xbf16>, vector<16x16xbf16>, vector<128x16xf32> -> vector<128x16xf32>
    %37 = vector.extract_strided_slice %34 {offsets = [0, 0], sizes = [8, 128], strides = [1, 1]} : vector<34x128xf32> to vector<8x128xf32>
    %38 = vector.extract_strided_slice %36 {offsets = [0, 0], sizes = [128, 8], strides = [1, 1]} : vector<128x16xf32> to vector<128x8xf32>
    %39 = arith.truncf %38 : vector<128x8xf32> to vector<128x8xbf16>
    %40 = arith.truncf %37 : vector<8x128xf32> to vector<8x128xbf16>
    %cst_33 = arith.constant dense<0.000000e+00> : vector<128x128xf32>
    %41 = tpu.matmul %39, %40, %cst_33 {dimension_numbers = #tpu.dot_dimension_numbers<[1], [0], [0], [1], [0, 0, 1, 1], [], []>} : vector<128x8xbf16>, vector<8x128xbf16>, vector<128x128xf32> -> vector<128x128xf32>
    %42 = arith.mulf %41, %6 : vector<128x128xf32>
    %cst_34 = arith.constant dense<0.000000e+00> : vector<128xf32>
    %43 = vector.multi_reduction <add>, %42, %cst_34 [0] : vector<128x128xf32> to vector<128xf32>
    %44 = vector.shape_cast %43 : vector<128xf32> to vector<1x128xf32>
    %c16_35 = arith.constant 16 : index
    %c0_36 = arith.constant 0 : index
    %45 = vector.load %arg3[%c16_35, %c0_36] : memref<32x16xbf16, #tpu.memory_space<vmem>>, vector<16x16xbf16>
    %cst_37 = arith.constant dense<0.000000e+00> : vector<128x16xf32>
    %46 = tpu.matmul %33, %45, %cst_37 {dimension_numbers = #tpu.dot_dimension_numbers<[1], [1], [0], [0], [0, 0, 1, 0], [], []>} : vector<128x16xbf16>, vector<16x16xbf16>, vector<128x16xf32> -> vector<128x16xf32>
    %47 = vector.extract_strided_slice %34 {offsets = [8, 0], sizes = [8, 128], strides = [1, 1]} : vector<34x128xf32> to vector<8x128xf32>
    %48 = vector.extract_strided_slice %46 {offsets = [0, 0], sizes = [128, 8], strides = [1, 1]} : vector<128x16xf32> to vector<128x8xf32>
    %49 = arith.truncf %48 : vector<128x8xf32> to vector<128x8xbf16>
    %50 = arith.truncf %47 : vector<8x128xf32> to vector<8x128xbf16>
    %cst_38 = arith.constant dense<0.000000e+00> : vector<128x128xf32>
    %51 = tpu.matmul %49, %50, %cst_38 {dimension_numbers = #tpu.dot_dimension_numbers<[1], [0], [0], [1], [0, 0, 1, 1], [], []>} : vector<128x8xbf16>, vector<8x128xbf16>, vector<128x128xf32> -> vector<128x128xf32>
    %52 = arith.mulf %51, %6 : vector<128x128xf32>
    %cst_39 = arith.constant dense<0.000000e+00> : vector<128xf32>
    %53 = vector.multi_reduction <add>, %52, %cst_39 [0] : vector<128x128xf32> to vector<128xf32>
    %54 = vector.shape_cast %53 : vector<128xf32> to vector<1x128xf32>
    %55 = tpu.concatenate %21, %31, %44, %54 in 0 : vector<1x128xf32>, vector<1x128xf32>, vector<1x128xf32>, vector<1x128xf32> -> vector<4x128xf32>
    %56 = arith.truncf %55 : vector<4x128xf32> to vector<4x128xbf16>
    %c0_40 = arith.constant 0 : index
    %c0_41 = arith.constant 0 : index
    %57 = vector.load %arg5[%c0_40, %c0_41] : memref<128x128xbf16, #tpu.memory_space<vmem>>, vector<128x128xbf16>
    %cst_42 = arith.constant dense<0.000000e+00> : vector<4x128xf32>
    %58 = tpu.matmul %56, %57, %cst_42 {dimension_numbers = #tpu.dot_dimension_numbers<[1], [0], [0], [1], [0, 0, 1, 1], [], []>} : vector<4x128xbf16>, vector<128x128xbf16>, vector<4x128xf32> -> vector<4x128xf32>
    %cst_43 = arith.constant 0.000000e+00 : f32
    %59 = vector.broadcast %cst_43 : f32 to vector<4x128xf32>
    %60 = arith.cmpf ogt, %58, %59 : vector<4x128xf32>
    %cst_44 = arith.constant 1.000000e-01 : f32
    %61 = vector.broadcast %cst_44 : f32 to vector<4x128xf32>
    %62 = arith.mulf %61, %58 : vector<4x128xf32>
    %63 = arith.select %60, %58, %62 : vector<4x128xi1>, vector<4x128xf32>
    %64 = arith.truncf %63 : vector<4x128xf32> to vector<4x128xbf16>
    %c0_45 = arith.constant 0 : index
    %c0_46 = arith.constant 0 : index
    %65 = vector.load %arg6[%c0_45, %c0_46] : memref<128x128xbf16, #tpu.memory_space<vmem>>, vector<128x128xbf16>
    %cst_47 = arith.constant dense<0.000000e+00> : vector<4x128xf32>
    %66 = tpu.matmul %64, %65, %cst_47 {dimension_numbers = #tpu.dot_dimension_numbers<[1], [0], [0], [1], [0, 0, 1, 1], [], []>} : vector<4x128xbf16>, vector<128x128xbf16>, vector<4x128xf32> -> vector<4x128xf32>
    %67 = vector.extract_strided_slice %11 {offsets = [0, 0], sizes = [8, 128], strides = [1, 1]} : vector<34x128xf32> to vector<8x128xf32>
    %68 = vector.extract_strided_slice %11 {offsets = [16, 0], sizes = [8, 128], strides = [1, 1]} : vector<34x128xf32> to vector<8x128xf32>
    %69 = vector.extract_strided_slice %11 {offsets = [32, 0], sizes = [1, 128], strides = [1, 1]} : vector<34x128xf32> to vector<1x128xf32>
    %70 = vector.broadcast %3 : vector<1x1xf32> to vector<1x128xf32>
    %71 = arith.addf %69, %70 : vector<1x128xf32>
    %72 = vector.extract_strided_slice %13 {offsets = [0, 8], sizes = [128, 1], strides = [1, 1]} : vector<128x16xf32> to vector<128x1xf32>
    %73 = vector.broadcast %4 : vector<1x1xf32> to vector<128x1xf32>
    %74 = arith.addf %72, %73 : vector<128x1xf32>
    %75 = vector.extract_strided_slice %13 {offsets = [0, 0], sizes = [128, 8], strides = [1, 1]} : vector<128x16xf32> to vector<128x8xf32>
    %76 = vector.broadcast %74 : vector<128x1xf32> to vector<128x8xf32>
    %77 = arith.mulf %75, %76 : vector<128x8xf32>
    %78 = arith.truncf %77 : vector<128x8xf32> to vector<128x8xbf16>
    %79 = vector.broadcast %71 : vector<1x128xf32> to vector<8x128xf32>
    %80 = arith.mulf %67, %79 : vector<8x128xf32>
    %81 = arith.truncf %80 : vector<8x128xf32> to vector<8x128xbf16>
    %cst_48 = arith.constant dense<0.000000e+00> : vector<128x128xf32>
    %82 = tpu.matmul %78, %81, %cst_48 {dimension_numbers = #tpu.dot_dimension_numbers<[1], [0], [0], [1], [0, 0, 1, 1], [], []>} : vector<128x8xbf16>, vector<8x128xbf16>, vector<128x128xf32> -> vector<128x128xf32>
    %83 = arith.addf %82, %8 : vector<128x128xf32>
    %cst_49 = arith.constant dense<0xFF800000> : vector<128xf32>
    %84 = vector.multi_reduction <maximumf>, %83, %cst_49 [0] : vector<128x128xf32> to vector<128xf32>
    %85 = vector.shape_cast %84 : vector<128xf32> to vector<1x128xf32>
    %86 = vector.broadcast %85 : vector<1x128xf32> to vector<128x128xf32>
    %87 = arith.subf %83, %86 : vector<128x128xf32>
    %88 = math.exp %87 : vector<128x128xf32>
    %cst_50 = arith.constant dense<0.000000e+00> : vector<128xf32>
    %89 = vector.multi_reduction <add>, %88, %cst_50 [0] : vector<128x128xf32> to vector<128xf32>
    %90 = vector.shape_cast %89 : vector<128xf32> to vector<1x128xf32>
    %91 = vector.extract_strided_slice %66 {offsets = [0, 0], sizes = [1, 128], strides = [1, 1]} : vector<4x128xf32> to vector<1x128xf32>
    %92 = vector.broadcast %91 : vector<1x128xf32> to vector<128x128xf32>
    %93 = arith.cmpf ogt, %82, %92 : vector<128x128xf32>
    %cst_51 = arith.constant 0.000000e+00 : f32
    %94 = vector.broadcast %cst_51 : f32 to vector<128x128xf32>
    %95 = arith.select %93, %88, %94 : vector<128x128xi1>, vector<128x128xf32>
    %96 = tpu.reciprocal %90 {approx = true} : vector<1x128xf32> -> vector<1x128xf32>
    %97 = vector.broadcast %96 : vector<1x128xf32> to vector<128x128xf32>
    %98 = arith.mulf %95, %97 : vector<128x128xf32>
    %99 = arith.truncf %68 : vector<8x128xf32> to vector<8x128xbf16>
    %100 = arith.truncf %98 : vector<128x128xf32> to vector<128x128xbf16>
    %cst_52 = arith.constant dense<0.000000e+00> : vector<8x128xf32>
    %101 = tpu.matmul %99, %100, %cst_52 {dimension_numbers = #tpu.dot_dimension_numbers<[1], [0], [0], [1], [0, 0, 1, 1], [], []>} : vector<8x128xbf16>, vector<128x128xbf16>, vector<8x128xf32> -> vector<8x128xf32>
    %102 = vector.extract_strided_slice %11 {offsets = [8, 0], sizes = [8, 128], strides = [1, 1]} : vector<34x128xf32> to vector<8x128xf32>
    %103 = vector.extract_strided_slice %11 {offsets = [24, 0], sizes = [8, 128], strides = [1, 1]} : vector<34x128xf32> to vector<8x128xf32>
    %104 = vector.extract_strided_slice %11 {offsets = [33, 0], sizes = [1, 128], strides = [1, 1]} : vector<34x128xf32> to vector<1x128xf32>
    %105 = vector.broadcast %3 : vector<1x1xf32> to vector<1x128xf32>
    %106 = arith.addf %104, %105 : vector<1x128xf32>
    %107 = vector.extract_strided_slice %23 {offsets = [0, 8], sizes = [128, 1], strides = [1, 1]} : vector<128x16xf32> to vector<128x1xf32>
    %108 = vector.broadcast %4 : vector<1x1xf32> to vector<128x1xf32>
    %109 = arith.addf %107, %108 : vector<128x1xf32>
    %110 = vector.extract_strided_slice %23 {offsets = [0, 0], sizes = [128, 8], strides = [1, 1]} : vector<128x16xf32> to vector<128x8xf32>
    %111 = vector.broadcast %109 : vector<128x1xf32> to vector<128x8xf32>
    %112 = arith.mulf %110, %111 : vector<128x8xf32>
    %113 = arith.truncf %112 : vector<128x8xf32> to vector<128x8xbf16>
    %114 = vector.broadcast %106 : vector<1x128xf32> to vector<8x128xf32>
    %115 = arith.mulf %102, %114 : vector<8x128xf32>
    %116 = arith.truncf %115 : vector<8x128xf32> to vector<8x128xbf16>
    %cst_53 = arith.constant dense<0.000000e+00> : vector<128x128xf32>
    %117 = tpu.matmul %113, %116, %cst_53 {dimension_numbers = #tpu.dot_dimension_numbers<[1], [0], [0], [1], [0, 0, 1, 1], [], []>} : vector<128x8xbf16>, vector<8x128xbf16>, vector<128x128xf32> -> vector<128x128xf32>
    %118 = arith.addf %117, %8 : vector<128x128xf32>
    %cst_54 = arith.constant dense<0xFF800000> : vector<128xf32>
    %119 = vector.multi_reduction <maximumf>, %118, %cst_54 [0] : vector<128x128xf32> to vector<128xf32>
    %120 = vector.shape_cast %119 : vector<128xf32> to vector<1x128xf32>
    %121 = vector.broadcast %120 : vector<1x128xf32> to vector<128x128xf32>
    %122 = arith.subf %118, %121 : vector<128x128xf32>
    %123 = math.exp %122 : vector<128x128xf32>
    %cst_55 = arith.constant dense<0.000000e+00> : vector<128xf32>
    %124 = vector.multi_reduction <add>, %123, %cst_55 [0] : vector<128x128xf32> to vector<128xf32>
    %125 = vector.shape_cast %124 : vector<128xf32> to vector<1x128xf32>
    %126 = vector.extract_strided_slice %66 {offsets = [1, 0], sizes = [1, 128], strides = [1, 1]} : vector<4x128xf32> to vector<1x128xf32>
    %127 = vector.broadcast %126 : vector<1x128xf32> to vector<128x128xf32>
    %128 = arith.cmpf ogt, %117, %127 : vector<128x128xf32>
    %cst_56 = arith.constant 0.000000e+00 : f32
    %129 = vector.broadcast %cst_56 : f32 to vector<128x128xf32>
    %130 = arith.select %128, %123, %129 : vector<128x128xi1>, vector<128x128xf32>
    %131 = tpu.reciprocal %125 {approx = true} : vector<1x128xf32> -> vector<1x128xf32>
    %132 = vector.broadcast %131 : vector<1x128xf32> to vector<128x128xf32>
    %133 = arith.mulf %130, %132 : vector<128x128xf32>
    %134 = arith.truncf %103 : vector<8x128xf32> to vector<8x128xbf16>
    %135 = arith.truncf %133 : vector<128x128xf32> to vector<128x128xbf16>
    %cst_57 = arith.constant dense<0.000000e+00> : vector<8x128xf32>
    %136 = tpu.matmul %134, %135, %cst_57 {dimension_numbers = #tpu.dot_dimension_numbers<[1], [0], [0], [1], [0, 0, 1, 1], [], []>} : vector<8x128xbf16>, vector<128x128xbf16>, vector<8x128xf32> -> vector<8x128xf32>
    %137 = tpu.concatenate %101, %136 in 0 : vector<8x128xf32>, vector<8x128xf32> -> vector<16x128xf32>
    %138 = arith.truncf %137 : vector<16x128xf32> to vector<16x128xbf16>
    %cst_58 = arith.constant dense<0.000000e+00> : vector<16x128xf32>
    %139 = tpu.matmul %1, %138, %cst_58 {dimension_numbers = #tpu.dot_dimension_numbers<[1], [0], [0], [1], [0, 0, 1, 1], [], []>} : vector<16x16xbf16>, vector<16x128xbf16>, vector<16x128xf32> -> vector<16x128xf32>
    %140 = vector.broadcast %2 : vector<16x1xf32> to vector<16x128xf32>
    %141 = arith.addf %139, %140 : vector<16x128xf32>
    %c0_59 = arith.constant 0 : index
    %c0_60 = arith.constant 0 : index
    %c0_61 = arith.constant 0 : index
    %142 = vector.load %arg9[%c0_59, %c0_60, %c0_61] : memref<2x16x128xf32, #tpu.memory_space<vmem>>, vector<1x16x128xf32>
    %143 = vector.shape_cast %142 : vector<1x16x128xf32> to vector<16x128xf32>
    %144 = vector.shape_cast %141 : vector<16x128xf32> to vector<1x16x128xf32>
    tpu.vector_store %arg9[%c0_59, %c0_60, %c0_61], %144 {strides = array<i32>} : memref<2x16x128xf32, #tpu.memory_space<vmem>>, vector<1x16x128xf32>,
    %145 = vector.extract_strided_slice %34 {offsets = [0, 0], sizes = [8, 128], strides = [1, 1]} : vector<34x128xf32> to vector<8x128xf32>
    %146 = vector.extract_strided_slice %34 {offsets = [16, 0], sizes = [8, 128], strides = [1, 1]} : vector<34x128xf32> to vector<8x128xf32>
    %147 = vector.extract_strided_slice %34 {offsets = [32, 0], sizes = [1, 128], strides = [1, 1]} : vector<34x128xf32> to vector<1x128xf32>
    %148 = vector.broadcast %3 : vector<1x1xf32> to vector<1x128xf32>
    %149 = arith.addf %147, %148 : vector<1x128xf32>
    %150 = vector.extract_strided_slice %36 {offsets = [0, 8], sizes = [128, 1], strides = [1, 1]} : vector<128x16xf32> to vector<128x1xf32>
    %151 = vector.broadcast %4 : vector<1x1xf32> to vector<128x1xf32>
    %152 = arith.addf %150, %151 : vector<128x1xf32>
    %153 = vector.extract_strided_slice %36 {offsets = [0, 0], sizes = [128, 8], strides = [1, 1]} : vector<128x16xf32> to vector<128x8xf32>
    %154 = vector.broadcast %152 : vector<128x1xf32> to vector<128x8xf32>
    %155 = arith.mulf %153, %154 : vector<128x8xf32>
    %156 = arith.truncf %155 : vector<128x8xf32> to vector<128x8xbf16>
    %157 = vector.broadcast %149 : vector<1x128xf32> to vector<8x128xf32>
    %158 = arith.mulf %145, %157 : vector<8x128xf32>
    %159 = arith.truncf %158 : vector<8x128xf32> to vector<8x128xbf16>
    %cst_62 = arith.constant dense<0.000000e+00> : vector<128x128xf32>
    %160 = tpu.matmul %156, %159, %cst_62 {dimension_numbers = #tpu.dot_dimension_numbers<[1], [0], [0], [1], [0, 0, 1, 1], [], []>} : vector<128x8xbf16>, vector<8x128xbf16>, vector<128x128xf32> -> vector<128x128xf32>
    %161 = arith.addf %160, %8 : vector<128x128xf32>
    %cst_63 = arith.constant dense<0xFF800000> : vector<128xf32>
    %162 = vector.multi_reduction <maximumf>, %161, %cst_63 [0] : vector<128x128xf32> to vector<128xf32>
    %163 = vector.shape_cast %162 : vector<128xf32> to vector<1x128xf32>
    %164 = vector.broadcast %163 : vector<1x128xf32> to vector<128x128xf32>
    %165 = arith.subf %161, %164 : vector<128x128xf32>
    %166 = math.exp %165 : vector<128x128xf32>
    %cst_64 = arith.constant dense<0.000000e+00> : vector<128xf32>
    %167 = vector.multi_reduction <add>, %166, %cst_64 [0] : vector<128x128xf32> to vector<128xf32>
    %168 = vector.shape_cast %167 : vector<128xf32> to vector<1x128xf32>
    %169 = vector.extract_strided_slice %66 {offsets = [2, 0], sizes = [1, 128], strides = [1, 1]} : vector<4x128xf32> to vector<1x128xf32>
    %170 = vector.broadcast %169 : vector<1x128xf32> to vector<128x128xf32>
    %171 = arith.cmpf ogt, %160, %170 : vector<128x128xf32>
    %cst_65 = arith.constant 0.000000e+00 : f32
    %172 = vector.broadcast %cst_65 : f32 to vector<128x128xf32>
    %173 = arith.select %171, %166, %172 : vector<128x128xi1>, vector<128x128xf32>
    %174 = tpu.reciprocal %168 {approx = true} : vector<1x128xf32> -> vector<1x128xf32>
    %175 = vector.broadcast %174 : vector<1x128xf32> to vector<128x128xf32>
    %176 = arith.mulf %173, %175 : vector<128x128xf32>
    %177 = arith.truncf %146 : vector<8x128xf32> to vector<8x128xbf16>
    %178 = arith.truncf %176 : vector<128x128xf32> to vector<128x128xbf16>
    %cst_66 = arith.constant dense<0.000000e+00> : vector<8x128xf32>
    %179 = tpu.matmul %177, %178, %cst_66 {dimension_numbers = #tpu.dot_dimension_numbers<[1], [0], [0], [1], [0, 0, 1, 1], [], []>} : vector<8x128xbf16>, vector<128x128xbf16>, vector<8x128xf32> -> vector<8x128xf32>
    %180 = vector.extract_strided_slice %34 {offsets = [8, 0], sizes = [8, 128], strides = [1, 1]} : vector<34x128xf32> to vector<8x128xf32>
    %181 = vector.extract_strided_slice %34 {offsets = [24, 0], sizes = [8, 128], strides = [1, 1]} : vector<34x128xf32> to vector<8x128xf32>
    %182 = vector.extract_strided_slice %34 {offsets = [33, 0], sizes = [1, 128], strides = [1, 1]} : vector<34x128xf32> to vector<1x128xf32>
    %183 = vector.broadcast %3 : vector<1x1xf32> to vector<1x128xf32>
    %184 = arith.addf %182, %183 : vector<1x128xf32>
    %185 = vector.extract_strided_slice %46 {offsets = [0, 8], sizes = [128, 1], strides = [1, 1]} : vector<128x16xf32> to vector<128x1xf32>
    %186 = vector.broadcast %4 : vector<1x1xf32> to vector<128x1xf32>
    %187 = arith.addf %185, %186 : vector<128x1xf32>
    %188 = vector.extract_strided_slice %46 {offsets = [0, 0], sizes = [128, 8], strides = [1, 1]} : vector<128x16xf32> to vector<128x8xf32>
    %189 = vector.broadcast %187 : vector<128x1xf32> to vector<128x8xf32>
    %190 = arith.mulf %188, %189 : vector<128x8xf32>
    %191 = arith.truncf %190 : vector<128x8xf32> to vector<128x8xbf16>
    %192 = vector.broadcast %184 : vector<1x128xf32> to vector<8x128xf32>
    %193 = arith.mulf %180, %192 : vector<8x128xf32>
    %194 = arith.truncf %193 : vector<8x128xf32> to vector<8x128xbf16>
    %cst_67 = arith.constant dense<0.000000e+00> : vector<128x128xf32>
    %195 = tpu.matmul %191, %194, %cst_67 {dimension_numbers = #tpu.dot_dimension_numbers<[1], [0], [0], [1], [0, 0, 1, 1], [], []>} : vector<128x8xbf16>, vector<8x128xbf16>, vector<128x128xf32> -> vector<128x128xf32>
    %196 = arith.addf %195, %8 : vector<128x128xf32>
    %cst_68 = arith.constant dense<0xFF800000> : vector<128xf32>
    %197 = vector.multi_reduction <maximumf>, %196, %cst_68 [0] : vector<128x128xf32> to vector<128xf32>
    %198 = vector.shape_cast %197 : vector<128xf32> to vector<1x128xf32>
    %199 = vector.broadcast %198 : vector<1x128xf32> to vector<128x128xf32>
    %200 = arith.subf %196, %199 : vector<128x128xf32>
    %201 = math.exp %200 : vector<128x128xf32>
    %cst_69 = arith.constant dense<0.000000e+00> : vector<128xf32>
    %202 = vector.multi_reduction <add>, %201, %cst_69 [0] : vector<128x128xf32> to vector<128xf32>
    %203 = vector.shape_cast %202 : vector<128xf32> to vector<1x128xf32>
    %204 = vector.extract_strided_slice %66 {offsets = [3, 0], sizes = [1, 128], strides = [1, 1]} : vector<4x128xf32> to vector<1x128xf32>
    %205 = vector.broadcast %204 : vector<1x128xf32> to vector<128x128xf32>
    %206 = arith.cmpf ogt, %195, %205 : vector<128x128xf32>
    %cst_70 = arith.constant 0.000000e+00 : f32
    %207 = vector.broadcast %cst_70 : f32 to vector<128x128xf32>
    %208 = arith.select %206, %201, %207 : vector<128x128xi1>, vector<128x128xf32>
    %209 = tpu.reciprocal %203 {approx = true} : vector<1x128xf32> -> vector<1x128xf32>
    %210 = vector.broadcast %209 : vector<1x128xf32> to vector<128x128xf32>
    %211 = arith.mulf %208, %210 : vector<128x128xf32>
    %212 = arith.truncf %181 : vector<8x128xf32> to vector<8x128xbf16>
    %213 = arith.truncf %211 : vector<128x128xf32> to vector<128x128xbf16>
    %cst_71 = arith.constant dense<0.000000e+00> : vector<8x128xf32>
    %214 = tpu.matmul %212, %213, %cst_71 {dimension_numbers = #tpu.dot_dimension_numbers<[1], [0], [0], [1], [0, 0, 1, 1], [], []>} : vector<8x128xbf16>, vector<128x128xbf16>, vector<8x128xf32> -> vector<8x128xf32>
    %215 = tpu.concatenate %179, %214 in 0 : vector<8x128xf32>, vector<8x128xf32> -> vector<16x128xf32>
    %216 = arith.truncf %215 : vector<16x128xf32> to vector<16x128xbf16>
    %cst_72 = arith.constant dense<0.000000e+00> : vector<16x128xf32>
    %217 = tpu.matmul %1, %216, %cst_72 {dimension_numbers = #tpu.dot_dimension_numbers<[1], [0], [0], [1], [0, 0, 1, 1], [], []>} : vector<16x16xbf16>, vector<16x128xbf16>, vector<16x128xf32> -> vector<16x128xf32>
    %218 = vector.broadcast %2 : vector<16x1xf32> to vector<16x128xf32>
    %219 = arith.addf %217, %218 : vector<16x128xf32>
    %c1_73 = arith.constant 1 : index
    %c0_74 = arith.constant 0 : index
    %c0_75 = arith.constant 0 : index
    %220 = vector.load %arg9[%c1_73, %c0_74, %c0_75] : memref<2x16x128xf32, #tpu.memory_space<vmem>>, vector<1x16x128xf32>
    %221 = vector.shape_cast %220 : vector<1x16x128xf32> to vector<16x128xf32>
    %222 = vector.shape_cast %219 : vector<16x128xf32> to vector<1x16x128xf32>
    tpu.vector_store %arg9[%c1_73, %c0_74, %c0_75], %222 {strides = array<i32>} : memref<2x16x128xf32, #tpu.memory_space<vmem>>, vector<1x16x128xf32>,
    return
  }
  func.func @transform_0(%arg0: i32) -> (i32, i32) {
    %c0_i32 = arith.constant 0 : i32
    %c0_i32_0 = arith.constant 0 : i32
    %c0_i32_1 = arith.constant 0 : i32
    return %c0_i32, %c0_i32_0 : i32, i32
  }
  func.func @transform_1(%arg0: i32) -> (i32, i32) {
    %c0_i32 = arith.constant 0 : i32
    %c0_i32_0 = arith.constant 0 : i32
    %c0_i32_1 = arith.constant 0 : i32
    return %c0_i32, %c0_i32_0 : i32, i32
  }
  func.func @transform_2(%arg0: i32) -> (i32, i32) {
    %c0_i32 = arith.constant 0 : i32
    %c0_i32_0 = arith.constant 0 : i32
    %c0_i32_1 = arith.constant 0 : i32
    return %c0_i32, %c0_i32_0 : i32, i32
  }
  func.func @transform_3(%arg0: i32) -> (i32, i32) {
    %c0_i32 = arith.constant 0 : i32
    %c0_i32_0 = arith.constant 0 : i32
    %c0_i32_1 = arith.constant 0 : i32
    return %c0_i32, %c0_i32_0 : i32, i32
  }
  func.func @transform_4(%arg0: i32) -> (i32, i32) {
    %c0_i32 = arith.constant 0 : i32
    %c0_i32_0 = arith.constant 0 : i32
    %c0_i32_1 = arith.constant 0 : i32
    return %c0_i32, %c0_i32_0 : i32, i32
  }
  func.func @transform_5(%arg0: i32) -> (i32, i32) {
    %c0_i32 = arith.constant 0 : i32
    %c0_i32_0 = arith.constant 0 : i32
    %c0_i32_1 = arith.constant 0 : i32
    return %c0_i32, %c0_i32_0 : i32, i32
  }
  func.func @transform_6(%arg0: i32) -> (i32, i32, i32) {
    %c0_i32 = arith.constant 0 : i32
    %c0_i32_0 = arith.constant 0 : i32
    %c0_i32_1 = arith.constant 0 : i32
    %c0_i32_2 = arith.constant 0 : i32
    return %c0_i32, %c0_i32_0, %c0_i32_1 : i32, i32, i32
  }
  func.func @transform_7(%arg0: i32) -> (i32, i32, i32) {
    %c0_i32 = arith.constant 0 : i32
    %c0_i32_0 = arith.constant 0 : i32
    %c0_i32_1 = arith.constant 0 : i32
    return %arg0, %c0_i32, %c0_i32_0 : i32, i32, i32
  }
  func.func @transform_8(%arg0: i32) -> (i32, i32, i32) {
    %c0_i32 = arith.constant 0 : i32
    %c0_i32_0 = arith.constant 0 : i32
    %c0_i32_1 = arith.constant 0 : i32
    return %arg0, %c0_i32, %c0_i32_0 : i32, i32, i32
  }
}

</mosaic_0001>

<bundles_post_ra>
// kernel: fa_forward.1
= control target key start
LH: loop header
LB: loop body
LE: loop exit
PB: predicated region body
PF: predicated region fallthrough
CT: control target
= control target key end

     0   :  { %s5061_s27 = smov 0   ;;  %s7434_s0 = inlined_call_operand.vmem [shape: f32[16,2], index: 0, kind: input, shape index: {}]   ;;  %s7435_s1 = inlined_call_operand.vmem [shape: bf16[34,16], index: 1, kind: input, shape index: {}]   ;;  %s7436_s2 = inlined_call_operand.vmem [shape: bf16[32,16], index: 2, kind: input, shape index: {}]   ;;  %s7437_s3 = inlined_call_operand.vmem [shape: bf16[16,16], index: 3, kind: input, shape index: {}]   ;;  %s7438_s4 = inlined_call_operand.vmem [shape: bf16[128,128], index: 4, kind: input, shape index: {}]   ;;  %s7439_s5 = inlined_call_operand.vmem [shape: bf16[128,128], index: 5, kind: input, shape index: {}]   ;;  %s7440_s6 = inlined_call_operand.vmem [shape: f32[2,128,128], index: 6, kind: input, shape index: {}]   ;;  %s7441_s7 = inlined_call_operand.vmem [shape: bf16[4,128,16], index: 7, kind: input, shape index: {}]   ;;  %s7442_s8 = inlined_call_operand.vmem [shape: f32[4,16,128], index: 8, kind: output, shape index: {}]  }
   0x1 LB: > { %s3980_s28 = sadd.s32 4294967295, %s5008_s27   ;;  %p3984_p0 = scmp.ge.s32.totalorder %s5008_s27, 1  ;;  %s5008_s27 = sphi %s5061_s27, %s18_s27  }
   0x2   : > { %p264_p1 = scmp.lt.s32.totalorder %s5008_s27, 3 }
   0x4   : > { %p265_p2 = pnand %p3984_p0, %p264_p1 }
   0x6   : > { %268 = sbr.rel (%p265_p2) target bundleno = 2544 (0x9f0), region = 52 }
   0xb   : > { %vm7517_vm0 = vcmask 130048   ;;  %v5072_v0 = vld [vmem:[%s7436_s2] sm:$0xff]   ;;  %s3985_s9 = sshll.u32 %s3980_s28, 1  ;;  %v7444_v2 = vmov 0.0   ;;  %vm5011_vm1 = vmmov 0   ;;  %s5012_s12 = smov 7  }
   0xc   : > { %4764 = vmatprep.subr.msk.bf16.mxu1 %vm7517_vm0, %v5072_v0  ;;  %v5078_v1 = vsel %vm7517_vm0, %v5072_v0, 0  ;;  %4360 = vmatprep.subr.bf16.mxu0 %v7444_v2  ;;  %p301_p3 = scmp.lt.s32.totalorder %s3985_s9, 3  ;;  %v4130_v3 = vld [vmem:[%s7434_s0 + $0x1] ss:$0 sm:$0xff]  ;;  %v324_v4 = vld [vmem:[%s7434_s0] sm:$0x1] }
   0xd   : > { %4389 = vmatpush3.bf16.xpose.msra.mxu1 %v5078_v1  ;;  %4376 = vmatprep.mubr.msk.bf16.mxu0 %vm5011_vm1, %v7444_v2  ;;  %v5013_v5 = vmov 1   ;;  %v5164_v22 = vld [vmem:[%s7435_s1] sm:$0xff]   ;;  %v7443_v23 = vmov 8   ;;  %v5175_v24 = vld [vmem:[%s7435_s1 + $0x8] sm:$0xff]   ;;  %vm7518_vm2 = vcmask 64512   ;;  %vm7519_vm3 = vcmask 1043456  }
   0xe   : > { %s7778_s9 = smov (!%p301_p3, %s3985_s9), 3  ;;  %1975 = vrot.lane.b32.xlu0 %v4130_v3, %s5012_s12  ;;  %4791 = vset.pattern.permute.xlu1 %v7443_v23  ;;  %v5184_v25 = vld [vmem:[%s7435_s1 + $0x10] ss:$0 sps:$4 sm:$0x11]   ;;  %v5256_v60 = vld [vmem:[%s7436_s2 + $0x8] sm:$0xff]   ;;  %vm1745_vm4 = vcmask 1040384  }
   0xf   : > { %s4170_s15 = sshll.u32 %s7778_s9, 6  ;;  %4790 = vset.pattern.permute.xlu0 %v5013_v5  ;;  %vm1747_vm5 = vcmask 1041408   ;;  %vm1749_vm6 = vcmask 1042432   ;;  %s4171_s13 = sshll.u32 %s7778_s9, 4 }
  0x10   : > { %s5096_s18 = scalar_lea.vmem %s7441_s7, %s4170_s15  ;;  %s7200_s16 = scalar_lea.vmem %s7442_s8, %s4171_s13 }
  0x11   : > { %v5099_v6 = vld [vmem:[%s5096_s18] sm:$0xff]   ;;  %v5102_v7 = vld [vmem:[%s5096_s18 + $0x38] sm:$0xff]   ;;  %v5107_v8 = vld [vmem:[%s5096_s18 + $0x8] sm:$0xff]  }
  0x12   : > { %1966 = vperm.xlu0 %4790, %v324_v4   ;;  %4390 = vmatprep.mubr.msk.bf16.mxu1 %vm7517_vm0, %v5099_v6  ;;  %v460_v9 = vsel %vm7517_vm0, %v5102_v7, 0  ;;  %v5112_v10 = vld [vmem:[%s5096_s18 + $0x10] sm:$0xff]   ;;  %v5123_v12 = vld [vmem:[%s5096_s18 + $0x28] sm:$0xff]   ;;  %v5128_v14 = vld [vmem:[%s5096_s18 + $0x18] sm:$0xff]   ;;  %v442_v20 = vsel %vm7517_vm0, %v5107_v8, 0  ;;  %v439_v21 = vsel %vm7517_vm0, %v5099_v6, 0 }
  0x13   : > { %4361 = vmatpush3.bf16.xpose.msra.mxu0 %v460_v9  ;;  %v5117_v11 = vld [vmem:[%s5096_s18 + $0x30] sm:$0xff]   ;;  %v5131_v15 = vld [vmem:[%s5096_s18 + $0x20] sm:$0xff]   ;;  %v454_v16 = vsel %vm7517_vm0, %v5123_v12, 0  ;;  %v448_v18 = vsel %vm7517_vm0, %v5128_v14, 0  ;;  %v445_v19 = vsel %vm7517_vm0, %v5112_v10, 0 }
  0x14   : > { %4391 = vmatmul.mubr.msk.bf16.vlgmr.msra.gmra.mxu1 %vm7517_vm0, %v5107_v8  ;;  %4362 = vmatprep.subr.bf16.mxu0 %v7444_v2  ;;  %v457_v13 = vsel %vm7517_vm0, %v5117_v11, 0  ;;  %v451_v17 = vsel %vm7517_vm0, %v5131_v15, 0 }
  0x15   : > { %4394 = vmatprep.mubr.msk.bf16.mxu1 %vm7517_vm0, %v5112_v10 }
  0x16   : > { %4792 = vset.pattern.permute.xlu0 %v7443_v23 }
  0x1b   : > { %4363 = vmatpush3.bf16.xpose.msra.mxu0 %v457_v13  ;;  %v5268_v13 = vsel %vm7517_vm0, %v5256_v60, 0 }
  0x1c   : > { %4395 = vmatmul.mubr.msk.bf16.gmra.mxu1 %vm7517_vm0, %v5128_v14  ;;  %4364 = vmatprep.subr.bf16.mxu0 %v7444_v2 }
  0x1d   : > { %4398 = vmatprep.mubr.msk.bf16.mxu1 %vm7517_vm0, %v5131_v15 }
  0x23   : > { %4365 = vmatpush3.bf16.xpose.msra.mxu0 %v454_v16 }
  0x24   : > { %4399 = vmatmul.mubr.msk.bf16.gmra.mxu1 %vm7517_vm0, %v5123_v12  ;;  %4366 = vmatprep.subr.bf16.mxu0 %v7444_v2 }
  0x25   : > { %4402 = vmatprep.mubr.msk.bf16.mxu1 %vm7517_vm0, %v5117_v11 }
  0x2b   : > { %4367 = vmatpush3.bf16.xpose.msra.mxu0 %v451_v17  ;;  %v2098_v17 = vlaneseq }
  0x2c   : > { %4403 = vmatmul.mubr.msk.bf16.gmra.mxu1 %vm7517_vm0, %v5102_v7  ;;  %4368 = vmatprep.subr.bf16.mxu0 %v7444_v2 }
  0x33   : > { %4369 = vmatpush3.bf16.xpose.msra.mxu0 %v448_v18 }
  0x34   : > { %4370 = vmatprep.subr.bf16.mxu0 %v7444_v2 }
  0x3b   : > { %4371 = vmatpush3.bf16.xpose.msra.mxu0 %v445_v19 }
  0x3c   : > { %4372 = vmatprep.subr.bf16.mxu0 %v7444_v2 }
  0x43   : > { %4373 = vmatpush3.bf16.xpose.msra.mxu0 %v442_v20 }
  0x44   : > { %4374 = vmatprep.subr.bf16.mxu0 %v7444_v2 }
  0x4b   : > { %4375 = vmatpush3.bf16.xpose.msra.mxu0 %v439_v21  ;;  %v5282_v21 = vshrl.u32 %v2098_v17, 7  ;;  %v5378_v17 = vld [vmem:[%s5096_s18 + $0x40] sm:$0xff]  }
  0x4d   : > { %7541 = vst [vmem:[#allocation17_spill] sm:$0xff] %v5282_v21 }
  0x52   : > { %4377 = vmatmul.mubr.msk.bf16.vlgmr.msra.gmra.mxu0 %vm7517_vm0, %v5164_v22 }
  0x53   : > { %4380 = vmatprep.mubr.msk.bf16.mxu0 %vm5011_vm1, %v7444_v2 }
  0x5a   : > { %4381 = vmatmul.mubr.msk.bf16.gmra.mxu0 %vm7517_vm0, %v5175_v24 }
  0x5b   : > { %4384 = vmatprep.mubr.msk.bf16.mxu0 %vm5011_vm1, %v7444_v2 }
  0x62   : > { %4385 = vmatmul.mubr.msk.bf16.gmra.mxu0 %vm7517_vm0, %v5184_v25 }
  0x80   : > { %v5188_v26 = vpop.permute.xlu0 %1975 }
  0x8d   : > { %v5279_v20 = vpop.permute.xlu0 %1966 }
  0xd4   : > { %v5190_v27 = vpop.f32.mrf.mxu1 }
  0xd5   : > { %7526 = vst [vmem:[#allocation2_spill] sm:$0xff] %v5190_v27  ;;  %v1980_v28 = vadd.f32 %v5190_v27, %v5188_v26 }
  0xd6   : > { %v5194_v29 = vpop.f32.mrf.mxu1 }
  0xd7   : > { %v1978_v30 = vadd.f32 %v5188_v26, %v5194_v29  ;;  %2006 = vperm.xlu1 %4791, %v1980_v28  }
  0xd8   : > { %v5198_v31 = vpop.f32.mrf.mxu1 }
  0xd9   : > { %7527 = vst [vmem:[#allocation3_spill] sm:$0xff] %v5198_v31  ;;  %v1981_v33 = vadd.f32 %v5198_v31, %v5188_v26  ;;  %v626_v4 = vpack.c.bf16 %v5198_v31, %v5190_v27 }
  0xda   : > { %v5200_v32 = vpop.f32.mrf.mxu1 }
  0xdb   : > { %v625_v34 = vpack.c.bf16 %v5200_v32, %v5194_v29  ;;  %1996 = vperm.xlu1 %4791, %v1978_v30   ;;  %v1979_v39 = vadd.f32 %v5188_v26, %v5200_v32 }
  0xdc   : > { %v5206_v35 = vpop.f32.mrf.mxu1 }
  0xdd   : > { %7528 = vst [vmem:[#allocation4_spill] sm:$0xff] %v5206_v35  ;;  %v1984_v36 = vadd.f32 %v5206_v35, %v5188_v26  ;;  %4408 = vmatprep.mubr.msk.bf16.mxu1 %vm7518_vm2, %v625_v34  ;;  %v7446_v34 = vrot.slane %v5279_v20, 7 }
  0xde   : > { %v5211_v37 = vpop.f32.mrf.mxu1 }
  0xdf   : > { %7529 = vst [vmem:[#allocation5_spill] sm:$0xff] %v5211_v37  ;;  %v1982_v38 = vadd.f32 %v5188_v26, %v5211_v37  ;;  %2011 = vperm.xlu1 %4791, %v1981_v33   ;;  %2026 = vperm.xlu0 %4792, %v1984_v36  }
  0xe0   : > { %v5217_v40 = vpop.f32.mrf.mxu1 }
  0xe1   : > { %7530 = vst [vmem:[#allocation6_spill] sm:$0xff] %v5217_v40  ;;  %v1985_v42 = vadd.f32 %v5217_v40, %v5188_v26  ;;  %v628_v33 = vpack.c.bf16 %v5217_v40, %v5206_v35 }
  0xe2   : > { %v5219_v41 = vpop.f32.mrf.mxu1 }
  0xe3   : > { %7531 = vst [vmem:[#allocation7_spill] sm:$0xff] %v5219_v41  ;;  %2001 = vperm.xlu1 %4791, %v1979_v39   ;;  %2016 = vperm.xlu0 %4792, %v1982_v38   ;;  %v1983_v47 = vadd.f32 %v5188_v26, %v5219_v41  ;;  %v627_v63 = vpack.c.bf16 %v5219_v41, %v5211_v37  ;;  %v5296_v38 = vsub.s32 1, %v5282_v21 }
  0xe4   : > { %v5223_v43 = vpop.f32.mrf.mxu1 }
  0xe5   : > { %7532 = vst [vmem:[#allocation8_spill] sm:$0xff] %v5223_v43  ;;  %v1988_v44 = vadd.f32 %v5223_v43, %v5188_v26  ;;  %7544 = vst [vmem:[#allocation20_spill] sm:$0xff] %v5296_v38 }
  0xe6   : > { %v5227_v45 = vpop.f32.mrf.mxu1 }
  0xe7   : > { %7533 = vst [vmem:[#allocation9_spill] sm:$0xff] %v5227_v45  ;;  %v1986_v46 = vadd.f32 %v5188_v26, %v5227_v45  ;;  %2031 = vperm.xlu1 %4791, %v1985_v42   ;;  %2046 = vperm.xlu0 %4792, %v1988_v44  }
  0xe8   : > { %v5233_v48 = vpop.f32.mrf.mxu1 }
  0xe9   : > { %7534 = vst [vmem:[#allocation10_spill] sm:$0xff] %v5233_v48  ;;  %v1989_v50 = vadd.f32 %v5233_v48, %v5188_v26 }
  0xea   : > { %v5235_v49 = vpop.f32.mrf.mxu1 }
  0xeb   : > { %7535 = vst [vmem:[#allocation11_spill] sm:$0xff] %v5235_v49  ;;  %2021 = vperm.xlu1 %4791, %v1983_v47   ;;  %2036 = vperm.xlu0 %4792, %v1986_v46   ;;  %v1987_v54 = vadd.f32 %v5188_v26, %v5235_v49  ;;  %v629_v28 = vpack.c.bf16 %v5235_v49, %v5227_v45 }
  0xec   : > { %v5239_v51 = vpop.f32.mrf.mxu1 }
  0xed   : > { %7536 = vst [vmem:[#allocation12_spill] sm:$0xff] %v5239_v51 }
  0xee   : > { %v5241_v52 = vpop.f32.mrf.mxu1 }
  0xef   : > { %7537 = vst [vmem:[#allocation13_spill] sm:$0xff] %v5241_v52  ;;  %v1990_v53 = vadd.f32 %v5188_v26, %v5241_v52  ;;  %2051 = vperm.xlu1 %4791, %v1989_v50  }
  0xf0   : > { %v5247_v55 = vpop.f32.mrf.mxu1 }
  0xf1   : > { %7538 = vst [vmem:[#allocation14_spill] sm:$0xff] %v5247_v55  ;;  %2056 = vperm.xlu0 %4792, %v1990_v53  }
  0xf2   : > { %v5249_v56 = vpop.f32.mrf.mxu1 }
  0xf3   : > { %7539 = vst [vmem:[#allocation15_spill] sm:$0xff] %v5249_v56  ;;  %2041 = vperm.xlu1 %4791, %v1987_v54   ;;  %v1991_v57 = vadd.f32 %v5188_v26, %v5249_v56  ;;  %v631_v53 = vpack.c.bf16 %v5249_v56, %v5241_v52  ;;  %v1992_v56 = vadd.f32 %v5239_v51, %v5188_v26 }
  0xf7   : > { %2061 = vperm.xlu1 %4791, %v1991_v57   ;;  %v630_v57 = vpack.c.bf16 %v5233_v48, %v5223_v43  ;;  %v1993_v48 = vadd.f32 %v5247_v55, %v5188_v26 }
 0x112   : > { %v496_v58 = vpop.f32.mrf.mxu0 }
 0x113   : > { %v633_v59 = vpack.c.bf16 %v496_v58, %v496_v58 }
 0x114   : > { %v4378_v61 = vpop.f32.mrf.mxu0 }
 0x115   : > { %4765 = vmatprep.subr.msk.bf16.mxu1 %vm7519_vm3, %v633_v59  ;;  %v661_v62 = vsel %vm7519_vm3, %v633_v59, 0 }
 0x116   : > { %v499_v3 = vpop.f32.mrf.mxu0  ;;  %4407 = vmatpush3.bf16.msra.mxu1 %v661_v62 }
 0x117   : > { %v912_v5 = vpack.c.bf16 %v499_v3, %v499_v3  ;;  %4766 = vmatprep.subr.msk.bf16.mxu1 %vm7517_vm0, %v5256_v60 }
 0x118   : > { %v4379_v9 = vpop.f32.mrf.mxu0 }
 0x119   : > { %4409 = vmatmul.mubr.msk.bf16.vlgmr.msra.gmra.mxu1 %vm7518_vm2, %v626_v4  ;;  %4767 = vmatprep.subr.msk.bf16.mxu0 %vm7519_vm3, %v912_v5  ;;  %v938_v16 = vsel %vm7519_vm3, %v912_v5, 0  ;;  %v5320_v4 = vld [vmem:[%s5096_s18 + $0x78] sm:$0xff]   ;;  %v5366_v5 = vld [vmem:[%s5096_s18 + $0x50] sm:$0xff]   ;;  %v5372_v9 = vld [vmem:[%s5096_s18 + $0x48] sm:$0xff]  }
 0x11a   : > { %v5273_v18 = vpop.f32.mrf.mxu0  ;;  %4443 = vmatpush3.bf16.msra.mxu0 %v938_v16  ;;  %4412 = vmatprep.mubr.msk.bf16.mxu1 %vm7518_vm2, %v627_v63  ;;  %v632_v63 = vpack.c.bf16 %v5247_v55, %v5239_v51  ;;  %v1135_v16 = vsel %vm7517_vm0, %v5372_v9, 0 }
 0x11b   : > { %7540 = vst [vmem:[#allocation16_spill] sm:$0xff] %v5273_v18  ;;  %4425 = vmatpush3.bf16.xpose.msra.mxu1 %v5268_v13  ;;  %4768 = vmatprep.subr.msk.bf16.mxu0 %vm7517_vm0, %v5072_v0  ;;  %v5293_v0 = vsub.s32 0, %v5282_v21 }
 0x11c   : > { %v4382_v19 = vpop.f32.mrf.mxu0  ;;  %4460 = vmatprep.subr.bf16.mxu1 %v7444_v2 }
 0x11d   : > { %7543 = vst [vmem:[#allocation19_spill] sm:$0xff] %v5293_v0  ;;  %v1132_v19 = vsel %vm7517_vm0, %v5378_v17, 0 }
 0x11e   : > { %v5286_v30 = vpop.f32.mrf.mxu0 }
 0x11f   : > { %7542 = vst [vmem:[#allocation18_spill] sm:$0xff] %v5286_v30 }
 0x120   : > { %v4383_v36 = vpop.f32.mrf.mxu0 }
 0x121   : > { %4413 = vmatmul.mubr.msk.bf16.gmra.mxu1 %vm7518_vm2, %v628_v33  ;;  %v4823_v33 = vld [vmem:[%s7438_s4 + $0x8] sm:$0xff]   ;;  %v4824_v36 = vld [vmem:[%s7438_s4] sm:$0xff]  }
 0x122   : > { %v512_v39 = vpop.f32.mrf.mxu0  ;;  %4416 = vmatprep.mubr.msk.bf16.mxu1 %vm7518_vm2, %v629_v28  ;;  %v4822_v28 = vld [vmem:[%s7438_s4 + $0x10] sm:$0xff]  }
 0x123   : > { %v1969_v42 = vadd.f32 %v5279_v20, %v512_v39  ;;  %v2438_v44 = vadd.f32 %v7446_v34, %v512_v39 }
 0x124   : > { %v4386_v46 = vpop.f32.mrf.mxu0 }
 0x125   : > { %v2101_v47 = vrot.slane %v1969_v42, %v5293_v0  ;;  %v2562_v50 = vrot.slane %v2438_v44, %v5296_v38  ;;  %v5454_v46 = vld [vmem:[%s7440_s6] sm:$0xff] }
 0x126   : > { %v515_v54 = vpop.f32.mrf.mxu0 }
 0x127   : > { %v5308_v59 = vmul.f32 %v2101_v47, %v496_v58  ;;  %v5310_v61 = vmul.f32 %v2562_v50, %v499_v3  ;;  %v1153_v58 = vsel %vm7517_vm0, %v5320_v4, 0  ;;  %v5330_v3 = vld [vmem:[%s5096_s18 + $0x70] sm:$0xff]   ;;  %v5459_v50 = vld [vmem:[%s7440_s6 + $0x8] sm:$0xff] }
 0x128   : > { %v4387_v62 = vpop.f32.mrf.mxu0 }
 0x129   : > { %4417 = vmatmul.mubr.msk.bf16.gmra.mxu1 %vm7518_vm2, %v630_v57  ;;  %v5447_v39 = vpack.c.bf16 %v5308_v59, %v5308_v59  ;;  %v5471_v62 = vld [vmem:[%s7440_s6 + $0x18] sm:$0xff] }
 0x12a   : > { %4420 = vmatprep.mubr.msk.bf16.mxu1 %vm7518_vm2, %v631_v53  ;;  %v5464_v53 = vld [vmem:[%s7440_s6 + $0x10] sm:$0xff] }
 0x12b   : > { %7545 = vst [vmem:[#allocation21_spill] sm:$0xff] %v5447_v39 }
 0x131   : > { %4421 = vmatmul.mubr.msk.bf16.gmra.mxu1 %vm7518_vm2, %v632_v63 }
 0x132   : > { %4426 = vmatprep.mubr.msk.bf16.mxu1 %vm7517_vm0, %v5099_v6  ;;  %v1150_v6 = vsel %vm7517_vm0, %v5330_v3, 0 }
 0x139   : > { %4427 = vmatmul.mubr.msk.bf16.vlgmr.msra.gmra.mxu1 %vm7517_vm0, %v5107_v8  ;;  %v5340_v8 = vld [vmem:[%s5096_s18 + $0x68] sm:$0xff]  }
 0x13a   : > { %4461 = vmatpush3.bf16.xpose.msra.mxu1 %v1153_v58  ;;  %4430 = vmatprep.mubr.msk.bf16.mxu1 %vm7517_vm0, %v5112_v10  ;;  %v1147_v10 = vsel %vm7517_vm0, %v5340_v8, 0 }
 0x13b   : > { %4462 = vmatprep.subr.bf16.mxu1 %v7444_v2 }
 0x141   : > { %4431 = vmatmul.mubr.msk.bf16.gmra.mxu1 %vm7517_vm0, %v5128_v14  ;;  %v5350_v14 = vld [vmem:[%s5096_s18 + $0x60] sm:$0xff]  }
 0x142   : > { %4463 = vmatpush3.bf16.xpose.msra.mxu1 %v1150_v6  ;;  %4434 = vmatprep.mubr.msk.bf16.mxu1 %vm7517_vm0, %v5131_v15  ;;  %v1144_v15 = vsel %vm7517_vm0, %v5350_v14, 0 }
 0x143   : > { %4464 = vmatprep.subr.bf16.mxu1 %v7444_v2 }
 0x149   : > { %4435 = vmatmul.mubr.msk.bf16.gmra.mxu1 %vm7517_vm0, %v5123_v12  ;;  %v5360_v12 = vld [vmem:[%s5096_s18 + $0x58] sm:$0xff]  }
 0x14a   : > { %4465 = vmatpush3.bf16.xpose.msra.mxu1 %v1147_v10  ;;  %4438 = vmatprep.mubr.msk.bf16.mxu1 %vm7517_vm0, %v5117_v11  ;;  %v1141_v11 = vsel %vm7517_vm0, %v5360_v12, 0  ;;  %v5477_v10 = vld [vmem:[%s7440_s6 + $0x20] sm:$0xff] }
 0x14b   : > { %4466 = vmatprep.subr.bf16.mxu1 %v7444_v2 }
 0x151   : > { %4439 = vmatmul.mubr.msk.bf16.gmra.mxu1 %vm7517_vm0, %v5102_v7  ;;  %v1138_v7 = vsel %vm7517_vm0, %v5366_v5, 0 }
 0x152   : > { %4467 = vmatpush3.bf16.xpose.msra.mxu1 %v1144_v15  ;;  %4476 = vmatprep.mubr.msk.bf16.mxu1 %vm5011_vm1, %v7444_v2 }
 0x153   : > { %4468 = vmatprep.subr.bf16.mxu1 %v7444_v2 }
 0x15a   : > { %4469 = vmatpush3.bf16.xpose.msra.mxu1 %v1141_v11 }
 0x15b   : > { %4470 = vmatprep.subr.bf16.mxu1 %v7444_v2 }
 0x162   : > { %4471 = vmatpush3.bf16.xpose.msra.mxu1 %v1138_v7 }
 0x163   : > { %4472 = vmatprep.subr.bf16.mxu1 %v7444_v2 }
 0x16a   : > { %4473 = vmatpush3.bf16.xpose.msra.mxu1 %v1135_v16 }
 0x16b   : > { %4474 = vmatprep.subr.bf16.mxu1 %v7444_v2 }
 0x172   : > { %4475 = vmatpush3.bf16.xpose.msra.mxu1 %v1132_v19  ;;  %v5483_v19 = vld [vmem:[%s7440_s6 + $0x28] sm:$0xff] }
 0x173   : > { %4770 = vmatprep.subr.msk.bf16.mxu1 %vm7517_vm0, %v5256_v60  ;;  %v4820_v60 = vld [vmem:[%s7438_s4 + $0x20] sm:$0xff]  }
 0x179   : > { %4477 = vmatmul.mubr.msk.bf16.vlgmr.msra.gmra.mxu1 %vm7517_vm0, %v5164_v22  ;;  %v4817_v22 = vld [vmem:[%s7438_s4 + $0x38] sm:$0xff]  }
 0x17a   : > { %4480 = vmatprep.mubr.msk.bf16.mxu1 %vm5011_vm1, %v7444_v2  ;;  %4525 = vmatpush3.bf16.xpose.msra.mxu1 %v5268_v13  ;;  %v4821_v13 = vld [vmem:[%s7438_s4 + $0x18] sm:$0xff]  }
 0x17b   : > { %4560 = vmatprep.subr.bf16.mxu1 %v7444_v2 }
 0x181   : > { %4481 = vmatmul.mubr.msk.bf16.gmra.mxu1 %vm7517_vm0, %v5175_v24  ;;  %v4818_v24 = vld [vmem:[%s7438_s4 + $0x30] sm:$0xff]  }
 0x182   : > { %4484 = vmatprep.mubr.msk.bf16.mxu1 %vm5011_vm1, %v7444_v2 }
 0x189   : > { %4485 = vmatmul.mubr.msk.bf16.gmra.mxu1 %vm7517_vm0, %v5184_v25  ;;  %v4819_v25 = vld [vmem:[%s7438_s4 + $0x28] sm:$0xff]  }
 0x18a   : > { %4526 = vmatprep.mubr.msk.bf16.mxu1 %vm7517_vm0, %v5378_v17 }
 0x191   : > { %4527 = vmatmul.mubr.msk.bf16.vlgmr.msra.gmra.mxu1 %vm7517_vm0, %v5372_v9 }
 0x192   : > { %4561 = vmatpush3.bf16.msra.mxu1 %v4817_v22  ;;  %4530 = vmatprep.mubr.msk.bf16.mxu1 %vm7517_vm0, %v5366_v5 }
 0x193   : > { %4562 = vmatprep.subr.bf16.mxu1 %v7444_v2 }
 0x196   : > { %4563 = vmatpush3.bf16.msra.mxu1 %v4818_v24 }
 0x197   : > { %4564 = vmatprep.subr.bf16.mxu1 %v7444_v2 }
 0x199   : > { %4531 = vmatmul.mubr.msk.bf16.gmra.mxu1 %vm7517_vm0, %v5360_v12 }
 0x19a   : > { %4565 = vmatpush3.bf16.msra.mxu1 %v4819_v25  ;;  %4534 = vmatprep.mubr.msk.bf16.mxu1 %vm7517_vm0, %v5350_v14  ;;  %v5489_v25 = vld [vmem:[%s7440_s6 + $0x30] sm:$0xff] }
 0x19b   : > { %4566 = vmatprep.subr.bf16.mxu1 %v7444_v2 }
 0x19e   : > { %4567 = vmatpush3.bf16.msra.mxu1 %v4820_v60 }
 0x19f   : > { %4568 = vmatprep.subr.bf16.mxu1 %v7444_v2 }
 0x1a1   : > { %4535 = vmatmul.mubr.msk.bf16.gmra.mxu1 %vm7517_vm0, %v5340_v8 }
 0x1a2   : > { %4569 = vmatpush3.bf16.msra.mxu1 %v4821_v13  ;;  %4538 = vmatprep.mubr.msk.bf16.mxu1 %vm7517_vm0, %v5330_v3 }
 0x1a3   : > { %4570 = vmatprep.subr.bf16.mxu1 %v7444_v2 }
 0x1a6   : > { %4571 = vmatpush3.bf16.msra.mxu1 %v4822_v28 }
 0x1a7   : > { %4572 = vmatprep.subr.bf16.mxu1 %v7444_v2 }
 0x1a9   : > { %4539 = vmatmul.mubr.msk.bf16.gmra.mxu1 %vm7517_vm0, %v5320_v4 }
 0x1aa   : > { %4573 = vmatpush3.bf16.msra.mxu1 %v4823_v33  ;;  %4576 = vmatprep.mubr.msk.bf16.mxu1 %vm5011_vm1, %v7444_v2  ;;  %v5495_v33 = vld [vmem:[%s7440_s6 + $0x38] sm:$0xff] }
 0x1ab   : > { %4574 = vmatprep.subr.bf16.mxu1 %v7444_v2 }
 0x1ae   : > { %4575 = vmatpush3.bf16.msra.mxu1 %v4824_v36 }
 0x1af   : > { %4772 = vmatprep.subr.msk.bf16.mxu1 %vm7519_vm3, %v5447_v39 }
 0x1d9   : > { %v4410_v42 = vpop.f32.mrf.mxu1 }
 0x1da   : > { %v762_v58 = vmul.f32 %v4410_v42, %v5464_v53 }
 0x1db   : > { %v697_v44 = vpop.f32.mrf.mxu1 }
 0x1dc   : > { %v760_v57 = vmul.f32 %v697_v44, %v5454_v46 }
 0x1dd   : > { %v4411_v47 = vpop.f32.mrf.mxu1 }
 0x1de   : > { %v763_v11 = vmul.f32 %v4411_v47, %v5471_v62  ;;  %v5501_v47 = vld [vmem:[%s7440_s6 + $0x40] sm:$0xff] }
 0x1df   : > { %v700_v54 = vpop.f32.mrf.mxu1 }
 0x1e0   : > { %v761_v59 = vmul.f32 %v700_v54, %v5459_v50 }
 0x1e1   : > { %v4414_v63 = vpop.f32.mrf.mxu1 }
 0x1e2   : > { %v776_v6 = vadd.f32 %v761_v59, %v760_v57  ;;  %v766_v42 = vmul.f32 %v4414_v63, %v5489_v25  ;;  %v5513_v63 = vld [vmem:[%s7440_s6 + $0x50] sm:$0xff] }
 0x1e3   : > { %v713_v15 = vpop.f32.mrf.mxu1 }
 0x1e4   : > { %v777_v7 = vadd.f32 %v776_v6, %v762_v58  ;;  %v764_v22 = vmul.f32 %v713_v15, %v5477_v10  ;;  %v5507_v6 = vld [vmem:[%s7440_s6 + $0x48] sm:$0xff] }
 0x1e5   : > { %v4415_v16 = vpop.f32.mrf.mxu1 }
 0x1e6   : > { %v778_v24 = vadd.f32 %v777_v7, %v763_v11  ;;  %v767_v57 = vmul.f32 %v4415_v16, %v5495_v33  ;;  %v5519_v16 = vld [vmem:[%s7440_s6 + $0x58] sm:$0xff] }
 0x1e7   : > { %v716_v60 = vpop.f32.mrf.mxu1 }
 0x1e8   : > { %v779_v13 = vadd.f32 %v778_v24, %v764_v22  ;;  %v765_v28 = vmul.f32 %v716_v60, %v5483_v19 }
 0x1e9   : > { %v4418_v36 = vpop.f32.mrf.mxu1 }
 0x1ea   : > { %v780_v44 = vadd.f32 %v779_v13, %v765_v28  ;;  %v770_v13 = vmul.f32 %v4418_v36, %v5513_v63  ;;  %v5537_v36 = vld [vmem:[%s7440_s6 + $0x70] sm:$0xff] }
 0x1eb   : > { %v729_v54 = vpop.f32.mrf.mxu1 }
 0x1ec   : > { %v781_v59 = vadd.f32 %v780_v44, %v766_v42  ;;  %v768_v15 = vmul.f32 %v729_v54, %v5501_v47  ;;  %v5525_v42 = vld [vmem:[%s7440_s6 + $0x60] sm:$0xff] }
 0x1ed   : > { %v4419_v58 = vpop.f32.mrf.mxu1 }
 0x1ee   : > { %v782_v11 = vadd.f32 %v781_v59, %v767_v57  ;;  %v771_v54 = vmul.f32 %v4419_v58, %v5519_v16  ;;  %v5543_v58 = vld [vmem:[%s7440_s6 + $0x78] sm:$0xff] }
 0x1ef   : > { %v732_v7 = vpop.f32.mrf.mxu1 }
 0x1f0   : > { %v783_v22 = vadd.f32 %v782_v11, %v768_v15  ;;  %v769_v24 = vmul.f32 %v732_v7, %v5507_v6  ;;  %v5531_v15 = vld [vmem:[%s7440_s6 + $0x68] sm:$0xff] }
 0x1f1   : > { %v4422_v60 = vpop.f32.mrf.mxu1 }
 0x1f2   : > { %v784_v28 = vadd.f32 %v783_v22, %v769_v24 }
 0x1f3   : > { %v745_v44 = vpop.f32.mrf.mxu1 }
 0x1f4   : > { %v785_v57 = vadd.f32 %v784_v28, %v770_v13  ;;  %v772_v11 = vmul.f32 %v745_v44, %v5525_v42  ;;  %v774_v28 = vmul.f32 %v4422_v60, %v5537_v36 }
 0x1f5   : > { %v4423_v59 = vpop.f32.mrf.mxu1 }
 0x1f6   : > { %v786_v7 = vadd.f32 %v785_v57, %v771_v54  ;;  %v775_v2 = vmul.f32 %v4423_v59, %v5543_v58 }
 0x1f7   : > { %v748_v22 = vpop.f32.mrf.mxu1 }
 0x1f8   : > { %v787_v24 = vadd.f32 %v786_v7, %v772_v11  ;;  %v773_v23 = vmul.f32 %v748_v22, %v5531_v15 }
 0x1f9   : > { %v5545_v13 = vpop.f32.mrf.mxu1 }
 0x1fa   : > { %v788_v44 = vadd.f32 %v787_v24, %v773_v23  ;;  %v2441_v54 = vadd.f32 %v5545_v13, %v5188_v26 }
 0x1fb   : > { %v5550_v57 = vpop.f32.mrf.mxu1 }
 0x1fc   : > { %v789_v11 = vadd.f32 %v788_v44, %v774_v28  ;;  %v2439_v7 = vadd.f32 %v5188_v26, %v5550_v57  ;;  %2467 = vperm.xlu0 %4792, %v2441_v54  }
 0x1fd   : > { %v5555_v22 = vpop.f32.mrf.mxu1 }
 0x1fe   : > { %v5557_v34 = vadd.f32 %v789_v11, %v775_v2  ;;  %2457 = vperm.xlu1 %4791, %v2439_v7   ;;  %v2442_v23 = vadd.f32 %v5555_v22, %v5188_v26  ;;  %v905_v28 = vpack.c.bf16 %v5555_v22, %v5545_v13 }
 0x1ff   : > { %v5559_v30 = vpop.f32.mrf.mxu1 }
 0x200   : > { %v904_v60 = vpack.c.bf16 %v5559_v30, %v5550_v57  ;;  %v2440_v59 = vadd.f32 %v5188_v26, %v5559_v30 }
 0x201   : > { %v5567_v24 = vpop.f32.mrf.mxu1 }
 0x202   : > { %2472 = vperm.xlu1 %4791, %v2442_v23   ;;  %2462 = vperm.xlu0 %4792, %v2440_v59   ;;  %v2445_v44 = vadd.f32 %v5567_v24, %v5188_v26 }
 0x203   : > { %4444 = vmatprep.mubr.msk.bf16.mxu0 %vm7518_vm2, %v904_v60  ;;  %v5572_v2 = vpop.f32.mrf.mxu1 }
 0x204   : > { %4445 = vmatmul.mubr.msk.bf16.vlgmr.msra.gmra.mxu0 %vm7518_vm2, %v905_v28  ;;  %v2443_v23 = vadd.f32 %v5188_v26, %v5572_v2 }
 0x205   : > { %v5577_v54 = vpop.f32.mrf.mxu1  ;;  %4489 = vmatpush3.bf16.xpose.msra.mxu0 %v5078_v1 }
 0x206   : > { %v2446_v11 = vadd.f32 %v5577_v54, %v5188_v26  ;;  %2487 = vperm.xlu0 %4792, %v2445_v44   ;;  %v907_v28 = vpack.c.bf16 %v5577_v54, %v5567_v24 }
 0x207   : > { %v5582_v7 = vpop.f32.mrf.mxu1 }
 0x208   : > { %v906_v60 = vpack.c.bf16 %v5582_v7, %v5572_v2  ;;  %2492 = vperm.xlu1 %4791, %v2446_v11   ;;  %v2444_v1 = vadd.f32 %v5188_v26, %v5582_v7 }
 0x209   : > { %v5588_v59 = vpop.f32.mrf.mxu1 }
 0x20a   : > { %2477 = vperm.xlu0 %4792, %v2443_v23   ;;  %4448 = vmatprep.mubr.msk.bf16.mxu0 %vm7518_vm2, %v906_v60  ;;  %v2449_v18 = vadd.f32 %v5588_v59, %v5188_v26 }
 0x20b   : > { %v5595_v44 = vpop.f32.mrf.mxu1 }
 0x20c   : > { %4449 = vmatmul.mubr.msk.bf16.gmra.mxu0 %vm7518_vm2, %v907_v28  ;;  %2482 = vperm.xlu1 %4791, %v2444_v1   ;;  %v2447_v23 = vadd.f32 %v5188_v26, %v5595_v44 }
 0x20d   : > { %v5600_v11 = vpop.f32.mrf.mxu1 }
 0x20e   : > { %v2450_v21 = vadd.f32 %v5600_v11, %v5188_v26  ;;  %2507 = vperm.xlu0 %4792, %v2449_v18   ;;  %v909_v28 = vpack.c.bf16 %v5600_v11, %v5588_v59 }
 0x20f   : > { %v5604_v52 = vpop.f32.mrf.mxu1 }
 0x210   : > { %v908_v60 = vpack.c.bf16 %v5604_v52, %v5595_v44  ;;  %2512 = vperm.xlu1 %4791, %v2450_v21   ;;  %v2448_v1 = vadd.f32 %v5188_v26, %v5604_v52 }
 0x211   : > { %v5610_v43 = vpop.f32.mrf.mxu1 }
 0x212   : > { %7546 = vst [vmem:[#allocation22_spill] sm:$0xff] %v5610_v43  ;;  %2497 = vperm.xlu0 %4792, %v2447_v23   ;;  %4452 = vmatprep.mubr.msk.bf16.mxu0 %vm7518_vm2, %v908_v60 }
 0x213   : > { %v5617_v18 = vpop.f32.mrf.mxu1 }
 0x214   : > { %7547 = vst [vmem:[#allocation23_spill] sm:$0xff] %v5617_v18  ;;  %4453 = vmatmul.mubr.msk.bf16.gmra.mxu0 %vm7518_vm2, %v909_v28  ;;  %2502 = vperm.xlu1 %4791, %v2448_v1   ;;  %v2451_v23 = vadd.f32 %v5188_v26, %v5617_v18 }
 0x215   : > { %v5622_v21 = vpop.f32.mrf.mxu1 }
 0x216   : > { %7548 = vst [vmem:[#allocation24_spill] sm:$0xff] %v5622_v21  ;;  %2066 = vperm.xlu0 %4792, %v1992_v56   ;;  %v911_v51 = vpack.c.bf16 %v5622_v21, %v5610_v43  ;;  %v2453_v56 = vadd.f32 %v5610_v43, %v5188_v26 }
 0x217   : > { %v5626_v45 = vpop.f32.mrf.mxu1 }
 0x218   : > { %7549 = vst [vmem:[#allocation25_spill] sm:$0xff] %v5626_v45  ;;  %v910_v60 = vpack.c.bf16 %v5626_v45, %v5617_v18  ;;  %2071 = vperm.xlu1 %4791, %v1993_v48   ;;  %v2452_v28 = vadd.f32 %v5188_v26, %v5626_v45  ;;  %v2454_v48 = vadd.f32 %v5622_v21, %v5188_v26 }
 0x21a   : > { %2517 = vperm.xlu0 %4792, %v2451_v23   ;;  %4456 = vmatprep.mubr.msk.bf16.mxu0 %vm7518_vm2, %v910_v60  ;;  %v5664_v23 = vpop.permute.xlu1 %2006 }
 0x21b   : > { %7551 = vst [vmem:[#allocation27_spill] sm:$0xff] %v5664_v23 }
 0x21c   : > { %4457 = vmatmul.mubr.msk.bf16.gmra.mxu0 %vm7518_vm2, %v911_v51  ;;  %2522 = vperm.xlu1 %4791, %v2452_v28  }
 0x21d   : > { %4490 = vmatprep.mubr.msk.bf16.mxu0 %vm7517_vm0, %v5378_v17 }
 0x21e   : > { %2527 = vperm.xlu0 %4792, %v2453_v56   ;;  %v7553_v56 = vrot.slane %v5279_v20, 7 }
 0x220   : > { %2532 = vperm.xlu1 %4791, %v2454_v48  }
 0x224   : > { %4491 = vmatmul.mubr.msk.bf16.vlgmr.msra.gmra.mxu0 %vm7517_vm0, %v5372_v9 }
 0x225   : > { %4494 = vmatprep.mubr.msk.bf16.mxu0 %vm7517_vm0, %v5366_v5 }
 0x22c   : > { %4495 = vmatmul.mubr.msk.bf16.gmra.mxu0 %vm7517_vm0, %v5360_v12 }
 0x22d   : > { %4498 = vmatprep.mubr.msk.bf16.mxu0 %vm7517_vm0, %v5350_v14 }
 0x234   : > { %4499 = vmatmul.mubr.msk.bf16.gmra.mxu0 %vm7517_vm0, %v5340_v8 }
 0x235   : > { %4502 = vmatprep.mubr.msk.bf16.mxu0 %vm7517_vm0, %v5330_v3 }
 0x239   : > { %v1189_v51 = vpop.f32.mrf.mxu1 }
 0x23a   : > { %v5656_v17 = vpack.c.bf16 %v1189_v51, %v1189_v51 }
 0x23b   : > { %v4478_v1 = vpop.f32.mrf.mxu1 }
 0x23c   : > { %4503 = vmatmul.mubr.msk.bf16.gmra.mxu0 %vm7517_vm0, %v5320_v4  ;;  %4769 = vmatprep.subr.msk.bf16.mxu0 %vm7519_vm3, %v5656_v17  ;;  %v5671_v4 = vpop.permute.xlu1 %1996 }
 0x23d   : > { %v1192_v12 = vpop.f32.mrf.mxu1 }
 0x23f   : > { %v4479_v5 = vpop.f32.mrf.mxu1 }
 0x241   : > { %v5662_v9 = vpop.f32.mrf.mxu1 }
 0x242   : > { %7550 = vst [vmem:[#allocation26_spill] sm:$0xff] %v5662_v9 }
 0x243   : > { %v4482_v14 = vpop.f32.mrf.mxu1 }
 0x245   : > { %v5666_v8 = vpop.f32.mrf.mxu1 }
 0x246   : > { %7552 = vst [vmem:[#allocation28_spill] sm:$0xff] %v5666_v8 }
 0x247   : > { %v4483_v3 = vpop.f32.mrf.mxu1 }
 0x248   : > { %v5679_v3 = vpop.permute.xlu1 %2011 }
 0x249   : > { %v1205_v60 = vpop.f32.mrf.mxu1  ;;  %7556 = vst [vmem:[#allocation31_spill] sm:$0xff] %v5679_v3 }
 0x24a   : > { %v2959_v28 = vadd.f32 %v5279_v20, %v1205_v60  ;;  %v3418_v48 = vadd.f32 %v7553_v56, %v1205_v60 }
 0x24b   : > { %v4486_v1 = vpop.f32.mrf.mxu1 }
 0x24c   : > { %v3083_v43 = vrot.slane %v2959_v28, %v5293_v0  ;;  %v3542_v5 = vrot.slane %v3418_v48, %v5296_v38 }
 0x24d   : > { %v1208_v9 = vpop.f32.mrf.mxu1 }
 0x24e   : > { %v5675_v14 = vmul.f32 %v3083_v43, %v1189_v51  ;;  %v5677_v21 = vmul.f32 %v3542_v5, %v1192_v12  ;;  %v5693_v51 = vpop.permute.xlu1 %2001 }
 0x24f   : > { %v4487_v8 = vpop.f32.mrf.mxu1 }
 0x250   : > { %7554 = vst [vmem:[#allocation29_spill] sm:$0xff] %v5675_v14  ;;  %7555 = vst [vmem:[#allocation30_spill] sm:$0xff] %v5677_v21 }
 0x251   : > { %v5681_v18 = vpop.f32.mrf.mxu1 }
 0x252   : > { %7557 = vst [vmem:[#allocation32_spill] sm:$0xff] %v5681_v18  ;;  %v3421_v20 = vadd.f32 %v5681_v18, %v5188_v26  ;;  %v5707_v14 = vpop.permute.xlu1 %2031 }
 0x253   : > { %v5685_v60 = vpop.f32.mrf.mxu1  ;;  %7563 = vst [vmem:[#allocation38_spill] sm:$0xff] %v5707_v14 }
 0x254   : > { %7558 = vst [vmem:[#allocation33_spill] sm:$0xff] %v5685_v60  ;;  %v3419_v28 = vadd.f32 %v5188_v26, %v5685_v60  ;;  %3447 = vperm.xlu0 %4792, %v3421_v20  }
 0x255   : > { %v5689_v56 = vpop.f32.mrf.mxu1 }
 0x256   : > { %7559 = vst [vmem:[#allocation34_spill] sm:$0xff] %v5689_v56  ;;  %v3422_v43 = vadd.f32 %v5689_v56, %v5188_v26 }
 0x257   : > { %v5695_v9 = vpop.f32.mrf.mxu1 }
 0x258   : > { %7560 = vst [vmem:[#allocation35_spill] sm:$0xff] %v5695_v9  ;;  %v3420_v8 = vadd.f32 %v5188_v26, %v5695_v9  ;;  %3452 = vperm.xlu1 %4791, %v3422_v43   ;;  %3437 = vperm.xlu0 %4792, %v3419_v28   ;;  %v5713_v28 = vpop.permute.xlu0 %2026 }
 0x259   : > { %v5699_v48 = vpop.f32.mrf.mxu1  ;;  %7565 = vst [vmem:[#allocation40_spill] sm:$0xff] %v5713_v28 }
 0x25a   : > { %7561 = vst [vmem:[#allocation36_spill] sm:$0xff] %v5699_v48  ;;  %v3425_v1 = vadd.f32 %v5699_v48, %v5188_v26 }
 0x25b   : > { %v5703_v5 = vpop.f32.mrf.mxu1 }
 0x25c   : > { %7562 = vst [vmem:[#allocation37_spill] sm:$0xff] %v5703_v5  ;;  %v3423_v20 = vadd.f32 %v5188_v26, %v5703_v5  ;;  %3442 = vperm.xlu1 %4791, %v3420_v8   ;;  %3467 = vperm.xlu0 %4792, %v3425_v1   ;;  %v5723_v1 = vpop.permute.xlu1 %2021  ;;  %v5729_v28 = vpop.permute.xlu0 %2016 }
 0x25d   : > { %v5709_v21 = vpop.f32.mrf.mxu1  ;;  %7568 = vst [vmem:[#allocation43_spill] sm:$0xff] %v5723_v1  ;;  %7570 = vst [vmem:[#allocation45_spill] sm:$0xff] %v5729_v28 }
 0x25e   : > { %7564 = vst [vmem:[#allocation39_spill] sm:$0xff] %v5709_v21  ;;  %v3426_v43 = vadd.f32 %v5709_v21, %v5188_v26 }
 0x25f   : > { %v5715_v38 = vpop.f32.mrf.mxu1 }
 0x260   : > { %7566 = vst [vmem:[#allocation41_spill] sm:$0xff] %v5715_v38  ;;  %v3424_v0 = vadd.f32 %v5188_v26, %v5715_v38  ;;  %3472 = vperm.xlu1 %4791, %v3426_v43   ;;  %3457 = vperm.xlu0 %4792, %v3423_v20   ;;  %v5735_v43 = vpack.c.bf16 %v1192_v12, %v1192_v12  ;;  %v5741_v37 = vpop.permute.xlu1 %2051  ;;  %v5747_v28 = vpop.permute.xlu0 %2046 }
 0x261   : > { %v5719_v45 = vpop.f32.mrf.mxu1  ;;  %7573 = vst [vmem:[#allocation48_spill] sm:$0xff] %v5741_v37  ;;  %7575 = vst [vmem:[#allocation50_spill] sm:$0xff] %v5747_v28 }
 0x262   : > { %7567 = vst [vmem:[#allocation42_spill] sm:$0xff] %v5719_v45  ;;  %v3429_v8 = vadd.f32 %v5719_v45, %v5188_v26 }
 0x263   : > { %v5725_v55 = vpop.f32.mrf.mxu1 }
 0x264   : > { %7569 = vst [vmem:[#allocation44_spill] sm:$0xff] %v5725_v55  ;;  %v3427_v35 = vadd.f32 %v5188_v26, %v5725_v55  ;;  %3462 = vperm.xlu1 %4791, %v3424_v0   ;;  %3487 = vperm.xlu0 %4792, %v3429_v8   ;;  %v1342_v8 = vsel %vm7519_vm3, %v5656_v17, 0 }
 0x265   : > { %v5731_v49 = vpop.f32.mrf.mxu1  ;;  %4507 = vmatpush3.bf16.msra.mxu0 %v1342_v8  ;;  %v5763_v8 = vpop.permute.xlu0 %2036 }
 0x266   : > { %7571 = vst [vmem:[#allocation46_spill] sm:$0xff] %v5731_v49  ;;  %v3430_v20 = vadd.f32 %v5731_v49, %v5188_v26  ;;  %4771 = vmatprep.subr.msk.bf16.mxu0 %vm7519_vm3, %v5735_v43  ;;  %7580 = vst [vmem:[#allocation55_spill] sm:$0xff] %v5763_v8 }
 0x267   : > { %v5737_v40 = vpop.f32.mrf.mxu1 }
 0x268   : > { %7572 = vst [vmem:[#allocation47_spill] sm:$0xff] %v5737_v40  ;;  %3492 = vperm.xlu1 %4791, %v3430_v20   ;;  %v3428_v14 = vadd.f32 %v5188_v26, %v5737_v40  ;;  %3477 = vperm.xlu0 %4792, %v3427_v35   ;;  %v5757_v20 = vpop.permute.xlu1 %2041 }
 0x269   : > { %v5743_v0 = vpop.f32.mrf.mxu1  ;;  %7578 = vst [vmem:[#allocation53_spill] sm:$0xff] %v5757_v20  ;;  %v5765_v28 = vpop.permute.xlu0 %2056 }
 0x26a   : > { %7574 = vst [vmem:[#allocation49_spill] sm:$0xff] %v5743_v0  ;;  %7581 = vst [vmem:[#allocation56_spill] sm:$0xff] %v5765_v28 }
 0x26b   : > { %v5749_v27 = vpop.f32.mrf.mxu1 }
 0x26c   : > { %7576 = vst [vmem:[#allocation51_spill] sm:$0xff] %v5749_v27  ;;  %3482 = vperm.xlu1 %4791, %v3428_v14   ;;  %v3431_v12 = vadd.f32 %v5188_v26, %v5749_v27  ;;  %v5767_v23 = vpop.permute.xlu1 %2061 }
 0x26d   : > { %v5755_v35 = vpop.f32.mrf.mxu1  ;;  %7582 = vst [vmem:[#allocation57_spill] sm:$0xff] %v5767_v23 }
 0x26e   : > { %7577 = vst [vmem:[#allocation52_spill] sm:$0xff] %v5755_v35  ;;  %3497 = vperm.xlu0 %4792, %v3431_v12  }
 0x26f   : > { %v5759_v37 = vpop.f32.mrf.mxu1 }
 0x270   : > { %7579 = vst [vmem:[#allocation54_spill] sm:$0xff] %v5759_v37  ;;  %v3432_v17 = vadd.f32 %v5188_v26, %v5759_v37 }
 0x272   : > { %3502 = vperm.xlu1 %4791, %v3432_v17  }
 0x277   : > { %v2468_v14 = vpop.permute.xlu0 %2467 }
 0x278   : > { %v5770_v12 = vmul.f32 %v5545_v13, %v2468_v14 }
 0x279   : > { %v2458_v1 = vpop.permute.xlu1 %2457 }
 0x27a   : > { %7583 = vst [vmem:[#allocation58_spill] sm:$0xff] %v5770_v12  ;;  %v5773_v20 = vmul.f32 %v2458_v1, %v5550_v57 }
 0x27c   : > { %7584 = vst [vmem:[#allocation59_spill] sm:$0xff] %v5773_v20  ;;  %v1575_v20 = vpack.c.bf16 %v5695_v9, %v5685_v60  ;;  %v3434_v9 = vadd.f32 %v5755_v35, %v5188_v26 }
 0x27d   : > { %v2473_v41 = vpop.permute.xlu1 %2472  ;;  %v2463_v31 = vpop.permute.xlu0 %2462 }
 0x27e   : > { %v5776_v3 = vmul.f32 %v5555_v22, %v2473_v41  ;;  %v5779_v8 = vmul.f32 %v2463_v31, %v5559_v30 }
 0x280   : > { %7585 = vst [vmem:[#allocation60_spill] sm:$0xff] %v5776_v3 }
 0x281   : > { %v2488_v23 = vpop.permute.xlu0 %2487 }
 0x282   : > { %v5786_v13 = vmul.f32 %v5567_v24, %v2488_v23 }
 0x283   : > { %v2493_v39 = vpop.permute.xlu1 %2492 }
 0x284   : > { %7586 = vst [vmem:[#allocation61_spill] sm:$0xff] %v5786_v13  ;;  %v5789_v57 = vmul.f32 %v5577_v54, %v2493_v39 }
 0x285   : > { %v2478_v1 = vpop.permute.xlu0 %2477 }
 0x286   : > { %7587 = vst [vmem:[#allocation62_spill] sm:$0xff] %v5789_v57  ;;  %v5794_v30 = vmul.f32 %v2478_v1, %v5572_v2 }
 0x287   : > { %v2483_v31 = vpop.permute.xlu1 %2482 }
 0x288   : > { %7588 = vst [vmem:[#allocation63_spill] sm:$0xff] %v5794_v30  ;;  %v5797_v22 = vmul.f32 %v2483_v31, %v5582_v7 }
 0x289   : > { %v2508_v14 = vpop.permute.xlu0 %2507 }
 0x28a   : > { %7589 = vst [vmem:[#allocation64_spill] sm:$0xff] %v5797_v22  ;;  %v5802_v23 = vmul.f32 %v5588_v59, %v2508_v14 }
 0x28b   : > { %v2513_v24 = vpop.permute.xlu1 %2512 }
 0x28c   : > { %7590 = vst [vmem:[#allocation65_spill] sm:$0xff] %v5802_v23  ;;  %v5805_v39 = vmul.f32 %v5600_v11, %v2513_v24 }
 0x28d   : > { %v2498_v54 = vpop.permute.xlu0 %2497 }
 0x28e   : > { %7591 = vst [vmem:[#allocation66_spill] sm:$0xff] %v5805_v39  ;;  %v5810_v1 = vmul.f32 %v2498_v54, %v5595_v44 }
 0x28f   : > { %v2503_v2 = vpop.permute.xlu1 %2502 }
 0x290   : > { %7592 = vst [vmem:[#allocation67_spill] sm:$0xff] %v5810_v1  ;;  %v5813_v7 = vmul.f32 %v2503_v2, %v5604_v52 }
 0x292   : > { %7593 = vst [vmem:[#allocation68_spill] sm:$0xff] %v5813_v7 }
 0x2c4   : > { %v4446_v17 = vpop.f32.mrf.mxu0 }
 0x2c5   : > { %v1039_v41 = vmul.f32 %v4446_v17, %v5464_v53 }
 0x2c6   : > { %v974_v59 = vpop.f32.mrf.mxu0 }
 0x2c7   : > { %v1037_v11 = vmul.f32 %v974_v59, %v5454_v46 }
 0x2c8   : > { %v4447_v14 = vpop.f32.mrf.mxu0 }
 0x2c9   : > { %v1040_v54 = vmul.f32 %v4447_v14, %v5471_v62 }
 0x2ca   : > { %v977_v28 = vpop.f32.mrf.mxu0 }
 0x2cb   : > { %v1038_v24 = vmul.f32 %v977_v28, %v5459_v50 }
 0x2cc   : > { %v4450_v13 = vpop.f32.mrf.mxu0 }
 0x2cd   : > { %v1053_v23 = vadd.f32 %v1038_v24, %v1037_v11  ;;  %v1043_v59 = vmul.f32 %v4450_v13, %v5489_v25 }
 0x2ce   : > { %v990_v44 = vpop.f32.mrf.mxu0 }
 0x2cf   : > { %v1054_v52 = vadd.f32 %v1053_v23, %v1039_v41  ;;  %v1041_v39 = vmul.f32 %v990_v44, %v5477_v10 }
 0x2d0   : > { %v4451_v2 = vpop.f32.mrf.mxu0 }
 0x2d1   : > { %v1055_v31 = vadd.f32 %v1054_v52, %v1040_v54  ;;  %v1044_v17 = vmul.f32 %v4451_v2, %v5495_v33  ;;  %v791_v52 = vrot.slane %v5557_v34, 4 }
 0x2d2   : > { %v993_v1 = vpop.f32.mrf.mxu0 }
 0x2d3   : > { %v1056_v7 = vadd.f32 %v1055_v31, %v1041_v39  ;;  %v1042_v57 = vmul.f32 %v993_v1, %v5483_v19 }
 0x2d4   : > { %v4454_v30 = vpop.f32.mrf.mxu0 }
 0x2d5   : > { %v1057_v28 = vadd.f32 %v1056_v7, %v1042_v57  ;;  %v1047_v39 = vmul.f32 %v4454_v30, %v5513_v63 }
 0x2d6   : > { %v1006_v22 = vpop.f32.mrf.mxu0 }
 0x2d7   : > { %v1058_v11 = vadd.f32 %v1057_v28, %v1043_v59  ;;  %v1045_v14 = vmul.f32 %v1006_v22, %v5501_v47 }
 0x2d8   : > { %v4455_v24 = vpop.f32.mrf.mxu0 }
 0x2d9   : > { %v1059_v41 = vadd.f32 %v1058_v11, %v1044_v17  ;;  %v1048_v13 = vmul.f32 %v4455_v24, %v5519_v16 }
 0x2da   : > { %v1009_v23 = vpop.f32.mrf.mxu0 }
 0x2db   : > { %v1060_v12 = vadd.f32 %v1059_v41, %v1045_v14  ;;  %v1046_v44 = vmul.f32 %v1009_v23, %v5507_v6  ;;  %v792_v14 = vadd.f32 %v791_v52, %v5557_v34 }
 0x2dc   : > { %v4458_v54 = vpop.f32.mrf.mxu0 }
 0x2dd   : > { %v1061_v1 = vadd.f32 %v1060_v12, %v1046_v44  ;;  %v1051_v12 = vmul.f32 %v4458_v54, %v5537_v36 }
 0x2de   : > { %v1022_v31 = vpop.f32.mrf.mxu0 }
 0x2df   : > { %v1062_v57 = vadd.f32 %v1061_v1, %v1047_v39  ;;  %v1049_v2 = vmul.f32 %v1022_v31, %v5525_v42  ;;  %v793_v1 = vrot.slane %v792_v14, 2 }
 0x2e0   : > { %v4459_v7 = vpop.f32.mrf.mxu0 }
 0x2e1   : > { %v1063_v59 = vadd.f32 %v1062_v57, %v1048_v13  ;;  %v1052_v23 = vmul.f32 %v4459_v7, %v5543_v58 }
 0x2e2   : > { %v1025_v22 = vpop.f32.mrf.mxu0 }
 0x2e3   : > { %v1064_v28 = vadd.f32 %v1063_v59, %v1049_v2  ;;  %v1050_v17 = vmul.f32 %v1025_v22, %v5531_v15  ;;  %v794_v59 = vadd.f32 %v793_v1, %v792_v14 }
 0x2e4   : > { %v5832_v11 = vpop.f32.mrf.mxu0 }
 0x2e5   : > { %v1065_v30 = vadd.f32 %v1064_v28, %v1050_v17  ;;  %v2962_v24 = vadd.f32 %v5832_v11, %v5188_v26 }
 0x2e6   : > { %v5838_v41 = vpop.f32.mrf.mxu0 }
 0x2e7   : > { %v1066_v44 = vadd.f32 %v1065_v30, %v1051_v12  ;;  %2988 = vperm.xlu0 %4792, %v2962_v24   ;;  %v2960_v13 = vadd.f32 %v5188_v26, %v5838_v41  ;;  %v1609_v30 = vsel %vm7519_vm3, %v5735_v43, 0 }
 0x2e8   : > { %v5841_v39 = vpop.f32.mrf.mxu0 }
 0x2e9   : > { %v1067_v31 = vadd.f32 %v1066_v44, %v1052_v23  ;;  %v2963_v34 = vadd.f32 %v5841_v39, %v5188_v26  ;;  %v1309_v7 = vpack.c.bf16 %v5841_v39, %v5832_v11  ;;  %v7594_v23 = vmov 0.0  }
 0x2ea   : > { %v5847_v54 = vpop.f32.mrf.mxu0  ;;  %v795_v44 = vrot.slane %v794_v59, 1 }
 0x2eb   : > { %v1068_v57 = vrot.slane %v1067_v31, 4  ;;  %v1308_v52 = vpack.c.bf16 %v5847_v54, %v5838_v41  ;;  %2978 = vperm.xlu0 %4792, %v2960_v13   ;;  %2993 = vperm.xlu1 %4791, %v2963_v34   ;;  %v2961_v28 = vadd.f32 %v5188_v26, %v5847_v54 }
 0x2ec   : > { %v5853_v2 = vpop.f32.mrf.mxu0 }
 0x2ed   : > { %v1069_v22 = vadd.f32 %v1068_v57, %v1067_v31  ;;  %v2966_v17 = vadd.f32 %v5853_v2, %v5188_v26  ;;  %4508 = vmatprep.mubr.msk.bf16.mxu0 %vm7518_vm2, %v1308_v52 }
 0x2ee   : > { %v5860_v12 = vpop.f32.mrf.mxu0  ;;  %4509 = vmatmul.mubr.msk.bf16.vlgmr.msra.gmra.mxu0 %vm7518_vm2, %v1309_v7 }
 0x2ef   : > { %v1070_v24 = vrot.slane %v1069_v22, 2  ;;  %4543 = vmatpush3.bf16.msra.mxu0 %v1609_v30  ;;  %2983 = vperm.xlu1 %4791, %v2961_v28   ;;  %v2964_v13 = vadd.f32 %v5188_v26, %v5860_v12 }
 0x2f0   : > { %3008 = vperm.xlu0 %4792, %v2966_v17   ;;  %v5865_v14 = vpop.f32.mrf.mxu0  ;;  %4580 = vmatprep.subr.bf16.mxu0 %v7594_v23 }
 0x2f1   : > { %v1071_v1 = vadd.f32 %v1070_v24, %v1069_v22  ;;  %v2967_v31 = vadd.f32 %v5865_v14, %v5188_v26  ;;  %v1311_v52 = vpack.c.bf16 %v5865_v14, %v5853_v2  ;;  %v796_v22 = vadd.f32 %v795_v44, %v794_v59 }
 0x2f2   : > { %v5872_v34 = vpop.f32.mrf.mxu0 }
 0x2f3   : > { %v1072_v57 = vrot.slane %v1071_v1, 1  ;;  %v1310_v43 = vpack.c.bf16 %v5872_v34, %v5860_v12  ;;  %3013 = vperm.xlu1 %4791, %v2967_v31   ;;  %v2965_v17 = vadd.f32 %v5188_v26, %v5872_v34 }
 0x2f4   : > { %2998 = vperm.xlu0 %4792, %v2964_v13   ;;  %v5878_v7 = vpop.f32.mrf.mxu0 }
 0x2f5   : > { %v1073_v28 = vadd.f32 %v1072_v57, %v1071_v1  ;;  %v2970_v30 = vadd.f32 %v5878_v7, %v5188_v26  ;;  %4512 = vmatprep.mubr.msk.bf16.mxu0 %vm7518_vm2, %v1310_v43 }
 0x2f6   : > { %v5885_v24 = vpop.f32.mrf.mxu0  ;;  %4513 = vmatmul.mubr.msk.bf16.gmra.mxu0 %vm7518_vm2, %v1311_v52 }
 0x2f7   : > { %3003 = vperm.xlu1 %4791, %v2965_v17   ;;  %v5888_v31 = vsel %vm1745_vm4, %v796_v22, %v1073_v28  ;;  %v2968_v44 = vadd.f32 %v5188_v26, %v5885_v24 }
 0x2f8   : > { %3028 = vperm.xlu0 %4792, %v2970_v30   ;;  %v5890_v13 = vpop.f32.mrf.mxu0 }
 0x2f9   : > { %v2971_v59 = vadd.f32 %v5890_v13, %v5188_v26  ;;  %v1313_v43 = vpack.c.bf16 %v5890_v13, %v5878_v7 }
 0x2fa   : > { %v5896_v1 = vpop.f32.mrf.mxu0 }
 0x2fb   : > { %v1312_v57 = vpack.c.bf16 %v5896_v1, %v5885_v24  ;;  %3033 = vperm.xlu1 %4791, %v2971_v59   ;;  %v2969_v22 = vadd.f32 %v5188_v26, %v5896_v1 }
 0x2fc   : > { %3018 = vperm.xlu0 %4792, %v2968_v44   ;;  %v5902_v52 = vpop.f32.mrf.mxu0 }
 0x2fd   : > { %v2974_v28 = vadd.f32 %v5902_v52, %v5188_v26  ;;  %4516 = vmatprep.mubr.msk.bf16.mxu0 %vm7518_vm2, %v1312_v57 }
 0x2fe   : > { %v5909_v17 = vpop.f32.mrf.mxu0  ;;  %4517 = vmatmul.mubr.msk.bf16.gmra.mxu0 %vm7518_vm2, %v1313_v43  ;;  %v3433_v43 = vadd.f32 %v5743_v0, %v5188_v26 }
 0x2ff   : > { %3023 = vperm.xlu1 %4791, %v2969_v22   ;;  %v2972_v44 = vadd.f32 %v5188_v26, %v5909_v17 }
 0x300   : > { %3048 = vperm.xlu0 %4792, %v2974_v28   ;;  %v5912_v30 = vpop.f32.mrf.mxu0 }
 0x301   : > { %v2975_v59 = vadd.f32 %v5912_v30, %v5188_v26  ;;  %v1315_v22 = vpack.c.bf16 %v5912_v30, %v5902_v52 }
 0x302   : > { %v5918_v3 = vpop.f32.mrf.mxu0 }
 0x303   : > { %v1314_v57 = vpack.c.bf16 %v5918_v3, %v5909_v17  ;;  %3053 = vperm.xlu1 %4791, %v2975_v59   ;;  %v2973_v28 = vadd.f32 %v5188_v26, %v5918_v3  ;;  %v1577_v59 = vpack.c.bf16 %v5715_v38, %v5703_v5  ;;  %v4826_v26 = vld [vmem:[%s7439_s5 + $0x30] sm:$0xff]  }
 0x304   : > { %3038 = vperm.xlu0 %4792, %v2972_v44   ;;  %v4825_v44 = vld [vmem:[%s7439_s5 + $0x38] sm:$0xff]  }
 0x305   : > { %4520 = vmatprep.mubr.msk.bf16.mxu0 %vm7518_vm2, %v1314_v57  ;;  %v1576_v57 = vpack.c.bf16 %v5689_v56, %v5681_v18 }
 0x306   : > { %4521 = vmatmul.mubr.msk.bf16.gmra.mxu0 %vm7518_vm2, %v1315_v22  ;;  %v4828_v22 = vld [vmem:[%s7439_s5 + $0x20] sm:$0xff]  }
 0x307   : > { %3043 = vperm.xlu1 %4791, %v2973_v28   ;;  %4544 = vmatprep.mubr.msk.bf16.mxu0 %vm7518_vm2, %v1575_v20  ;;  %v4827_v20 = vld [vmem:[%s7439_s5 + $0x28] sm:$0xff]   ;;  %v1581_v28 = vpack.c.bf16 %v5759_v37, %v5749_v27 }
 0x308   : > { %3507 = vperm.xlu0 %4792, %v3433_v43   ;;  %v1578_v43 = vpack.c.bf16 %v5709_v21, %v5699_v48 }
 0x30b   : > { %3512 = vperm.xlu1 %4791, %v3434_v9   ;;  %v1579_v9 = vpack.c.bf16 %v5737_v40, %v5725_v55 }
 0x30e   : > { %4545 = vmatmul.mubr.msk.bf16.vlgmr.msra.gmra.mxu0 %vm7518_vm2, %v1576_v57  ;;  %v4830_v57 = vld [vmem:[%s7439_s5 + $0x10] sm:$0xff]  }
 0x30f   : > { %4581 = vmatpush3.bf16.msra.mxu0 %v4825_v44  ;;  %4548 = vmatprep.mubr.msk.bf16.mxu0 %vm7518_vm2, %v1577_v59  ;;  %v4829_v59 = vld [vmem:[%s7439_s5 + $0x18] sm:$0xff]   ;;  %v1580_v44 = vpack.c.bf16 %v5731_v49, %v5719_v45 }
 0x310   : > { %4582 = vmatprep.subr.bf16.mxu0 %v7594_v23 }
 0x313   : > { %4583 = vmatpush3.bf16.msra.mxu0 %v4826_v26  ;;  %v4831_v26 = vld [vmem:[%s7439_s5 + $0x8] sm:$0xff]  }
 0x314   : > { %4584 = vmatprep.subr.bf16.mxu0 %v7594_v23 }
 0x316   : > { %4549 = vmatmul.mubr.msk.bf16.gmra.mxu0 %vm7518_vm2, %v1578_v43  ;;  %v5991_v43 = vpack.c.bf16 %v5310_v61, %v5310_v61 }
 0x317   : > { %4585 = vmatpush3.bf16.msra.mxu0 %v4827_v20  ;;  %4552 = vmatprep.mubr.msk.bf16.mxu0 %vm7518_vm2, %v1579_v9  ;;  %v1582_v9 = vpack.c.bf16 %v5755_v35, %v5743_v0  ;;  %v4832_v20 = vld [vmem:[%s7439_s5] sm:$0xff]  }
 0x318   : > { %4586 = vmatprep.subr.bf16.mxu0 %v7594_v23 }
 0x31b   : > { %4587 = vmatpush3.bf16.msra.mxu0 %v4828_v22  ;;  %v5993_v22 = vpop.permute.xlu0 %2066 }
 0x31c   : > { %4588 = vmatprep.subr.bf16.mxu0 %v7594_v23 }
 0x31e   : > { %4553 = vmatmul.mubr.msk.bf16.gmra.mxu0 %vm7518_vm2, %v1580_v44 }
 0x31f   : > { %4589 = vmatpush3.bf16.msra.mxu0 %v4829_v59  ;;  %4556 = vmatprep.mubr.msk.bf16.mxu0 %vm7518_vm2, %v1581_v28  ;;  %v5997_v28 = vpop.permute.xlu1 %2071  ;;  %v5999_v59 = vpop.permute.xlu0 %2517 }
 0x320   : > { %4590 = vmatprep.subr.bf16.mxu0 %v7594_v23 }
 0x323   : > { %4591 = vmatpush3.bf16.msra.mxu0 %v4830_v57  ;;  %v6001_v44 = vpop.permute.xlu1 %2522  ;;  %v6003_v57 = vpop.permute.xlu0 %2527 }
 0x324   : > { %4592 = vmatprep.subr.bf16.mxu0 %v7594_v23 }
 0x326   : > { %4557 = vmatmul.mubr.msk.bf16.gmra.mxu0 %vm7518_vm2, %v1582_v9 }
 0x327   : > { %4593 = vmatpush3.bf16.msra.mxu0 %v4831_v26  ;;  %4596 = vmatprep.mubr.msk.bf16.mxu0 %vm5011_vm1, %v7594_v23  ;;  %v6005_v26 = vpop.permute.xlu1 %2532  ;;  %v6007_v9 = vpop.permute.xlu0 %3447 }
 0x328   : > { %4594 = vmatprep.subr.bf16.mxu0 %v7594_v23  ;;  %7595 = vst [vmem:[#allocation69_spill] sm:$0xff] %v6007_v9 }
 0x32b   : > { %4595 = vmatpush3.bf16.msra.mxu0 %v4832_v20  ;;  %v6009_v61 = vpop.permute.xlu1 %3452  ;;  %v6011_v20 = vpop.permute.xlu0 %3437 }
 0x32c   : > { %4773 = vmatprep.subr.msk.bf16.mxu0 %vm7519_vm3, %v5991_v43  ;;  %7596 = vst [vmem:[#allocation70_spill] sm:$0xff] %v6009_v61  ;;  %7597 = vst [vmem:[#allocation71_spill] sm:$0xff] %v6011_v20 }
 0x32f   : > { %v6013_v0 = vpop.permute.xlu1 %3442  ;;  %v6015_v35 = vpop.permute.xlu0 %3467 }
 0x330   : > { %7598 = vst [vmem:[#allocation72_spill] sm:$0xff] %v6013_v0  ;;  %7599 = vst [vmem:[#allocation73_spill] sm:$0xff] %v6015_v35 }
 0x333   : > { %v6017_v37 = vpop.permute.xlu1 %3472  ;;  %v6019_v27 = vpop.permute.xlu0 %3457 }
 0x334   : > { %7600 = vst [vmem:[#allocation74_spill] sm:$0xff] %v6017_v37  ;;  %7601 = vst [vmem:[#allocation75_spill] sm:$0xff] %v6019_v27 }
 0x337   : > { %v6021_v49 = vpop.permute.xlu1 %3462  ;;  %v6023_v45 = vpop.permute.xlu0 %3487 }
 0x338   : > { %7602 = vst [vmem:[#allocation76_spill] sm:$0xff] %v6021_v49  ;;  %7603 = vst [vmem:[#allocation77_spill] sm:$0xff] %v6023_v45 }
 0x33b   : > { %v6025_v40 = vpop.permute.xlu1 %3492  ;;  %v6027_v55 = vpop.permute.xlu0 %3477 }
 0x33c   : > { %7604 = vst [vmem:[#allocation78_spill] sm:$0xff] %v6025_v40  ;;  %7605 = vst [vmem:[#allocation79_spill] sm:$0xff] %v6027_v55 }
 0x33f   : > { %v6029_v21 = vpop.permute.xlu1 %3482  ;;  %v6031_v48 = vpop.permute.xlu0 %3497 }
 0x340   : > { %7606 = vst [vmem:[#allocation80_spill] sm:$0xff] %v6029_v21  ;;  %7607 = vst [vmem:[#allocation81_spill] sm:$0xff] %v6031_v48 }
 0x343   : > { %v6033_v38 = vpop.permute.xlu1 %3502 }
 0x344   : > { %7608 = vst [vmem:[#allocation82_spill] sm:$0xff] %v6033_v38 }
 0x362   : > { %v2989_v5 = vpop.permute.xlu0 %2988 }
 0x363   : > { %v6036_v37 = vmul.f32 %v5832_v11, %v2989_v5 }
 0x365   : > { %7609 = vst [vmem:[#allocation83_spill] sm:$0xff] %v6036_v37 }
 0x366   : > { %v2979_v35 = vpop.permute.xlu0 %2978  ;;  %v2994_v56 = vpop.permute.xlu1 %2993 }
 0x367   : > { %v6039_v49 = vmul.f32 %v5841_v39, %v2994_v56  ;;  %v6044_v55 = vmul.f32 %v2979_v35, %v5838_v41 }
 0x369   : > { %7610 = vst [vmem:[#allocation84_spill] sm:$0xff] %v6039_v49  ;;  %7611 = vst [vmem:[#allocation85_spill] sm:$0xff] %v6044_v55 }
 0x36a   : > { %v2984_v45 = vpop.permute.xlu1 %2983 }
 0x36b   : > { %v6047_v48 = vmul.f32 %v2984_v45, %v5847_v54  ;;  %v3009_v38 = vpop.permute.xlu0 %3008 }
 0x36c   : > { %v6052_v5 = vmul.f32 %v5853_v2, %v3009_v38 }
 0x36d   : > { %7612 = vst [vmem:[#allocation86_spill] sm:$0xff] %v6047_v48 }
 0x36e   : > { %v3014_v27 = vpop.permute.xlu1 %3013  ;;  %7613 = vst [vmem:[#allocation87_spill] sm:$0xff] %v6052_v5 }
 0x36f   : > { %v2999_v56 = vpop.permute.xlu0 %2998  ;;  %v6055_v11 = vmul.f32 %v5865_v14, %v3014_v27 }
 0x370   : > { %v6060_v41 = vmul.f32 %v2999_v56, %v5860_v12 }
 0x371   : > { %7614 = vst [vmem:[#allocation88_spill] sm:$0xff] %v6055_v11 }
 0x372   : > { %v3004_v35 = vpop.permute.xlu1 %3003  ;;  %7615 = vst [vmem:[#allocation89_spill] sm:$0xff] %v6060_v41 }
 0x373   : > { %v6063_v45 = vmul.f32 %v3004_v35, %v5872_v34  ;;  %v3029_v54 = vpop.permute.xlu0 %3028 }
 0x374   : > { %v6068_v2 = vmul.f32 %v5878_v7, %v3029_v54 }
 0x375   : > { %7616 = vst [vmem:[#allocation90_spill] sm:$0xff] %v6063_v45 }
 0x376   : > { %v3034_v38 = vpop.permute.xlu1 %3033  ;;  %7617 = vst [vmem:[#allocation91_spill] sm:$0xff] %v6068_v2 }
 0x377   : > { %v3019_v27 = vpop.permute.xlu0 %3018  ;;  %v6071_v14 = vmul.f32 %v5890_v13, %v3034_v38 }
 0x378   : > { %v6076_v56 = vmul.f32 %v3019_v27, %v5885_v24 }
 0x379   : > { %7618 = vst [vmem:[#allocation92_spill] sm:$0xff] %v6071_v14 }
 0x37a   : > { %v3024_v12 = vpop.permute.xlu1 %3023  ;;  %7619 = vst [vmem:[#allocation93_spill] sm:$0xff] %v6076_v56 }
 0x37b   : > { %v6079_v34 = vmul.f32 %v3024_v12, %v5896_v1  ;;  %v3049_v35 = vpop.permute.xlu0 %3048 }
 0x37c   : > { %v6084_v54 = vmul.f32 %v5902_v52, %v3049_v35 }
 0x37d   : > { %7620 = vst [vmem:[#allocation94_spill] sm:$0xff] %v6079_v34 }
 0x37e   : > { %v3054_v7 = vpop.permute.xlu1 %3053  ;;  %7621 = vst [vmem:[#allocation95_spill] sm:$0xff] %v6084_v54 }
 0x37f   : > { %v6087_v13 = vmul.f32 %v5912_v30, %v3054_v7  ;;  %v3039_v38 = vpop.permute.xlu0 %3038 }
 0x380   : > { %v6092_v27 = vmul.f32 %v3039_v38, %v5909_v17 }
 0x381   : > { %7622 = vst [vmem:[#allocation96_spill] sm:$0xff] %v6087_v13 }
 0x382   : > { %v3044_v24 = vpop.permute.xlu1 %3043  ;;  %7623 = vst [vmem:[#allocation97_spill] sm:$0xff] %v6092_v27 }
 0x383   : > { %v6095_v1 = vmul.f32 %v3044_v24, %v5918_v3 }
 0x385   : > { %7624 = vst [vmem:[#allocation98_spill] sm:$0xff] %v6095_v1 }
 0x3ae   : > { %v4510_v40 = vpop.f32.mrf.mxu0 }
 0x3af   : > { %v1443_v39 = vmul.f32 %v4510_v40, %v5464_v53 }
 0x3b0   : > { %v1378_v52 = vpop.f32.mrf.mxu0 }
 0x3b1   : > { %v1441_v30 = vmul.f32 %v1378_v52, %v5454_v46 }
 0x3b2   : > { %v4511_v35 = vpop.f32.mrf.mxu0 }
 0x3b3   : > { %v1444_v38 = vmul.f32 %v4511_v35, %v5471_v62 }
 0x3b4   : > { %v1381_v21 = vpop.f32.mrf.mxu0 }
 0x3b5   : > { %v1442_v7 = vmul.f32 %v1381_v21, %v5459_v50 }
 0x3b6   : > { %v4514_v2 = vpop.f32.mrf.mxu0 }
 0x3b7   : > { %v1457_v54 = vadd.f32 %v1442_v7, %v1441_v30  ;;  %v1447_v46 = vmul.f32 %v4514_v2, %v5489_v25 }
 0x3b8   : > { %v1394_v17 = vpop.f32.mrf.mxu0 }
 0x3b9   : > { %v1458_v3 = vadd.f32 %v1457_v54, %v1443_v39  ;;  %v1445_v13 = vmul.f32 %v1394_v17, %v5477_v10 }
 0x3ba   : > { %v4515_v24 = vpop.f32.mrf.mxu0 }
 0x3bb   : > { %v1459_v12 = vadd.f32 %v1458_v3, %v1444_v38  ;;  %v1448_v40 = vmul.f32 %v4515_v24, %v5495_v33 }
 0x3bc   : > { %v1397_v27 = vpop.f32.mrf.mxu0 }
 0x3bd   : > { %v1460_v1 = vadd.f32 %v1459_v12, %v1445_v13  ;;  %v1446_v14 = vmul.f32 %v1397_v27, %v5483_v19 }
 0x3be   : > { %v4518_v56 = vpop.f32.mrf.mxu0 }
 0x3bf   : > { %v1461_v50 = vadd.f32 %v1460_v1, %v1446_v14  ;;  %v1451_v25 = vmul.f32 %v4518_v56, %v5513_v63 }
 0x3c0   : > { %v1410_v21 = vpop.f32.mrf.mxu0 }
 0x3c1   : > { %v1462_v52 = vadd.f32 %v1461_v50, %v1447_v46  ;;  %v1449_v39 = vmul.f32 %v1410_v21, %v5501_v47  ;;  %v4970_v47 = vld [vmem:[%s7440_s6] sm:$0xff] }
 0x3c2   : > { %v4519_v53 = vpop.f32.mrf.mxu0 }
 0x3c3   : > { %v1463_v30 = vadd.f32 %v1462_v52, %v1448_v40  ;;  %v1452_v33 = vmul.f32 %v4519_v53, %v5519_v16  ;;  %v4972_v16 = vld [vmem:[%s7440_s6 + $0x10] sm:$0xff]  ;;  %v4973_v53 = vld [vmem:[%s7440_s6 + $0x18] sm:$0xff] }
 0x3c4   : > { %v1413_v62 = vpop.f32.mrf.mxu0 }
 0x3c5   : > { %v1464_v10 = vadd.f32 %v1463_v30, %v1449_v39  ;;  %v1450_v35 = vmul.f32 %v1413_v62, %v5507_v6  ;;  %v4971_v6 = vld [vmem:[%s7440_s6 + $0x8] sm:$0xff] }
 0x3c6   : > { %v4522_v54 = vpop.f32.mrf.mxu0 }
 0x3c7   : > { %v1465_v19 = vadd.f32 %v1464_v10, %v1450_v35 }
 0x3c8   : > { %v1426_v13 = vpop.f32.mrf.mxu0 }
 0x3c9   : > { %v1466_v14 = vadd.f32 %v1465_v19, %v1451_v25  ;;  %v1453_v63 = vmul.f32 %v1426_v13, %v5525_v42  ;;  %v4974_v42 = vld [vmem:[%s7440_s6 + $0x20] sm:$0xff] }
 0x3ca   : > { %v4523_v12 = vpop.f32.mrf.mxu0 }
 0x3cb   : > { %v1467_v17 = vadd.f32 %v1466_v14, %v1452_v33 }
 0x3cc   : > { %v1429_v27 = vpop.f32.mrf.mxu0 }
 0x3cd   : > { %v1468_v21 = vadd.f32 %v1467_v17, %v1453_v63  ;;  %v1454_v52 = vmul.f32 %v1429_v27, %v5531_v15  ;;  %v4975_v15 = vld [vmem:[%s7440_s6 + $0x28] sm:$0xff] }
 0x3ce   : > { %v4546_v2 = vpop.f32.mrf.mxu0 }
 0x3cf   : > { %v1710_v46 = vmul.f32 %v4972_v16, %v4546_v2  ;;  %v1469_v13 = vadd.f32 %v1468_v21, %v1454_v52  ;;  %v1455_v2 = vmul.f32 %v4522_v54, %v5537_v36  ;;  %v4978_v36 = vld [vmem:[%s7440_s6 + $0x40] sm:$0xff]  ;;  %v4979_v21 = vld [vmem:[%s7440_s6 + $0x48] sm:$0xff] }
 0x3d0   : > { %v1645_v1 = vpop.f32.mrf.mxu0 }
 0x3d1   : > { %v1708_v3 = vmul.f32 %v4970_v47, %v1645_v1  ;;  %v4976_v1 = vld [vmem:[%s7440_s6 + $0x30] sm:$0xff]  ;;  %v1470_v17 = vadd.f32 %v1469_v13, %v1455_v2  ;;  %v4977_v47 = vld [vmem:[%s7440_s6 + $0x38] sm:$0xff]  ;;  %v4982_v13 = vld [vmem:[%s7440_s6 + $0x60] sm:$0xff] }
 0x3d2   : > { %v4547_v7 = vpop.f32.mrf.mxu0 }
 0x3d3   : > { %v1711_v30 = vmul.f32 %v4973_v53, %v4547_v7 }
 0x3d4   : > { %v1648_v38 = vpop.f32.mrf.mxu0 }
 0x3d5   : > { %v1709_v24 = vmul.f32 %v4971_v6, %v1648_v38 }
 0x3d6   : > { %v4550_v56 = vpop.f32.mrf.mxu0 }
 0x3d7   : > { %v1724_v50 = vadd.f32 %v1709_v24, %v1708_v3  ;;  %v1714_v33 = vmul.f32 %v4976_v1, %v4550_v56  ;;  %v1456_v24 = vmul.f32 %v4523_v12, %v5543_v58  ;;  %v4980_v58 = vld [vmem:[%s7440_s6 + $0x50] sm:$0xff] }
 0x3d8   : > { %v1661_v40 = vpop.f32.mrf.mxu0 }
 0x3d9   : > { %v1725_v62 = vadd.f32 %v1724_v50, %v1710_v46  ;;  %v1712_v10 = vmul.f32 %v4974_v42, %v1661_v40  ;;  %v1471_v46 = vadd.f32 %v1470_v17, %v1456_v24 }
 0x3da   : > { %v4551_v39 = vpop.f32.mrf.mxu0 }
 0x3db   : > { %v1726_v35 = vadd.f32 %v1725_v62, %v1711_v30  ;;  %v1715_v3 = vmul.f32 %v4977_v47, %v4551_v39  ;;  %v1472_v30 = vrot.slane %v1471_v46, 4  ;;  %v4981_v39 = vld [vmem:[%s7440_s6 + $0x58] sm:$0xff] }
 0x3dc   : > { %v1664_v19 = vpop.f32.mrf.mxu0  ;;  %v4985_v47 = vld [vmem:[%s7440_s6 + $0x78] sm:$0xff] }
 0x3dd   : > { %v1727_v25 = vadd.f32 %v1726_v35, %v1712_v10  ;;  %v1713_v27 = vmul.f32 %v4975_v15, %v1664_v19  ;;  %v1473_v15 = vadd.f32 %v1472_v30, %v1471_v46 }
 0x3de   : > { %v4554_v14 = vpop.f32.mrf.mxu0 }
 0x3df   : > { %v1728_v7 = vadd.f32 %v1727_v25, %v1713_v27  ;;  %v1718_v12 = vmul.f32 %v4980_v58, %v4554_v14  ;;  %v4983_v14 = vld [vmem:[%s7440_s6 + $0x68] sm:$0xff] }
 0x3e0   : > { %v1677_v38 = vpop.f32.mrf.mxu0 }
 0x3e1   : > { %v1729_v6 = vadd.f32 %v1728_v7, %v1714_v33  ;;  %v1716_v54 = vmul.f32 %v4978_v36, %v1677_v38  ;;  %v4984_v33 = vld [vmem:[%s7440_s6 + $0x70] sm:$0xff]  ;;  %v1474_v38 = vrot.slane %v1473_v15, 2 }
 0x3e2   : > { %v4555_v63 = vpop.f32.mrf.mxu0 }
 0x3e3   : > { %v1730_v16 = vadd.f32 %v1729_v6, %v1715_v3  ;;  %v1719_v42 = vmul.f32 %v4981_v39, %v4555_v63  ;;  %v1475_v63 = vadd.f32 %v1474_v38, %v1473_v15  ;;  %v7625_v39 = vld [vmem:[#allocation21_spill] sm:$0xff] }
 0x3e4   : > { %v1680_v56 = vpop.f32.mrf.mxu0  ;;  %v7633_v15 = vld [vmem:[#allocation45_spill] sm:$0xff] }
 0x3e5   : > { %v1731_v50 = vadd.f32 %v1730_v16, %v1716_v54  ;;  %v1717_v52 = vmul.f32 %v4979_v21, %v1680_v56  ;;  %v1476_v16 = vrot.slane %v1475_v63, 1  ;;  %v7637_v38 = vld [vmem:[#allocation53_spill] sm:$0xff] }
 0x3e6   : > { %v4558_v40 = vpop.f32.mrf.mxu0 }
 0x3e7   : > { %v1732_v53 = vadd.f32 %v1731_v50, %v1717_v52  ;;  %v1722_v7 = vmul.f32 %v4984_v33, %v4558_v40  ;;  %v1477_v50 = vadd.f32 %v1476_v16, %v1475_v63  ;;  %v2075_v52 = vmul.f32 %v5693_v51, %v5200_v32  ;;  %v7628_v32 = vld [vmem:[#allocation7_spill] sm:$0xff]  ;;  %v7635_v33 = vld [vmem:[#allocation6_spill] sm:$0xff]  ;;  %v7640_v63 = vld [vmem:[#allocation9_spill] sm:$0xff] }
 0x3e8   : > { %v1693_v62 = vpop.f32.mrf.mxu0  ;;  %v7629_v51 = vld [vmem:[#allocation43_spill] sm:$0xff] }
 0x3e9   : > { %v1733_v10 = vadd.f32 %v1732_v53, %v1718_v12  ;;  %v1720_v19 = vmul.f32 %v4982_v13, %v1693_v62  ;;  %v1748_v58 = vsel %vm1747_vm5, %v5888_v31, %v1477_v50  ;;  %v2074_v12 = vmul.f32 %v5671_v4, %v5194_v29  ;;  %v7631_v29 = vld [vmem:[#allocation2_spill] sm:$0xff] }
 0x3ea   : > { %v4559_v35 = vpop.f32.mrf.mxu0  ;;  %v2079_v31 = vmul.f32 %v7629_v51, %v7628_v32  ;;  %v7643_v50 = vld [vmem:[#allocation10_spill] sm:$0xff]  ;;  %v7651_v51 = vld [vmem:[#allocation12_spill] sm:$0xff] }
 0x3eb   : > { %v1734_v25 = vadd.f32 %v1733_v10, %v1719_v42  ;;  %v1723_v3 = vmul.f32 %v4985_v47, %v4559_v35  ;;  %v2090_v62 = vpack.c.bf16 %v2075_v52, %v2074_v12  ;;  %v2129_v42 = vsel %vm7519_vm3, %v7625_v39, 0  ;;  %v7626_v10 = vld [vmem:[#allocation31_spill] sm:$0xff]  ;;  %v7646_v12 = vld [vmem:[#allocation50_spill] sm:$0xff]  ;;  %v7649_v39 = vld [vmem:[#allocation56_spill] sm:$0xff] }
 0x3ec   : > { %v1696_v27 = vpop.f32.mrf.mxu0  ;;  %v7627_v35 = vld [vmem:[#allocation3_spill] sm:$0xff] }
 0x3ed   : > { %v1735_v2 = vadd.f32 %v1734_v25, %v1720_v19  ;;  %v1721_v1 = vmul.f32 %v4983_v14, %v1696_v27  ;;  %v2077_v13 = vmul.f32 %v7627_v35, %v7626_v10  ;;  %v7630_v19 = vld [vmem:[#allocation27_spill] sm:$0xff]  ;;  %v7632_v25 = vld [vmem:[#allocation5_spill] sm:$0xff] }
 0x3ee   : > { %v2076_v4 = vmul.f32 %v7631_v29, %v7630_v19  ;;  %v2078_v27 = vmul.f32 %v7633_v15, %v7632_v25  ;;  %v7644_v52 = vld [vmem:[#allocation15_spill] sm:$0xff] }
 0x3ef   : > { %v1736_v17 = vadd.f32 %v1735_v2, %v1721_v1  ;;  %v7634_v1 = vld [vmem:[#allocation38_spill] sm:$0xff] }
 0x3f0   : > { %v2091_v2 = vpack.c.bf16 %v2077_v13, %v2076_v4  ;;  %v2092_v14 = vpack.c.bf16 %v2079_v31, %v2078_v27  ;;  %v7650_v13 = vld [vmem:[#allocation14_spill] sm:$0xff]  ;;  %v2088_v31 = vmul.f32 %v7651_v51, %v5993_v22  ;;  %v7652_v22 = vld [vmem:[#allocation59_spill] sm:$0xff] }
 0x3f1   : > { %v1737_v6 = vadd.f32 %v1736_v17, %v1722_v7  ;;  %v2081_v7 = vmul.f32 %v7635_v33, %v7634_v1  ;;  %v7636_v17 = vld [vmem:[#allocation11_spill] sm:$0xff]  ;;  %v2089_v32 = vmul.f32 %v7650_v13, %v5997_v28  ;;  %v2590_v28 = vsel %vm7519_vm3, %v5991_v43, 0  ;;  %v7657_v43 = vld [vmem:[#allocation64_spill] sm:$0xff]  ;;  %v7668_v13 = vld [vmem:[#allocation66_spill] sm:$0xff] }
 0x3f2   : > { %v2083_v47 = vmul.f32 %v7637_v38, %v7636_v17  ;;  %v7653_v1 = vpack.c.bf16 %v5779_v8, %v7652_v22  ;;  %v6311_v22 = vld [vmem:[%s7440_s6 + $0xb0] sm:$0xff] }
 0x3f3   : > { %v1738_v24 = vadd.f32 %v1737_v6, %v1723_v3  ;;  %v7638_v3 = vld [vmem:[#allocation40_spill] sm:$0xff]  ;;  %v2097_v19 = vpack.c.bf16 %v2089_v32, %v2088_v31  ;;  %v7669_v32 = vld [vmem:[#allocation65_spill] sm:$0xff] }
 0x3f4   : > { %v7639_v6 = vld [vmem:[#allocation4_spill] sm:$0xff]  ;;  %v7670_v51 = vpack.c.bf16 %v7668_v13, %v7669_v32 }
 0x3f5   : > { %v1739_v36 = vrot.slane %v1738_v24, 4  ;;  %v7671_v31 = vld [vmem:[#allocation24_spill] sm:$0xff] }
 0x3f7   : > { %v1740_v54 = vadd.f32 %v1739_v36, %v1738_v24  ;;  %v2080_v24 = vmul.f32 %v7639_v6, %v7638_v3  ;;  %v7641_v36 = vld [vmem:[#allocation55_spill] sm:$0xff]  ;;  %v7655_v3 = vld [vmem:[#allocation58_spill] sm:$0xff] }
 0x3f9   : > { %v1741_v46 = vrot.slane %v1740_v54, 2  ;;  %v2093_v16 = vpack.c.bf16 %v2081_v7, %v2080_v24  ;;  %v7658_v24 = vld [vmem:[#allocation63_spill] sm:$0xff] }
 0x3fa   : > { %v7659_v8 = vpack.c.bf16 %v7657_v43, %v7658_v24  ;;  %v6328_v43 = vld [vmem:[%s7440_s6 + $0xc0] sm:$0xff]  ;;  %v6333_v24 = vld [vmem:[%s7440_s6 + $0xd8] sm:$0xff] }
 0x3fb   : > { %v1742_v56 = vadd.f32 %v1741_v46, %v1740_v54  ;;  %v2082_v54 = vmul.f32 %v7641_v36, %v7640_v63 }
 0x3fd   : > { %v1743_v21 = vrot.slane %v1742_v56, 1  ;;  %v2094_v46 = vpack.c.bf16 %v2083_v47, %v2082_v54  ;;  %v7654_v47 = vld [vmem:[#allocation60_spill] sm:$0xff] }
 0x3fe   : > { %v7656_v6 = vpack.c.bf16 %v7654_v47, %v7655_v3 }
 0x3ff   : > { %v1744_v40 = vadd.f32 %v1743_v21, %v1742_v56  ;;  %v7642_v56 = vld [vmem:[#allocation48_spill] sm:$0xff] }
 0x400   : > { %v2085_v21 = vmul.f32 %v7643_v50, %v7642_v56  ;;  %v7661_v56 = vld [vmem:[#allocation61_spill] sm:$0xff] }
 0x401   : > { %v1750_v53 = vsel %vm1749_vm6, %v1748_v58, %v1744_v40  ;;  %v7645_v40 = vld [vmem:[#allocation57_spill] sm:$0xff] }
 0x402   : > { %v1751_v30 = vpack.c.bf16 %v1750_v53, %v1750_v53  ;;  %v2087_v58 = vmul.f32 %v7645_v40, %v7644_v52  ;;  %v7647_v53 = vld [vmem:[#allocation8_spill] sm:$0xff]  ;;  %v7664_v52 = vld [vmem:[#allocation67_spill] sm:$0xff] }
 0x404   : > { %4577 = vmatmul.mubr.bf16.vlgmr.msra.gmra.mxu1 %v1751_v30  ;;  %v2084_v30 = vmul.f32 %v7647_v53, %v7646_v12  ;;  %v7666_v12 = vld [vmem:[#allocation25_spill] sm:$0xff] }
 0x405   : > { %4601 = vmatpush3.bf16.msra.mxu1 %v2129_v42  ;;  %4602 = vmatprep.mubr.msk.bf16.mxu1 %vm7518_vm2, %v2090_v62  ;;  %v7648_v62 = vld [vmem:[#allocation13_spill] sm:$0xff]  ;;  %v2548_v53 = vmul.f32 %v6001_v44, %v7666_v12  ;;  %v2550_v44 = vmul.f32 %v7671_v31, %v6005_v26 }
 0x406   : > { %4618 = vmatprep.subr.bf16.mxu1 %v7594_v23  ;;  %v2086_v42 = vmul.f32 %v7649_v39, %v7648_v62  ;;  %v2095_v10 = vpack.c.bf16 %v2085_v21, %v2084_v30  ;;  %v7663_v21 = vld [vmem:[#allocation68_spill] sm:$0xff]  ;;  %v7667_v62 = vld [vmem:[#allocation23_spill] sm:$0xff] }
 0x407   : > { %v7665_v40 = vpack.c.bf16 %v7663_v21, %v7664_v52  ;;  %v2547_v39 = vmul.f32 %v5999_v59, %v7667_v62  ;;  %v6272_v59 = vld [vmem:[%s7440_s6 + $0xa8] sm:$0xff]  ;;  %v6368_v62 = vld [vmem:[%s7440_s6 + $0xe0] sm:$0xff] }
 0x408   : > { %v2096_v35 = vpack.c.bf16 %v2087_v58, %v2086_v42  ;;  %7674 = vst [vmem:[#allocation31_spill] sm:$0xff] %v6368_v62 }
 0x40c   : > { %4603 = vmatmul.mubr.msk.bf16.vlgmr.msra.gmra.mxu1 %vm7518_vm2, %v2091_v2 }
 0x40d   : > { %4606 = vmatprep.mubr.msk.bf16.mxu1 %vm7518_vm2, %v2092_v14 }
 0x414   : > { %4607 = vmatmul.mubr.msk.bf16.gmra.mxu1 %vm7518_vm2, %v2093_v16 }
 0x415   : > { %4610 = vmatprep.mubr.msk.bf16.mxu1 %vm7518_vm2, %v2094_v46  ;;  %v7660_v46 = vld [vmem:[#allocation62_spill] sm:$0xff] }
 0x416   : > { %v7662_v50 = vpack.c.bf16 %v7660_v46, %v7661_v56  ;;  %v6343_v46 = vld [vmem:[%s7440_s6 + $0x90] sm:$0xff] }
 0x41c   : > { %4611 = vmatmul.mubr.msk.bf16.gmra.mxu1 %vm7518_vm2, %v2095_v10  ;;  %v2557_v10 = vpack.c.bf16 %v2548_v53, %v2547_v39  ;;  %v6363_v53 = vld [vmem:[%s7440_s6 + $0xd0] sm:$0xff]  ;;  %v6373_v39 = vld [vmem:[%s7440_s6 + $0xf8] sm:$0xff] }
 0x41d   : > { %4614 = vmatprep.mubr.msk.bf16.mxu1 %vm7518_vm2, %v2096_v35  ;;  %7675 = vst [vmem:[#allocation3_spill] sm:$0xff] %v6373_v39 }
 0x424   : > { %4615 = vmatmul.mubr.msk.bf16.gmra.mxu1 %vm7518_vm2, %v2097_v19 }
 0x425   : > { %4634 = vmatprep.mubr.msk.bf16.mxu1 %vm5011_vm1, %v7594_v23 }
 0x4c4   : > { %v1850_v29 = vpop.f32.mrf.mxu1 }
 0x4c5   : > { %vm1856_vm7 = vcmp.gt.f32.partialorder %v1850_v29, 0.0  ;;  %v1857_v4 = vmul.f32 0.1, %v1850_v29 }
 0x4c6   : > { %v4578_v25 = vpop.f32.mrf.mxu1 }
 0x4c7   : > { %v1858_v15 = vsel %vm1856_vm7, %v1850_v29, %v1857_v4  ;;  %v7672_v29 = vld [vmem:[#allocation22_spill] sm:$0xff] }
 0x4c8   : > { %v1859_v27 = vpack.c.bf16 %v1858_v15, %v1858_v15  ;;  %v1853_v2 = vpop.f32.mrf.mxu1  ;;  %v2549_v4 = vmul.f32 %v7672_v29, %v6003_v57  ;;  %v6279_v25 = vld [vmem:[%s7440_s6 + $0xa0] sm:$0xff]  ;;  %v6284_v15 = vld [vmem:[%s7440_s6 + $0xb8] sm:$0xff]  ;;  %v6296_v57 = vld [vmem:[%s7440_s6 + $0xc8] sm:$0xff] }
 0x4ca   : > { %v4579_v14 = vpop.f32.mrf.mxu1  ;;  %4597 = vmatmul.mubr.bf16.vlgmr.msra.gmra.mxu0 %v1859_v27  ;;  %v6291_v27 = vld [vmem:[%s7440_s6 + $0x88] sm:$0xff]  ;;  %v2558_v2 = vpack.c.bf16 %v2550_v44, %v2549_v4  ;;  %v6394_v4 = vld [vmem:[%s7440_s6 + $0xf0] sm:$0xff] }
 0x4cb   : > { %4639 = vmatpush3.bf16.msra.mxu0 %v2590_v28  ;;  %4640 = vmatprep.mubr.msk.bf16.mxu0 %vm7518_vm2, %v7653_v1  ;;  %v6301_v14 = vld [vmem:[%s7440_s6 + $0x80] sm:$0xff]  ;;  %v6306_v28 = vld [vmem:[%s7440_s6 + $0x98] sm:$0xff]  ;;  %7676 = vst [vmem:[#allocation7_spill] sm:$0xff] %v6394_v4 }
 0x4cc   : > { %v6215_v33 = vpop.f32.mrf.mxu1  ;;  %4656 = vmatprep.subr.bf16.mxu0 %v7594_v23 }
 0x4cd   : > { %v2230_v31 = vadd.f32 %v6215_v33, %v6343_v46 }
 0x4ce   : > { %v6218_v7 = vpop.f32.mrf.mxu1 }
 0x4cf   : > { %v2228_v52 = vadd.f32 %v6301_v14, %v6218_v7 }
 0x4d0   : > { %v6220_v17 = vpop.f32.mrf.mxu1 }
 0x4d2   : > { %v6222_v38 = vpop.f32.mrf.mxu1  ;;  %4641 = vmatmul.mubr.msk.bf16.vlgmr.msra.gmra.mxu0 %vm7518_vm2, %v7656_v6 }
 0x4d3   : > { %4644 = vmatprep.mubr.msk.bf16.mxu0 %vm7518_vm2, %v7659_v8  ;;  %v6338_v8 = vld [vmem:[%s7440_s6 + $0xe8] sm:$0xff]  ;;  %v2229_v56 = vadd.f32 %v6291_v27, %v6222_v38 }
 0x4d4   : > { %v6232_v63 = vpop.f32.mrf.mxu1  ;;  %7673 = vst [vmem:[#allocation21_spill] sm:$0xff] %v6338_v8 }
 0x4d5   : > { %v2234_v12 = vadd.f32 %v6232_v63, %v6311_v22 }
 0x4d6   : > { %v6234_v36 = vpop.f32.mrf.mxu1 }
 0x4d7   : > { %v2232_v3 = vadd.f32 %v6279_v25, %v6234_v36  ;;  %v2246_v41 = vmax.f32 %v2230_v31, %v2234_v12 }
 0x4d8   : > { %v6236_v54 = vpop.f32.mrf.mxu1 }
 0x4d9   : > { %v6323_v6 = vadd.f32 %v6236_v54, %v6284_v15  ;;  %v2244_v44 = vmax.f32 %v2228_v52, %v2232_v3 }
 0x4da   : > { %v6238_v16 = vpop.f32.mrf.mxu1  ;;  %4645 = vmatmul.mubr.msk.bf16.gmra.mxu0 %vm7518_vm2, %v7662_v50 }
 0x4db   : > { %4648 = vmatprep.mubr.msk.bf16.mxu0 %vm7518_vm2, %v7665_v40  ;;  %v6315_v1 = vadd.f32 %v6272_v59, %v6238_v16  ;;  %v2231_v40 = vadd.f32 %v6220_v17, %v6306_v28 }
 0x4dc   : > { %v6248_v58 = vpop.f32.mrf.mxu1 }
 0x4dd   : > { %v2247_v29 = vmax.f32 %v2231_v40, %v6323_v6 }
 0x4de   : > { %v6252_v30 = vpop.f32.mrf.mxu1 }
 0x4df   : > { %v2236_v13 = vadd.f32 %v6328_v43, %v6252_v30 }
 0x4e0   : > { %v6256_v42 = vpop.f32.mrf.mxu1 }
 0x4e1   : > { %v6382_v32 = vadd.f32 %v6256_v42, %v6333_v24  ;;  %v2248_v45 = vmax.f32 %v2244_v44, %v2236_v13 }
 0x4e2   : > { %v6258_v35 = vpop.f32.mrf.mxu1  ;;  %4649 = vmatmul.mubr.msk.bf16.gmra.mxu0 %vm7518_vm2, %v7670_v51 }
 0x4e3   : > { %4652 = vmatprep.mubr.msk.bf16.mxu0 %vm7518_vm2, %v2557_v10  ;;  %v6349_v50 = vadd.f32 %v6296_v57, %v6258_v35  ;;  %v2245_v10 = vmax.f32 %v2229_v56, %v6315_v1  ;;  %v2251_v37 = vmax.f32 %v2247_v29, %v6382_v32 }
 0x4e4   : > { %v6267_v19 = vpop.f32.mrf.mxu1 }
 0x4e5   : > { %v2249_v34 = vmax.f32 %v2245_v10, %v6349_v50  ;;  %v6412_v49 = vadd.f32 %v6267_v19, %v6394_v4 }
 0x4e6   : > { %v6286_v26 = vpop.f32.mrf.mxu1 }
 0x4e7   : > { %v6403_v5 = vadd.f32 %v6368_v62, %v6286_v26 }
 0x4e8   : > { %v6317_v47 = vpop.f32.mrf.mxu1 }
 0x4e9   : > { %v6407_v11 = vadd.f32 %v6317_v47, %v6373_v39  ;;  %v2252_v48 = vmax.f32 %v2248_v45, %v6403_v5 }
 0x4ea   : > { %v6351_v21 = vpop.f32.mrf.mxu1  ;;  %4653 = vmatmul.mubr.msk.bf16.gmra.mxu0 %vm7518_vm2, %v2558_v2  ;;  %v6398_v2 = vadd.f32 %v6248_v58, %v6363_v53 }
 0x4eb   : > { %4672 = vmatprep.mubr.msk.bf16.mxu0 %vm5011_vm1, %v7594_v23  ;;  %v6386_v51 = vadd.f32 %v6338_v8, %v6351_v21  ;;  %v2255_v61 = vmax.f32 %v2251_v37, %v6407_v11 }
 0x4ec   : > { %v2250_v10 = vmax.f32 %v2246_v41, %v6398_v2 }
 0x4ed   : > { %v2253_v55 = vmax.f32 %v2249_v34, %v6386_v51 }
 0x4ee   : > { %v2254_v18 = vmax.f32 %v2250_v10, %v6412_v49 }
 0x4ef   : > { %v2256_v9 = vmax.f32 %v2252_v48, %v2253_v55 }
 0x4f0   : > { %v2257_v0 = vmax.f32 %v2254_v18, %v2255_v61 }
 0x4f2   : > { %v2258_v20 = vmax.f32 %v2256_v9, %v2257_v0 }
 0x4f4   : > { %v2259_v44 = vrot.slane %v2258_v20, 4 }
 0x4f6   : > { %v2260_v60 = vmax.f32 %v2258_v20, %v2259_v44 }
 0x4f8   : > { %v2261_v29 = vrot.slane %v2260_v60, 2 }
 0x4fa   : > { %v2262_v8 = vmax.f32 %v2260_v60, %v2261_v29 }
 0x4fc   : > { %v2263_v39 = vrot.slane %v2262_v8, 1 }
 0x4fe   : > { %v6419_v62 = vmax.f32 %v2262_v8, %v2263_v39 }
 0x500   : > { %v2265_v34 = vsub.f32 %v2228_v52, %v6419_v62  ;;  %v2266_v41 = vsub.f32 %v2229_v56, %v6419_v62  ;;  %v2267_v37 = vsub.f32 %v2230_v31, %v6419_v62  ;;  %v2268_v55 = vsub.f32 %v2231_v40, %v6419_v62 }
 0x501   : > { %v2269_v48 = vsub.f32 %v2232_v3, %v6419_v62  ;;  %v2270_v0 = vsub.f32 %v6315_v1, %v6419_v62  ;;  %v2271_v8 = vsub.f32 %v2234_v12, %v6419_v62  ;;  %v2272_v3 = vsub.f32 %v6323_v6, %v6419_v62 }
 0x502   : > { %v2281_v4 = vmul.f32 1.442695, %v2265_v34  ;;  %v2283_v45 = vmul.f32 1.442695, %v2266_v41  ;;  %v2285_v18 = vmul.f32 1.442695, %v2267_v37  ;;  %v2273_v31 = vsub.f32 %v2236_v13, %v6419_v62 }
 0x503   : > { %v2287_v60 = vmul.f32 1.442695, %v2268_v55  ;;  %v2289_v9 = vmul.f32 1.442695, %v2269_v48  ;;  %v2291_v56 = vmul.f32 1.442695, %v2270_v0  ;;  %v2274_v44 = vsub.f32 %v6349_v50, %v6419_v62 }
 0x504   : > { %4834 = vpow2.f32 %v2281_v4  ;;  %v2293_v40 = vmul.f32 1.442695, %v2271_v8  ;;  %v2295_v4 = vmul.f32 1.442695, %v2272_v3  ;;  %v2297_v29 = vmul.f32 1.442695, %v2273_v31 }
 0x505   : > { %4836 = vpow2.f32 %v2283_v45  ;;  %v2275_v41 = vsub.f32 %v6398_v2, %v6419_v62  ;;  %v2299_v13 = vmul.f32 1.442695, %v2274_v44  ;;  %v2276_v55 = vsub.f32 %v6382_v32, %v6419_v62 }
 0x506   : > { %4838 = vpow2.f32 %v2285_v18  ;;  %v2278_v8 = vsub.f32 %v6386_v51, %v6419_v62  ;;  %v2279_v3 = vsub.f32 %v6412_v49, %v6419_v62  ;;  %v2280_v31 = vsub.f32 %v6407_v11, %v6419_v62 }
 0x507   : > { %4840 = vpow2.f32 %v2287_v60  ;;  %v2301_v50 = vmul.f32 1.442695, %v2275_v41  ;;  %v2277_v60 = vsub.f32 %v6403_v5, %v6419_v62  ;;  %v2303_v2 = vmul.f32 1.442695, %v2276_v55 }
 0x508   : > { %4842 = vpow2.f32 %v2289_v9  ;;  %v2307_v5 = vmul.f32 1.442695, %v2278_v8  ;;  %v2311_v44 = vmul.f32 1.442695, %v2280_v31  ;;  %v7678_v31 = vld [vmem:[#allocation19_spill] sm:$0xff] }
 0x509   : > { %4844 = vpow2.f32 %v2291_v56  ;;  %v2305_v32 = vmul.f32 1.442695, %v2277_v60 }
 0x50a   : > { %4846 = vpow2.f32 %v2293_v40 }
 0x50b   : > { %4848 = vpow2.f32 %v2295_v4  ;;  %v2309_v4 = vmul.f32 1.442695, %v2279_v3 }
 0x50c   : > { %4850 = vpow2.f32 %v2297_v29 }
 0x50d   : > { %4852 = vpow2.f32 %v2299_v13 }
 0x50e   : > { %4854 = vpow2.f32 %v2301_v50 }
 0x50f   : > { %4856 = vpow2.f32 %v2303_v2 }
 0x510   : > { %4858 = vpow2.f32 %v2305_v32 }
 0x511   : > { %v6428_v61 = vpop.eup %4834  ;;  %4860 = vpow2.f32 %v2307_v5 }
 0x512   : > { %v6430_v20 = vpop.eup %4836  ;;  %4862 = vpow2.f32 %v2309_v4 }
 0x513   : > { %v2313_v52 = vadd.f32 %v6430_v20, %v6428_v61  ;;  %v6437_v39 = vpop.eup %4838  ;;  %4864 = vpow2.f32 %v2311_v44 }
 0x514   : > { %v6441_v10 = vpop.eup %4840 }
 0x515   : > { %v2314_v1 = vadd.f32 %v6437_v39, %v2313_v52  ;;  %v6446_v6 = vpop.eup %4842 }
 0x516   : > { %v6451_v45 = vpop.eup %4844 }
 0x517   : > { %v2315_v12 = vadd.f32 %v6441_v10, %v2314_v1  ;;  %v6456_v18 = vpop.eup %4846 }
 0x518   : > { %v6461_v0 = vpop.eup %4848 }
 0x519   : > { %v2316_v34 = vadd.f32 %v6446_v6, %v2315_v12  ;;  %v6466_v56 = vpop.eup %4850 }
 0x51a   : > { %v4853_v40 = vpop.eup %4852 }
 0x51b   : > { %v2317_v37 = vadd.f32 %v6451_v45, %v2316_v34  ;;  %v4855_v12 = vpop.eup %4854 }
 0x51c   : > { %v4857_v29 = vpop.eup %4856 }
 0x51d   : > { %v2318_v48 = vadd.f32 %v6456_v18, %v2317_v37  ;;  %v4859_v41 = vpop.eup %4858 }
 0x51e   : > { %v4861_v37 = vpop.eup %4860 }
 0x51f   : > { %v2319_v9 = vadd.f32 %v6461_v0, %v2318_v48  ;;  %v4863_v55 = vpop.eup %4862 }
 0x520   : > { %v4865_v48 = vpop.eup %4864 }
 0x521   : > { %v2320_v52 = vadd.f32 %v6466_v56, %v2319_v9 }
 0x523   : > { %v2321_v1 = vadd.f32 %v4853_v40, %v2320_v52  ;;  %v7677_v52 = vld [vmem:[#allocation17_spill] sm:$0xff] }
 0x524   : > { %v3318_v3 = vsub.s32 2, %v7677_v52  ;;  %v3777_v5 = vsub.s32 3, %v7677_v52 }
 0x525   : > { %v2322_v51 = vadd.f32 %v4855_v12, %v2321_v1 }
 0x527   : > { %v2323_v34 = vadd.f32 %v4857_v29, %v2322_v51 }
 0x529   : > { %v2324_v13 = vadd.f32 %v4859_v41, %v2323_v34 }
 0x52b   : > { %v2325_v49 = vadd.f32 %v4861_v37, %v2324_v13 }
 0x52d   : > { %v2326_v50 = vadd.f32 %v4863_v55, %v2325_v49 }
 0x52f   : > { %v2327_v60 = vadd.f32 %v4865_v48, %v2326_v50 }
 0x531   : > { %v2328_v2 = vrot.slane %v2327_v60, 4 }
 0x533   : > { %v2329_v9 = vadd.f32 %v2328_v2, %v2327_v60 }
 0x535   : > { %v2330_v11 = vrot.slane %v2329_v9, 2 }
 0x537   : > { %v2331_v62 = vadd.f32 %v2330_v11, %v2329_v9 }
 0x539   : > { %v2332_v8 = vrot.slane %v2331_v62, 1 }
 0x53b   : > { %v2333_v32 = vadd.f32 %v2332_v8, %v2331_v62 }
 0x53d   : > { %4866 = vrcp.f32 %v2333_v32 }
 0x54a   : > { %v6490_v13 = vpop.eup %4866 }
 0x58a   : > { %v1958_v1 = vpop.f32.mrf.mxu0 }
 0x58b   : > { %v6476_v4 = vrot.slane %v1958_v1, %v7678_v31  ;;  %v6478_v51 = vrot.slane %v1958_v1, %v3318_v3  ;;  %v6480_v44 = vrot.slane %v1958_v1, %v3777_v5 }
 0x58c   : > { %v4598_v34 = vpop.f32.mrf.mxu0 }
 0x58d   : > { %vm2352_vm8 = vcmp.gt.f32.partialorder %v6267_v19, %v6476_v4  ;;  %vm2353_vm9 = vcmp.gt.f32.partialorder %v6317_v47, %v6476_v4  ;;  %vm2350_vm10 = vcmp.gt.f32.partialorder %v6286_v26, %v6476_v4  ;;  %vm2351_vm11 = vcmp.gt.f32.partialorder %v6351_v21, %v6476_v4  ;;  %v7679_v26 = vld [vmem:[#allocation20_spill] sm:$0xff] }
 0x58e   : > { %v1961_v49 = vpop.f32.mrf.mxu0  ;;  %v2368_v50 = vsel %vm2352_vm8, %v4863_v55, 0.0  ;;  %v2369_v60 = vsel %vm2353_vm9, %v4865_v48, 0.0  ;;  %v2366_v2 = vsel %vm2350_vm10, %v4859_v41, 0.0  ;;  %v2367_v9 = vsel %vm2351_vm11, %v4861_v37, 0.0 }
 0x58f   : > { %v2385_v11 = vmul.f32 %v6490_v13, %v2368_v50  ;;  %v2386_v19 = vmul.f32 %v6490_v13, %v2369_v60  ;;  %v2383_v62 = vmul.f32 %v6490_v13, %v2366_v2  ;;  %v2384_v47 = vmul.f32 %v6490_v13, %v2367_v9 }
 0x590   : > { %v4599_v8 = vpop.f32.mrf.mxu0  ;;  %vm2348_vm12 = vcmp.gt.f32.partialorder %v6248_v58, %v6476_v4  ;;  %vm2349_vm13 = vcmp.gt.f32.partialorder %v6256_v42, %v6476_v4  ;;  %vm2346_vm14 = vcmp.gt.f32.partialorder %v6252_v30, %v6476_v4  ;;  %vm2347_vm15 = vcmp.gt.f32.partialorder %v6258_v35, %v6476_v4 }
 0x591   : > { %v6505_v21 = vrot.slane %v1958_v1, %v7679_v26  ;;  %v2395_v41 = vpack.c.bf16 %v2386_v19, %v2385_v11  ;;  %v2364_v37 = vsel %vm2348_vm12, %v4855_v12, 0.0  ;;  %v2365_v48 = vsel %vm2349_vm13, %v4857_v29, 0.0 }
 0x592   : > { %v6507_v55 = vpop.f32.mrf.mxu0  ;;  %v2362_v32 = vsel %vm2346_vm14, %v6466_v56, 0.0  ;;  %v2363_v58 = vsel %vm2347_vm15, %v4853_v40, 0.0  ;;  %v2394_v52 = vpack.c.bf16 %v2384_v47, %v2383_v62  ;;  %v2381_v12 = vmul.f32 %v6490_v13, %v2364_v37 }
 0x593   : > { %vm2801_vm4 = vcmp.gt.f32.partialorder %v6507_v55, %v6505_v21  ;;  %4619 = vmatpush3.bf16.msra.mxu1 %v2395_v41  ;;  %v2379_v30 = vmul.f32 %v6490_v13, %v2362_v32  ;;  %v2380_v42 = vmul.f32 %v6490_v13, %v2363_v58  ;;  %vm2344_vm5 = vcmp.gt.f32.partialorder %v6232_v63, %v6476_v4 }
 0x594   : > { %v6514_v35 = vpop.f32.mrf.mxu0  ;;  %4620 = vmatprep.subr.bf16.mxu1 %v7594_v23  ;;  %vm2345_vm6 = vcmp.gt.f32.partialorder %v6236_v54, %v6476_v4  ;;  %v2382_v56 = vmul.f32 %v6490_v13, %v2365_v48  ;;  %v2360_v29 = vsel %vm2344_vm5, %v6456_v18, 0.0  ;;  %vm2342_vm11 = vcmp.gt.f32.partialorder %v6234_v36, %v6476_v4 }
 0x595   : > { %vm2799_vm7 = vcmp.gt.f32.partialorder %v6514_v35, %v6505_v21  ;;  %v2392_v40 = vpack.c.bf16 %v2380_v42, %v2379_v30  ;;  %v2361_v5 = vsel %vm2345_vm6, %v6461_v0, 0.0  ;;  %v2377_v1 = vmul.f32 %v6490_v13, %v2360_v29  ;;  %v7680_v42 = vld [vmem:[#allocation7_spill] sm:$0xff] }
 0x596   : > { %v6526_v3 = vpop.f32.mrf.mxu0  ;;  %v2378_v63 = vmul.f32 %v6490_v13, %v2361_v5  ;;  %v2393_v18 = vpack.c.bf16 %v2382_v56, %v2381_v12  ;;  %vm2343_vm12 = vcmp.gt.f32.partialorder %v6238_v16, %v6476_v4  ;;  %v2358_v50 = vsel %vm2342_vm11, %v6446_v6, 0.0  ;;  %v7682_v12 = vld [vmem:[#allocation3_spill] sm:$0xff] }
 0x597   : > { %vm2802_vm8 = vcmp.gt.f32.partialorder %v6526_v3, %v6505_v21  ;;  %4621 = vmatpush3.bf16.msra.mxu1 %v2394_v52  ;;  %v2359_v60 = vsel %vm2343_vm12, %v6451_v45, 0.0  ;;  %vm2340_vm15 = vcmp.gt.f32.partialorder %v6215_v33, %v6476_v4  ;;  %vm2341_vm5 = vcmp.gt.f32.partialorder %v6220_v17, %v6476_v4 }
 0x598   : > { %v6533_v54 = vpop.f32.mrf.mxu0  ;;  %4622 = vmatprep.subr.bf16.mxu1 %v7594_v23  ;;  %v2391_v31 = vpack.c.bf16 %v2378_v63, %v2377_v1  ;;  %v2375_v16 = vmul.f32 %v6490_v13, %v2358_v50  ;;  %v2376_v6 = vmul.f32 %v6490_v13, %v2359_v60  ;;  %v2356_v2 = vsel %vm2340_vm15, %v6437_v39, 0.0  ;;  %v7684_v50 = vld [vmem:[#allocation21_spill] sm:$0xff] }
 0x599   : > { %vm2800_vm9 = vcmp.gt.f32.partialorder %v6533_v54, %v6505_v21  ;;  %v2357_v33 = vsel %vm2341_vm5, %v6441_v10, 0.0  ;;  %vm2338_vm12 = vcmp.gt.f32.partialorder %v6218_v7, %v6476_v4  ;;  %vm2339_vm0 = vcmp.gt.f32.partialorder %v6222_v38, %v6476_v4 }
 0x59a   : > { %v6538_v34 = vpop.f32.mrf.mxu0  ;;  %v2390_v39 = vpack.c.bf16 %v2376_v6, %v2375_v16  ;;  %v2373_v10 = vmul.f32 %v6490_v13, %v2356_v2  ;;  %v2374_v9 = vmul.f32 %v6490_v13, %v2357_v33  ;;  %v2354_v19 = vsel %vm2338_vm12, %v6428_v61, 0.0 }
 0x59b   : > { %vm2805_vm10 = vcmp.gt.f32.partialorder %v6538_v34, %v6505_v21  ;;  %4623 = vmatpush3.bf16.msra.mxu1 %v2393_v18  ;;  %v2355_v7 = vsel %vm2339_vm0, %v6430_v20, 0.0  ;;  %v6593_v38 = vadd.f32 %v6526_v3, %v6306_v28  ;;  %v2371_v20 = vmul.f32 %v6490_v13, %v2354_v19 }
 0x59c   : > { %v6546_v0 = vpop.f32.mrf.mxu0  ;;  %4624 = vmatprep.subr.bf16.mxu1 %v7594_v23  ;;  %v2389_v61 = vpack.c.bf16 %v2374_v9, %v2373_v10  ;;  %v2372_v47 = vmul.f32 %v6490_v13, %v2355_v7  ;;  %v6608_v28 = vadd.f32 %v6538_v34, %v6311_v22  ;;  %v2691_v13 = vadd.f32 %v6507_v55, %v6343_v46 }
 0x59d   : > { %vm2803_vm13 = vcmp.gt.f32.partialorder %v6546_v0, %v6505_v21 }
 0x59e   : > { %v6551_v49 = vpop.f32.mrf.mxu0  ;;  %v2707_v48 = vmax.f32 %v2691_v13, %v6608_v28 }
 0x59f   : > { %vm2806_vm14 = vcmp.gt.f32.partialorder %v6551_v49, %v6505_v21  ;;  %4625 = vmatpush3.bf16.msra.mxu1 %v2392_v40  ;;  %v6597_v4 = vadd.f32 %v6551_v49, %v6284_v15  ;;  %v6612_v15 = vadd.f32 %v6279_v25, %v6546_v0  ;;  %v2689_v25 = vadd.f32 %v6301_v14, %v6514_v35  ;;  %v7683_v40 = vld [vmem:[#allocation16_spill] sm:$0xff] }
 0x5a0   : > { %v6561_v36 = vpop.f32.mrf.mxu0  ;;  %4626 = vmatprep.subr.bf16.mxu1 %v7594_v23  ;;  %v2387_v29 = vpack.c.bf16 %v7683_v40, %v7683_v40 }
 0x5a1   : > { %vm2804_vm6 = vcmp.gt.f32.partialorder %v6561_v36, %v6505_v21  ;;  %v6616_v8 = vadd.f32 %v6272_v59, %v6561_v36  ;;  %v2690_v59 = vadd.f32 %v6291_v27, %v6533_v54  ;;  %v2708_v22 = vmax.f32 %v6593_v38, %v6597_v4 }
 0x5a2   : > { %v6568_v45 = vpop.f32.mrf.mxu0  ;;  %v2388_v27 = vpack.c.bf16 %v2372_v47, %v2371_v20  ;;  %v2705_v32 = vmax.f32 %v2689_v25, %v6612_v15 }
 0x5a3   : > { %vm2809_vm11 = vcmp.gt.f32.partialorder %v6568_v45, %v6505_v21  ;;  %4627 = vmatpush3.bf16.msra.mxu1 %v2391_v31 }
 0x5a4   : > { %v6578_v17 = vpop.f32.mrf.mxu0  ;;  %4628 = vmatprep.subr.bf16.mxu1 %v7594_v23 }
 0x5a5   : > { %vm2807_vm2 = vcmp.gt.f32.partialorder %v6578_v17, %v6505_v21  ;;  %v2697_v46 = vadd.f32 %v6328_v43, %v6578_v17 }
 0x5a6   : > { %v6585_v11 = vpop.f32.mrf.mxu0 }
 0x5a7   : > { %vm2810_vm15 = vcmp.gt.f32.partialorder %v6585_v11, %v6505_v21  ;;  %4629 = vmatpush3.bf16.msra.mxu1 %v2390_v39  ;;  %v6620_v26 = vadd.f32 %v6585_v11, %v6333_v24  ;;  %v6636_v24 = vadd.f32 %v6568_v45, %v6363_v53  ;;  %v2706_v53 = vmax.f32 %v2690_v59, %v6616_v8 }
 0x5a8   : > { %v6599_v62 = vpop.f32.mrf.mxu0  ;;  %4630 = vmatprep.subr.bf16.mxu1 %v7594_v23  ;;  %v2709_v63 = vmax.f32 %v2705_v32, %v2697_v46 }
 0x5a9   : > { %vm2808_vm5 = vcmp.gt.f32.partialorder %v6599_v62, %v6505_v21  ;;  %v2698_v14 = vadd.f32 %v6296_v57, %v6599_v62  ;;  %v2712_v58 = vmax.f32 %v2708_v22, %v6620_v26  ;;  %v7681_v57 = vld [vmem:[#allocation31_spill] sm:$0xff]  ;;  %v2711_v5 = vmax.f32 %v2707_v48, %v6636_v24 }
 0x5aa   : > { %v6622_v41 = vpop.f32.mrf.mxu0 }
 0x5ab   : > { %vm2813_vm0 = vcmp.gt.f32.partialorder %v6622_v41, %v6505_v21  ;;  %4631 = vmatpush3.bf16.msra.mxu1 %v2389_v61  ;;  %v6655_v43 = vadd.f32 %v6622_v41, %v7680_v42  ;;  %v2710_v18 = vmax.f32 %v2706_v53, %v2698_v14 }
 0x5ac   : > { %v6638_v37 = vpop.f32.mrf.mxu0  ;;  %4632 = vmatprep.subr.bf16.mxu1 %v7594_v23 }
 0x5ad   : > { %vm2811_vm12 = vcmp.gt.f32.partialorder %v6638_v37, %v6505_v21  ;;  %v6659_v52 = vadd.f32 %v7681_v57, %v6638_v37  ;;  %v2715_v16 = vmax.f32 %v2711_v5, %v6655_v43 }
 0x5ae   : > { %v6651_v30 = vpop.f32.mrf.mxu0 }
 0x5af   : > { %v6663_v56 = vadd.f32 %v6651_v30, %v7682_v12  ;;  %vm2814_vm3 = vcmp.gt.f32.partialorder %v6651_v30, %v6505_v21  ;;  %4633 = vmatpush3.bf16.msra.mxu1 %v2388_v27  ;;  %v2713_v6 = vmax.f32 %v2709_v63, %v6659_v52 }
 0x5b0   : > { %v6670_v1 = vpop.f32.mrf.mxu0  ;;  %4676 = vmatprep.subr.bf16.mxu1 %v7594_v23 }
 0x5b1   : > { %v2716_v31 = vmax.f32 %v2712_v58, %v6663_v56  ;;  %v6676_v60 = vadd.f32 %v7684_v50, %v6670_v1 }
 0x5b2   : > { %4635 = vmatmul.mubr.bf16.vlgmr.msra.gmra.mxu1 %v2387_v29 }
 0x5b3   : > { %v2714_v2 = vmax.f32 %v2710_v18, %v6676_v60  ;;  %4678 = vmatprep.mubr.msk.bf16.mxu1 %vm5011_vm1, %v7594_v23  ;;  %v2718_v33 = vmax.f32 %v2715_v16, %v2716_v31 }
 0x5b5   : > { %v2717_v39 = vmax.f32 %v2713_v6, %v2714_v2 }
 0x5b7   : > { %v2719_v10 = vmax.f32 %v2717_v39, %v2718_v33 }
 0x5b9   : > { %v2720_v9 = vrot.slane %v2719_v10, 4 }
 0x5bb   : > { %v2721_v19 = vmax.f32 %v2719_v10, %v2720_v9 }
 0x5bd   : > { %v2722_v7 = vrot.slane %v2721_v19, 2 }
 0x5bf   : > { %v2723_v61 = vmax.f32 %v2721_v19, %v2722_v7 }
 0x5c1   : > { %v2724_v20 = vrot.slane %v2723_v61, 1 }
 0x5c3   : > { %v6683_v47 = vmax.f32 %v2723_v61, %v2724_v20 }
 0x5c5   : > { %v2726_v22 = vsub.f32 %v2689_v25, %v6683_v47  ;;  %v2727_v27 = vsub.f32 %v2690_v59, %v6683_v47  ;;  %v2728_v48 = vsub.f32 %v2691_v13, %v6683_v47  ;;  %v2729_v32 = vsub.f32 %v6593_v38, %v6683_v47 }
 0x5c6   : > { %v2730_v53 = vsub.f32 %v6612_v15, %v6683_v47  ;;  %v2731_v58 = vsub.f32 %v6616_v8, %v6683_v47  ;;  %v2732_v42 = vsub.f32 %v6608_v28, %v6683_v47  ;;  %v2733_v25 = vsub.f32 %v6597_v4, %v6683_v47 }
 0x5c7   : > { %v2742_v57 = vmul.f32 1.442695, %v2726_v22  ;;  %v2744_v12 = vmul.f32 1.442695, %v2727_v27  ;;  %v2746_v40 = vmul.f32 1.442695, %v2728_v48  ;;  %v2734_v13 = vsub.f32 %v2697_v46, %v6683_v47 }
 0x5c8   : > { %v2748_v59 = vmul.f32 1.442695, %v2729_v32  ;;  %v2750_v38 = vmul.f32 1.442695, %v2730_v53  ;;  %v2735_v29 = vsub.f32 %v2698_v14, %v6683_v47  ;;  %v2752_v15 = vmul.f32 1.442695, %v2731_v58 }
 0x5c9   : > { %4868 = vpow2.f32 %v2742_v57  ;;  %v2754_v8 = vmul.f32 1.442695, %v2732_v42  ;;  %v2756_v5 = vmul.f32 1.442695, %v2733_v25  ;;  %v2758_v28 = vmul.f32 1.442695, %v2734_v13 }
 0x5ca   : > { %4870 = vpow2.f32 %v2744_v12  ;;  %v2760_v63 = vmul.f32 1.442695, %v2735_v29  ;;  %v2736_v4 = vsub.f32 %v6636_v24, %v6683_v47  ;;  %v2737_v14 = vsub.f32 %v6620_v26, %v6683_v47 }
 0x5cb   : > { %4872 = vpow2.f32 %v2746_v40  ;;  %v2738_v16 = vsub.f32 %v6659_v52, %v6683_v47  ;;  %v2739_v39 = vsub.f32 %v6676_v60, %v6683_v47  ;;  %v2740_v19 = vsub.f32 %v6655_v43, %v6683_v47 }
 0x5cc   : > { %4874 = vpow2.f32 %v2748_v59  ;;  %v2762_v6 = vmul.f32 1.442695, %v2736_v4  ;;  %v2764_v10 = vmul.f32 1.442695, %v2737_v14  ;;  %v2741_v22 = vsub.f32 %v6663_v56, %v6683_v47 }
 0x5cd   : > { %4876 = vpow2.f32 %v2750_v38  ;;  %v2766_v61 = vmul.f32 1.442695, %v2738_v16  ;;  %v2768_v27 = vmul.f32 1.442695, %v2739_v39  ;;  %v2770_v58 = vmul.f32 1.442695, %v2740_v19 }
 0x5ce   : > { %4878 = vpow2.f32 %v2752_v15  ;;  %v2772_v47 = vmul.f32 1.442695, %v2741_v22 }
 0x5cf   : > { %4880 = vpow2.f32 %v2754_v8 }
 0x5d0   : > { %4882 = vpow2.f32 %v2756_v5 }
 0x5d1   : > { %4884 = vpow2.f32 %v2758_v28 }
 0x5d2   : > { %4886 = vpow2.f32 %v2760_v63 }
 0x5d3   : > { %4888 = vpow2.f32 %v2762_v6 }
 0x5d4   : > { %4890 = vpow2.f32 %v2764_v10 }
 0x5d5   : > { %4892 = vpow2.f32 %v2766_v61 }
 0x5d6   : > { %v4869_v46 = vpop.eup %4868  ;;  %4894 = vpow2.f32 %v2768_v27 }
 0x5d7   : > { %v4871_v18 = vpop.eup %4870  ;;  %v6707_v31 = vsel %vm2799_vm7, %v4869_v46, 0.0  ;;  %4896 = vpow2.f32 %v2770_v58  ;;  %vm7693_vm7 = vcmask 64512  }
 0x5d8   : > { %v4873_v50 = vpop.eup %4872  ;;  %v2774_v2 = vadd.f32 %v4871_v18, %v4869_v46  ;;  %v6714_v24 = vsel %vm2800_vm9, %v4871_v18, 0.0  ;;  %4898 = vpow2.f32 %v2772_v47  ;;  %vm7703_vm9 = vmmov %vm7693_vm7 }
 0x5d9   : > { %v4875_v33 = vpop.eup %4874  ;;  %v6719_v26 = vsel %vm2801_vm4, %v4873_v50, 0.0 }
 0x5da   : > { %v4877_v35 = vpop.eup %4876  ;;  %v2775_v9 = vadd.f32 %v4873_v50, %v2774_v2  ;;  %v6726_v52 = vsel %vm2802_vm8, %v4875_v33, 0.0  ;;  %vm7702_vm8 = vmmov %vm7693_vm7 }
 0x5db   : > { %v4879_v54 = vpop.eup %4878  ;;  %v6733_v55 = vsel %vm2803_vm13, %v4877_v35, 0.0  ;;  %vm7713_vm13 = vmmov %vm7693_vm7 }
 0x5dc   : > { %v4881_v7 = vpop.eup %4880  ;;  %v2776_v60 = vadd.f32 %v4875_v33, %v2775_v9  ;;  %v6738_v20 = vsel %vm2804_vm6, %v4879_v54, 0.0  ;;  %vm7723_vm6 = vmmov %vm7693_vm7 }
 0x5dd   : > { %v4883_v3 = vpop.eup %4882  ;;  %v2821_v43 = vsel %vm2805_vm10, %v4881_v7, 0.0  ;;  %vm7712_vm10 = vmmov %vm7693_vm7 }
 0x5de   : > { %v4885_v0 = vpop.eup %4884  ;;  %v2777_v48 = vadd.f32 %v4877_v35, %v2776_v60  ;;  %v2822_v32 = vsel %vm2806_vm14, %v4883_v3, 0.0  ;;  %vm7722_vm14 = vmmov %vm7693_vm7 }
 0x5df   : > { %v4887_v53 = vpop.eup %4886  ;;  %v2823_v36 = vsel %vm2807_vm2, %v4885_v0, 0.0  ;;  %vm2812_vm2 = vcmp.gt.f32.partialorder %v6670_v1, %v6505_v21 }
 0x5e0   : > { %v2778_v56 = vadd.f32 %v4879_v54, %v2777_v48  ;;  %v2824_v34 = vsel %vm2808_vm5, %v4887_v53, 0.0  ;;  %v4889_v40 = vpop.eup %4888  ;;  %vm7731_vm5 = vcmask 130048  }
 0x5e1   : > { %v4891_v59 = vpop.eup %4890  ;;  %v2825_v16 = vsel %vm2809_vm11, %v4889_v40, 0.0  ;;  %vm7726_vm11 = vmmov %vm7723_vm6 }
 0x5e2   : > { %v2779_v42 = vadd.f32 %v4881_v7, %v2778_v56  ;;  %v4893_v13 = vpop.eup %4892  ;;  %v2826_v6 = vsel %vm2810_vm15, %v4891_v59, 0.0 }
 0x5e3   : > { %v4895_v29 = vpop.eup %4894  ;;  %v2827_v33 = vsel %vm2811_vm12, %v4893_v13, 0.0  ;;  %vm7736_vm12 = vmmov %vm7723_vm6 }
 0x5e4   : > { %v2780_v57 = vadd.f32 %v4883_v3, %v2779_v42  ;;  %v4897_v8 = vpop.eup %4896  ;;  %v2828_v35 = vsel %vm2812_vm2, %v4895_v29, 0.0  ;;  %v7690_v42 = vld [vmem:[#allocation18_spill] sm:$0xff] }
 0x5e5   : > { %v4899_v62 = vpop.eup %4898  ;;  %v2829_v39 = vsel %vm2813_vm0, %v4897_v8, 0.0 }
 0x5e6   : > { %v2781_v49 = vadd.f32 %v4885_v0, %v2780_v57  ;;  %v2830_v1 = vsel %vm2814_vm3, %v4899_v62, 0.0  ;;  %v2848_v57 = vpack.c.bf16 %v7690_v42, %v7690_v42  ;;  %vm7691_vm3 = vcmask 1043456  }
 0x5e7   : > { %vm7692_vm4 = vmmov %vm7691_vm3 }
 0x5e8   : > { %v2782_v12 = vadd.f32 %v4887_v53, %v2781_v49  ;;  %vm7730_vm15 = vmmov %vm7691_vm3 }
 0x5e9   : > { %vm7732_vm0 = vmmov %vm7691_vm3 }
 0x5ea   : > { %v2783_v25 = vadd.f32 %v4889_v40, %v2782_v12  ;;  %v7694_v40 = vld [vmem:[#allocation69_spill] sm:$0xff] }
 0x5ec   : > { %v2784_v17 = vadd.f32 %v4891_v59, %v2783_v25  ;;  %v7695_v25 = vld [vmem:[#allocation32_spill] sm:$0xff] }
 0x5ed   : > { %v3517_v59 = vmul.f32 %v7695_v25, %v7694_v40  ;;  %v6843_v25 = vld [vmem:[%s7437_s3] sm:$0xff]  }
 0x5ee   : > { %v2785_v38 = vadd.f32 %v4893_v13, %v2784_v17  ;;  %v7696_v17 = vld [vmem:[#allocation70_spill] sm:$0xff]  ;;  %7729 = vst [vmem:[#allocation43_spill] sm:$0xff] %v6843_v25 }
 0x5ef   : > { %v7697_v13 = vld [vmem:[#allocation34_spill] sm:$0xff] }
 0x5f0   : > { %v2786_v15 = vadd.f32 %v4895_v29, %v2785_v38  ;;  %v3518_v38 = vmul.f32 %v7697_v13, %v7696_v17  ;;  %v7698_v29 = vld [vmem:[#allocation37_spill] sm:$0xff] }
 0x5f2   : > { %v2787_v5 = vadd.f32 %v4897_v8, %v2786_v15  ;;  %v7699_v15 = vld [vmem:[#allocation75_spill] sm:$0xff] }
 0x5f3   : > { %v3519_v8 = vmul.f32 %v7699_v15, %v7698_v29  ;;  %v7734_v29 = vld [vmem:[#allocation85_spill] sm:$0xff] }
 0x5f4   : > { %v2788_v28 = vadd.f32 %v4899_v62, %v2787_v5  ;;  %v7700_v5 = vld [vmem:[#allocation41_spill] sm:$0xff]  ;;  %v7701_v62 = vld [vmem:[#allocation76_spill] sm:$0xff] }
 0x5f6   : > { %v2789_v63 = vrot.slane %v2788_v28, 4 }
 0x5f8   : > { %v2790_v4 = vadd.f32 %v2789_v63, %v2788_v28  ;;  %v3520_v28 = vmul.f32 %v7701_v62, %v7700_v5  ;;  %v3532_v63 = vpack.c.bf16 %v3518_v38, %v3517_v59  ;;  %v7733_v38 = vld [vmem:[#allocation86_spill] sm:$0xff] }
 0x5f9   : > { %v7735_v15 = vpack.c.bf16 %v7733_v38, %v7734_v29 }
 0x5fa   : > { %v2791_v46 = vrot.slane %v2790_v4, 2 }
 0x5fc   : > { %v2792_v14 = vadd.f32 %v2791_v46, %v2790_v4  ;;  %v3533_v4 = vpack.c.bf16 %v3520_v28, %v3519_v8  ;;  %v7704_v46 = vld [vmem:[#allocation73_spill] sm:$0xff]  ;;  %v7737_v28 = vld [vmem:[#allocation84_spill] sm:$0xff] }
 0x5fe   : > { %v2793_v18 = vrot.slane %v2792_v14, 1 }
 0x600   : > { %v2794_v50 = vadd.f32 %v2793_v18, %v2792_v14  ;;  %v7705_v14 = vld [vmem:[#allocation36_spill] sm:$0xff] }
 0x601   : > { %v3521_v18 = vmul.f32 %v7705_v14, %v7704_v46  ;;  %v7741_v14 = vld [vmem:[#allocation90_spill] sm:$0xff] }
 0x602   : > { %4900 = vrcp.f32 %v2794_v50  ;;  %v7706_v50 = vld [vmem:[#allocation74_spill] sm:$0xff] }
 0x60f   : > { %v4901_v2 = vpop.eup %4900 }
 0x610   : > { %v2844_v45 = vmul.f32 %v4901_v2, %v2827_v33  ;;  %v2845_v10 = vmul.f32 %v4901_v2, %v2828_v35  ;;  %v2846_v9 = vmul.f32 %v4901_v2, %v2829_v39  ;;  %v2847_v54 = vmul.f32 %v4901_v2, %v2830_v1  ;;  %v7709_v33 = vld [vmem:[#allocation79_spill] sm:$0xff]  ;;  %v7711_v1 = vld [vmem:[#allocation80_spill] sm:$0xff] }
 0x611   : > { %v2842_v11 = vmul.f32 %v4901_v2, %v2825_v16  ;;  %v2843_v19 = vmul.f32 %v4901_v2, %v2826_v6  ;;  %v2840_v7 = vmul.f32 %v4901_v2, %v2823_v36  ;;  %v2841_v61 = vmul.f32 %v4901_v2, %v2824_v34  ;;  %v7689_v34 = vld [vmem:[#allocation30_spill] sm:$0xff]  ;;  %v7707_v16 = vld [vmem:[#allocation39_spill] sm:$0xff] }
 0x612   : > { %v2855_v60 = vpack.c.bf16 %v2845_v10, %v2844_v45  ;;  %v2856_v37 = vpack.c.bf16 %v2847_v54, %v2846_v9  ;;  %v2838_v3 = vmul.f32 %v4901_v2, %v2821_v43  ;;  %v2839_v22 = vmul.f32 %v4901_v2, %v2822_v32  ;;  %v7710_v39 = vld [vmem:[#allocation47_spill] sm:$0xff]  ;;  %v7714_v54 = vld [vmem:[#allocation77_spill] sm:$0xff] }
 0x613   : > { %v2854_v0 = vpack.c.bf16 %v2843_v19, %v2842_v11  ;;  %v2853_v27 = vpack.c.bf16 %v2841_v61, %v2840_v7  ;;  %v2836_v41 = vmul.f32 %v4901_v2, %v6733_v55  ;;  %v2837_v48 = vmul.f32 %v4901_v2, %v6738_v20  ;;  %v7688_v55 = vld [vmem:[#allocation72_spill] sm:$0xff]  ;;  %v7715_v11 = vld [vmem:[#allocation42_spill] sm:$0xff] }
 0x614   : > { %4657 = vmatpush3.bf16.msra.mxu0 %v2856_v37  ;;  %v2852_v21 = vpack.c.bf16 %v2839_v22, %v2838_v3  ;;  %v2834_v30 = vmul.f32 %v4901_v2, %v6719_v26  ;;  %v2835_v53 = vmul.f32 %v4901_v2, %v6726_v52  ;;  %v2832_v58 = vmul.f32 %v4901_v2, %v6707_v31  ;;  %v7685_v31 = vld [vmem:[#allocation33_spill] sm:$0xff]  ;;  %v7687_v52 = vld [vmem:[#allocation35_spill] sm:$0xff]  ;;  %v7716_v7 = vld [vmem:[#allocation78_spill] sm:$0xff] }
 0x615   : > { %4658 = vmatprep.subr.bf16.mxu0 %v7594_v23  ;;  %v2851_v36 = vpack.c.bf16 %v2837_v48, %v2836_v41  ;;  %v2833_v43 = vmul.f32 %v4901_v2, %v6714_v24  ;;  %v7686_v24 = vld [vmem:[#allocation71_spill] sm:$0xff]  ;;  %v3516_v20 = vmul.f32 %v7688_v55, %v7687_v52  ;;  %v3544_v47 = vpack.c.bf16 %v7689_v34, %v7689_v34  ;;  %v7708_v2 = vld [vmem:[#allocation44_spill] sm:$0xff]  ;;  %v7717_v61 = vld [vmem:[#allocation46_spill] sm:$0xff] }
 0x616   : > { %v2850_v32 = vpack.c.bf16 %v2835_v53, %v2834_v30  ;;  %v3515_v26 = vmul.f32 %v7686_v24, %v7685_v31  ;;  %v3522_v6 = vmul.f32 %v7707_v16, %v7706_v50  ;;  %v3523_v35 = vmul.f32 %v7709_v33, %v7708_v2  ;;  %v7718_v37 = vld [vmem:[#allocation51_spill] sm:$0xff]  ;;  %v7719_v3 = vld [vmem:[#allocation81_spill] sm:$0xff]  ;;  %v3513_v30 = vpop.permute.xlu1 %3512  ;;  %v3508_v53 = vpop.permute.xlu0 %3507  ;;  %v7745_v33 = vld [vmem:[#allocation88_spill] sm:$0xff] }
 0x617   : > { %v2849_v56 = vpack.c.bf16 %v2833_v43, %v2832_v58  ;;  %v3570_v12 = vsel %vm7692_vm4, %v3544_v47, 0  ;;  %v3524_v45 = vmul.f32 %v7711_v1, %v7710_v39  ;;  %v3525_v19 = vmul.f32 %v7715_v11, %v7714_v54  ;;  %v7724_v58 = vld [vmem:[#allocation52_spill] sm:$0xff]  ;;  %v7725_v43 = vld [vmem:[#allocation49_spill] sm:$0xff]  ;;  %v323_v34 = vld [vmem:[%s7434_s0 + $0x8] sm:$0xff] }
 0x618   : > { %4659 = vmatpush3.bf16.msra.mxu0 %v2855_v60  ;;  %v3531_v49 = vpack.c.bf16 %v3516_v20, %v3515_v26  ;;  %v3534_v10 = vpack.c.bf16 %v3522_v6, %v3521_v18  ;;  %v3526_v60 = vmul.f32 %v7717_v61, %v7716_v7  ;;  %v3527_v22 = vmul.f32 %v7719_v3, %v7718_v37  ;;  %v322_v20 = vld [vmem:[%s7434_s0] sm:$0xff]  ;;  %v7742_v18 = vld [vmem:[#allocation89_spill] sm:$0xff]  ;;  %v7753_v37 = vld [vmem:[#allocation91_spill] sm:$0xff] }
 0x619   : > { %4660 = vmatprep.subr.bf16.mxu0 %v7594_v23  ;;  %v3535_v9 = vpack.c.bf16 %v3524_v45, %v3523_v35  ;;  %v5015_v55 = vmov 0   ;;  %v7743_v50 = vpack.c.bf16 %v7741_v14, %v7742_v18  ;;  %v7746_v35 = vld [vmem:[#allocation87_spill] sm:$0xff]  ;;  %v7748_v45 = vld [vmem:[#allocation94_spill] sm:$0xff]  ;;  %v6917_v7 = vld [vmem:[%s7440_s6 + $0xb8] sm:$0xff] }
 0x61a   : > { %v3536_v48 = vpack.c.bf16 %v3526_v60, %v3525_v19  ;;  %4793 = vset.pattern.permute.xlu0 %v5015_v55  ;;  %4794 = vset.pattern.permute.xlu1 %v5015_v55  ;;  %v7747_v39 = vpack.c.bf16 %v7745_v33, %v7746_v35  ;;  %v7752_v60 = vld [vmem:[#allocation92_spill] sm:$0xff]  ;;  %v6994_v55 = vld [vmem:[%s7440_s6 + $0x80] sm:$0xff]  ;;  %v7061_v33 = vld [vmem:[%s7440_s6 + $0xf8] sm:$0xff] }
 0x61b   : > { %2900 = vperm.xlu0 %4793, %v322_v20   ;;  %2905 = vperm.xlu1 %4794, %v323_v34   ;;  %v7754_v3 = vpack.c.bf16 %v7752_v60, %v7753_v37  ;;  %v7001_v34 = vld [vmem:[%s7440_s6 + $0x88] sm:$0xff]  ;;  %v7052_v18 = vld [vmem:[%s7440_s6 + $0xe0] sm:$0xff]  ;;  %7762 = vst [vmem:[#allocation45_spill] sm:$0xff] %v7061_v33 }
 0x61c   : > { %4661 = vmatpush3.bf16.msra.mxu0 %v2854_v0  ;;  %v7720_v0 = vld [vmem:[#allocation54_spill] sm:$0xff]  ;;  %7761 = vst [vmem:[#allocation5_spill] sm:$0xff] %v7052_v18 }
 0x61d   : > { %4662 = vmatprep.subr.bf16.mxu0 %v7594_v23 }
 0x620   : > { %4663 = vmatpush3.bf16.msra.mxu0 %v2853_v27  ;;  %v7721_v27 = vld [vmem:[#allocation82_spill] sm:$0xff] }
 0x621   : > { %4664 = vmatprep.subr.bf16.mxu0 %v7594_v23  ;;  %v3528_v41 = vmul.f32 %v7721_v27, %v7720_v0  ;;  %v6932_v0 = vld [vmem:[%s7440_s6 + $0x98] sm:$0xff] }
 0x624   : > { %4665 = vmatpush3.bf16.msra.mxu0 %v2852_v21  ;;  %v3537_v21 = vpack.c.bf16 %v3528_v41, %v3527_v22  ;;  %v7756_v41 = vld [vmem:[#allocation98_spill] sm:$0xff] }
 0x625   : > { %4666 = vmatprep.subr.bf16.mxu0 %v7594_v23 }
 0x628   : > { %4667 = vmatpush3.bf16.msra.mxu0 %v2851_v36  ;;  %v3530_v36 = vmul.f32 %v7724_v58, %v3513_v30  ;;  %v6947_v30 = vld [vmem:[%s7440_s6 + $0xb0] sm:$0xff]  ;;  %v6956_v58 = vld [vmem:[%s7440_s6 + $0xa0] sm:$0xff] }
 0x629   : > { %4668 = vmatprep.subr.bf16.mxu0 %v7594_v23 }
 0x62c   : > { %4669 = vmatpush3.bf16.msra.mxu0 %v2850_v32  ;;  %v3529_v32 = vmul.f32 %v7725_v43, %v3508_v53  ;;  %v6965_v43 = vld [vmem:[%s7440_s6 + $0xa8] sm:$0xff] }
 0x62d   : > { %4670 = vmatprep.subr.bf16.mxu0 %v7594_v23 }
 0x630   : > { %4671 = vmatpush3.bf16.msra.mxu0 %v2849_v56  ;;  %v3538_v56 = vpack.c.bf16 %v3530_v36, %v3529_v32 }
 0x631   : > { %4775 = vmatprep.subr.msk.bf16.mxu0 %vm7691_vm3, %v3544_v47  ;;  %v7727_v47 = vmov 8  }
 0x632   : > { %4795 = vset.pattern.permute.xlu0 %v7727_v47 }
 0x633   : > { %4673 = vmatmul.mubr.bf16.vlgmr.msra.gmra.mxu0 %v2848_v57 }
 0x634   : > { %4721 = vmatpush3.bf16.msra.mxu0 %v3570_v12  ;;  %4722 = vmatprep.mubr.msk.bf16.mxu0 %vm7693_vm7, %v3531_v49  ;;  %v7728_v49 = vld [vmem:[#allocation29_spill] sm:$0xff]  ;;  %vm7740_vm7 = vmmov %vm7723_vm6 }
 0x635   : > { %4738 = vmatprep.subr.bf16.mxu0 %v7594_v23  ;;  %v3085_v12 = vpack.c.bf16 %v7728_v49, %v7728_v49 }
 0x637   : > { %v3111_v13 = vsel %vm7732_vm0, %v3085_v12, 0 }
 0x63b   : > { %4723 = vmatmul.mubr.msk.bf16.vlgmr.msra.gmra.mxu0 %vm7702_vm8, %v3532_v63  ;;  %v7738_v63 = vld [vmem:[#allocation83_spill] sm:$0xff] }
 0x63c   : > { %4726 = vmatprep.mubr.msk.bf16.mxu0 %vm7703_vm9, %v3533_v4  ;;  %v7739_v4 = vpack.c.bf16 %v7737_v28, %v7738_v63  ;;  %vm7744_vm9 = vmmov %vm7723_vm6 }
 0x643   : > { %4727 = vmatmul.mubr.msk.bf16.gmra.mxu0 %vm7712_vm10, %v3534_v10  ;;  %v7749_v10 = vld [vmem:[#allocation93_spill] sm:$0xff] }
 0x644   : > { %4730 = vmatprep.mubr.msk.bf16.mxu0 %vm7713_vm13, %v3535_v9  ;;  %v7750_v9 = vpack.c.bf16 %v7748_v45, %v7749_v10  ;;  %v7763_v45 = vld [vmem:[#allocation96_spill] sm:$0xff]  ;;  %v7764_v10 = vld [vmem:[#allocation95_spill] sm:$0xff] }
 0x64b   : > { %4731 = vmatmul.mubr.msk.bf16.gmra.mxu0 %vm7722_vm14, %v3536_v48  ;;  %v7757_v48 = vld [vmem:[#allocation97_spill] sm:$0xff] }
 0x64c   : > { %4734 = vmatprep.mubr.msk.bf16.mxu0 %vm7723_vm6, %v3537_v21  ;;  %v7758_v21 = vpack.c.bf16 %v7756_v41, %v7757_v48  ;;  %v7080_v48 = vld [vmem:[%s7440_s6 + $0xe8] sm:$0xff] }
 0x64d   : > { %7766 = vst [vmem:[#allocation38_spill] sm:$0xff] %v7080_v48 }
 0x653   : > { %4735 = vmatmul.mubr.msk.bf16.gmra.mxu0 %vm7726_vm11, %v3538_v56  ;;  %v6974_v56 = vld [vmem:[%s7440_s6 + $0xd8] sm:$0xff] }
 0x654   : > { %4754 = vmatprep.mubr.msk.bf16.mxu0 %vm5011_vm1, %v7594_v23 }
 0x672   : > { %v2430_v31 = vpop.f32.mrf.mxu1 }
 0x674   : > { %v4636_v24 = vpop.f32.mrf.mxu1 }
 0x676   : > { %v2433_v26 = vpop.f32.mrf.mxu1 }
 0x677   : > { %v6985_v26 = vld [vmem:[%s7440_s6 + $0x90] sm:$0xff] }
 0x678   : > { %v4637_v52 = vpop.f32.mrf.mxu1 }
 0x6f3   : > { %v2891_v42 = vpop.f32.mrf.mxu0 }
 0x6f4   : > { %v2897_v57 = vpack.c.bf16 %v2891_v42, %v2430_v31 }
 0x6f5   : > { %v4674_v40 = vpop.f32.mrf.mxu0 }
 0x6f6   : > { %4677 = vmatpush3.bf16.msra.mxu1 %v2897_v57  ;;  %v7010_v57 = vld [vmem:[%s7440_s6 + $0xd0] sm:$0xff]  ;;  %v7021_v40 = vld [vmem:[%s7440_s6 + $0xc0] sm:$0xff] }
 0x6f7   : > { %v2894_v59 = vpop.f32.mrf.mxu0  ;;  %4774 = vmatprep.subr.msk.bf16.mxu1 %vm7730_vm15, %v3085_v12  ;;  %vm7751_vm15 = vmmov %vm7723_vm6 }
 0x6f9   : > { %v4675_v17 = vpop.f32.mrf.mxu0  ;;  %4679 = vmatmul.mubr.msk.bf16.vlgmr.msra.gmra.mxu1 %vm7731_vm5, %v6843_v25 }
 0x6fa   : > { %4683 = vmatpush3.bf16.msra.mxu1 %v3111_v13  ;;  %4684 = vmatprep.mubr.msk.bf16.mxu1 %vm7736_vm12, %v7735_v15  ;;  %v7028_v17 = vld [vmem:[%s7440_s6 + $0xc8] sm:$0xff] }
 0x6fb   : > { %v6853_v8 = vpop.f32.mrf.mxu0  ;;  %4700 = vmatprep.subr.bf16.mxu1 %v7594_v23  ;;  %7759 = vst [vmem:[#allocation27_spill] sm:$0xff] %v7028_v17 }
 0x6fc   : > { %vm3781_vm2 = vcmp.gt.f32.partialorder %v6853_v8, %v6480_v44  ;;  %v3671_v52 = vadd.f32 %v6985_v26, %v6853_v8 }
 0x6fd   : > { %v6858_v5 = vpop.f32.mrf.mxu0 }
 0x6fe   : > { %vm3779_vm3 = vcmp.gt.f32.partialorder %v6858_v5, %v6480_v44  ;;  %v3669_v20 = vadd.f32 %v6994_v55, %v6858_v5 }
 0x6ff   : > { %v6862_v62 = vpop.f32.mrf.mxu0 }
 0x700   : > { %vm3782_vm4 = vcmp.gt.f32.partialorder %v6862_v62, %v6480_v44  ;;  %v6936_v27 = vadd.f32 %v6932_v0, %v6862_v62 }
 0x701   : > { %4685 = vmatmul.mubr.msk.bf16.vlgmr.msra.gmra.mxu1 %vm7740_vm7, %v7739_v4  ;;  %v6870_v46 = vpop.f32.mrf.mxu0  ;;  %vm7755_vm7 = vmmov %vm7723_vm6  ;;  %v7043_v4 = vld [vmem:[%s7440_s6 + $0xf0] sm:$0xff] }
 0x702   : > { %vm3780_vm8 = vcmp.gt.f32.partialorder %v6870_v46, %v6480_v44  ;;  %4688 = vmatprep.mubr.msk.bf16.mxu1 %vm7744_vm9, %v7743_v50  ;;  %v3670_v47 = vadd.f32 %v7001_v34, %v6870_v46  ;;  %7760 = vst [vmem:[#allocation2_spill] sm:$0xff] %v7043_v4 }
 0x703   : > { %v6878_v16 = vpop.f32.mrf.mxu0 }
 0x704   : > { %vm3785_vm10 = vcmp.gt.f32.partialorder %v6878_v16, %v6480_v44  ;;  %v6951_v53 = vadd.f32 %v6947_v30, %v6878_v16 }
 0x705   : > { %v6882_v6 = vpop.f32.mrf.mxu0 }
 0x706   : > { %vm3783_vm13 = vcmp.gt.f32.partialorder %v6882_v6, %v6480_v44  ;;  %v6960_v36 = vadd.f32 %v6956_v58, %v6882_v6  ;;  %v3687_v38 = vmax.f32 %v3671_v52, %v6951_v53 }
 0x707   : > { %v6886_v2 = vpop.f32.mrf.mxu0 }
 0x708   : > { %vm3786_vm14 = vcmp.gt.f32.partialorder %v6886_v2, %v6480_v44  ;;  %v6921_v61 = vadd.f32 %v6917_v7, %v6886_v2  ;;  %v3685_v29 = vmax.f32 %v3669_v20, %v6960_v36 }
 0x709   : > { %4689 = vmatmul.mubr.msk.bf16.gmra.mxu1 %vm7723_vm6, %v7747_v39  ;;  %v6894_v1 = vpop.f32.mrf.mxu0 }
 0x70a   : > { %vm3784_vm11 = vcmp.gt.f32.partialorder %v6894_v1, %v6480_v44  ;;  %4692 = vmatprep.mubr.msk.bf16.mxu1 %vm7751_vm15, %v7750_v9  ;;  %v6969_v32 = vadd.f32 %v6965_v43, %v6894_v1  ;;  %v3688_v42 = vmax.f32 %v6936_v27, %v6921_v61  ;;  %v7765_v9 = vpack.c.bf16 %v7763_v45, %v7764_v10 }
 0x70b   : > { %v6902_v54 = vpop.f32.mrf.mxu0 }
 0x70c   : > { %vm3789_vm5 = vcmp.gt.f32.partialorder %v6902_v54, %v6480_v44  ;;  %v7014_v49 = vadd.f32 %v7010_v57, %v6902_v54  ;;  %v3686_v15 = vmax.f32 %v3670_v47, %v6969_v32 }
 0x70d   : > { %v6906_v11 = vpop.f32.mrf.mxu0 }
 0x70e   : > { %vm3787_vm0 = vcmp.gt.f32.partialorder %v6906_v11, %v6480_v44  ;;  %v3677_v59 = vadd.f32 %v7021_v40, %v6906_v11  ;;  %v3691_v39 = vmax.f32 %v3687_v38, %v7014_v49 }
 0x70f   : > { %v6910_v19 = vpop.f32.mrf.mxu0 }
 0x710   : > { %vm3790_vm12 = vcmp.gt.f32.partialorder %v6910_v19, %v6480_v44  ;;  %v6978_v31 = vadd.f32 %v6974_v56, %v6910_v19  ;;  %v3689_v37 = vmax.f32 %v3685_v29, %v3677_v59 }
 0x711   : > { %4693 = vmatmul.mubr.msk.bf16.gmra.mxu1 %vm7755_vm7, %v7754_v3  ;;  %v6927_v22 = vpop.f32.mrf.mxu0 }
 0x712   : > { %vm3788_vm9 = vcmp.gt.f32.partialorder %v6927_v22, %v6480_v44  ;;  %4696 = vmatprep.mubr.msk.bf16.mxu1 %vm7723_vm6, %v7758_v21  ;;  %v3678_v13 = vadd.f32 %v7028_v17, %v6927_v22  ;;  %v3692_v28 = vmax.f32 %v3688_v42, %v6978_v31 }
 0x713   : > { %v6980_v24 = vpop.f32.mrf.mxu0 }
 0x714   : > { %v7047_v14 = vadd.f32 %v7043_v4, %v6980_v24  ;;  %v3690_v3 = vmax.f32 %v3686_v15, %v3678_v13 }
 0x715   : > { %v7016_v12 = vpop.f32.mrf.mxu0 }
 0x716   : > { %vm3791_vm7 = vcmp.gt.f32.partialorder %v7016_v12, %v6480_v44  ;;  %v7056_v50 = vadd.f32 %v7052_v18, %v7016_v12  ;;  %v3695_v42 = vmax.f32 %v3691_v39, %v7047_v14 }
 0x717   : > { %v7038_v63 = vpop.f32.mrf.mxu0 }
 0x718   : > { %v7065_v35 = vadd.f32 %v7061_v33, %v7038_v63  ;;  %vm3794_vm6 = vcmp.gt.f32.partialorder %v7038_v63, %v6480_v44  ;;  %v3693_v38 = vmax.f32 %v3689_v37, %v7056_v50 }
 0x719   : > { %4697 = vmatmul.mubr.msk.bf16.gmra.mxu1 %vm7751_vm15, %v7765_v9  ;;  %v7074_v60 = vpop.f32.mrf.mxu0 }
 0x71a   : > { %v3696_v41 = vmax.f32 %v3692_v28, %v7065_v35  ;;  %v7084_v21 = vadd.f32 %v7080_v48, %v7074_v60  ;;  %4716 = vmatprep.mubr.msk.bf16.mxu1 %vm5011_vm1, %v7594_v23 }
 0x71c   : > { %v3694_v29 = vmax.f32 %v3690_v3, %v7084_v21  ;;  %v3698_v15 = vmax.f32 %v3695_v42, %v3696_v41 }
 0x71e   : > { %v3697_v28 = vmax.f32 %v3693_v38, %v3694_v29 }
 0x720   : > { %v3699_v45 = vmax.f32 %v3697_v28, %v3698_v15 }
 0x722   : > { %v3700_v10 = vrot.slane %v3699_v45, 4 }
 0x724   : > { %v3701_v9 = vmax.f32 %v3699_v45, %v3700_v10 }
 0x726   : > { %v3702_v25 = vrot.slane %v3701_v9, 2 }
 0x728   : > { %v3703_v33 = vmax.f32 %v3701_v9, %v3702_v25 }
 0x72a   : > { %v3704_v18 = vrot.slane %v3703_v33, 1 }
 0x72c   : > { %v7091_v4 = vmax.f32 %v3703_v33, %v3704_v18 }
 0x72e   : > { %v3706_v48 = vsub.f32 %v3669_v20, %v7091_v4  ;;  %v3707_v17 = vsub.f32 %v3670_v47, %v7091_v4  ;;  %v3708_v39 = vsub.f32 %v3671_v52, %v7091_v4  ;;  %v3709_v37 = vsub.f32 %v6936_v27, %v7091_v4 }
 0x72f   : > { %v3710_v3 = vsub.f32 %v6960_v36, %v7091_v4  ;;  %v3711_v41 = vsub.f32 %v6969_v32, %v7091_v4  ;;  %v3712_v25 = vsub.f32 %v6951_v53, %v7091_v4  ;;  %v3713_v20 = vsub.f32 %v6921_v61, %v7091_v4 }
 0x730   : > { %v3722_v18 = vmul.f32 1.442695, %v3706_v48  ;;  %v3724_v33 = vmul.f32 1.442695, %v3707_v17  ;;  %v3726_v42 = vmul.f32 1.442695, %v3708_v39  ;;  %v3714_v52 = vsub.f32 %v3677_v59, %v7091_v4 }
 0x731   : > { %v3728_v47 = vmul.f32 1.442695, %v3709_v37  ;;  %v3730_v27 = vmul.f32 1.442695, %v3710_v3  ;;  %v3715_v38 = vsub.f32 %v3678_v13, %v7091_v4  ;;  %v3732_v36 = vmul.f32 1.442695, %v3711_v41 }
 0x732   : > { %4902 = vpow2.f32 %v3722_v18  ;;  %v3734_v32 = vmul.f32 1.442695, %v3712_v25  ;;  %v3736_v29 = vmul.f32 1.442695, %v3713_v20  ;;  %v3738_v53 = vmul.f32 1.442695, %v3714_v52 }
 0x733   : > { %4904 = vpow2.f32 %v3724_v33  ;;  %v3740_v17 = vmul.f32 1.442695, %v3715_v38  ;;  %v3716_v61 = vsub.f32 %v7014_v49, %v7091_v4  ;;  %v3717_v13 = vsub.f32 %v6978_v31, %v7091_v4 }
 0x734   : > { %4906 = vpow2.f32 %v3726_v42  ;;  %v3718_v45 = vsub.f32 %v7056_v50, %v7091_v4  ;;  %v3719_v37 = vsub.f32 %v7084_v21, %v7091_v4  ;;  %v3720_v25 = vsub.f32 %v7047_v14, %v7091_v4 }
 0x735   : > { %4908 = vpow2.f32 %v3728_v47  ;;  %v3742_v10 = vmul.f32 1.442695, %v3716_v61  ;;  %v3744_v3 = vmul.f32 1.442695, %v3717_v13  ;;  %v3721_v20 = vsub.f32 %v7065_v35, %v7091_v4 }
 0x736   : > { %4910 = vpow2.f32 %v3730_v27  ;;  %v3746_v33 = vmul.f32 1.442695, %v3718_v45  ;;  %v3748_v47 = vmul.f32 1.442695, %v3719_v37 }
 0x737   : > { %4912 = vpow2.f32 %v3732_v36  ;;  %v3750_v36 = vmul.f32 1.442695, %v3720_v25  ;;  %v3752_v35 = vmul.f32 1.442695, %v3721_v20 }
 0x738   : > { %4914 = vpow2.f32 %v3734_v32 }
 0x739   : > { %4916 = vpow2.f32 %v3736_v29 }
 0x73a   : > { %4918 = vpow2.f32 %v3738_v53 }
 0x73b   : > { %4920 = vpow2.f32 %v3740_v17 }
 0x73c   : > { %4922 = vpow2.f32 %v3742_v10 }
 0x73d   : > { %4924 = vpow2.f32 %v3744_v3 }
 0x73e   : > { %4926 = vpow2.f32 %v3746_v33 }
 0x73f   : > { %v4903_v59 = vpop.eup %4902  ;;  %4928 = vpow2.f32 %v3748_v47 }
 0x740   : > { %v4905_v48 = vpop.eup %4904  ;;  %v7115_v15 = vsel %vm3779_vm3, %v4903_v59, 0.0  ;;  %4930 = vpow2.f32 %v3750_v36  ;;  %vm7767_vm3 = vcmp.gt.f32.partialorder %v6980_v24, %v6480_v44 }
 0x741   : > { %v4907_v28 = vpop.eup %4906  ;;  %v3754_v9 = vadd.f32 %v4905_v48, %v4903_v59  ;;  %v7122_v49 = vsel %vm3780_vm8, %v4905_v48, 0.0  ;;  %4932 = vpow2.f32 %v3752_v35 }
 0x742   : > { %v4909_v39 = vpop.eup %4908  ;;  %v7127_v31 = vsel %vm3781_vm2, %v4907_v28, 0.0  ;;  %vm3792_vm2 = vcmp.gt.f32.partialorder %v7074_v60, %v6480_v44 }
 0x743   : > { %v4911_v5 = vpop.eup %4910  ;;  %v3755_v41 = vadd.f32 %v4907_v28, %v3754_v9  ;;  %v7134_v50 = vsel %vm3782_vm4, %v4909_v39, 0.0 }
 0x744   : > { %v4913_v46 = vpop.eup %4912  ;;  %v7141_v8 = vsel %vm3783_vm13, %v4911_v5, 0.0 }
 0x745   : > { %v4915_v18 = vpop.eup %4914  ;;  %v3756_v21 = vadd.f32 %v4909_v39, %v3755_v41  ;;  %v7146_v42 = vsel %vm3784_vm11, %v4913_v46, 0.0 }
 0x746   : > { %v4917_v62 = vpop.eup %4916  ;;  %v3801_v14 = vsel %vm3785_vm10, %v4915_v18, 0.0 }
 0x747   : > { %v4919_v6 = vpop.eup %4918  ;;  %v3757_v52 = vadd.f32 %v4911_v5, %v3756_v21  ;;  %v3802_v27 = vsel %vm3786_vm14, %v4917_v62, 0.0 }
 0x748   : > { %v4921_v38 = vpop.eup %4920  ;;  %v3803_v1 = vsel %vm3787_vm0, %v4919_v6, 0.0 }
 0x749   : > { %v3758_v4 = vadd.f32 %v4913_v46, %v3757_v52  ;;  %v3804_v16 = vsel %vm3788_vm9, %v4921_v38, 0.0  ;;  %v4923_v17 = vpop.eup %4922 }
 0x74a   : > { %v4925_v59 = vpop.eup %4924 }
 0x74b   : > { %v3759_v32 = vadd.f32 %v4915_v18, %v3758_v4  ;;  %v4927_v13 = vpop.eup %4926  ;;  %v3805_v18 = vsel %vm3789_vm5, %v4923_v17, 0.0  ;;  %v3806_v33 = vsel %vm3790_vm12, %v4925_v59, 0.0 }
 0x74c   : > { %v4929_v28 = vpop.eup %4928 }
 0x74d   : > { %v3760_v29 = vadd.f32 %v4917_v62, %v3759_v32  ;;  %v4931_v10 = vpop.eup %4930  ;;  %v3807_v62 = vsel %vm3791_vm7, %v4927_v13, 0.0  ;;  %v3808_v20 = vsel %vm3792_vm2, %v4929_v28, 0.0 }
 0x74e   : > { %v4933_v22 = vpop.eup %4932 }
 0x74f   : > { %v3761_v2 = vadd.f32 %v4919_v6, %v3760_v29  ;;  %v3809_v6 = vsel %vm7767_vm3, %v4931_v10, 0.0  ;;  %v3810_v60 = vsel %vm3794_vm6, %v4933_v22, 0.0 }
 0x751   : > { %v3762_v53 = vadd.f32 %v4921_v38, %v3761_v2 }
 0x753   : > { %v3763_v61 = vadd.f32 %v4923_v17, %v3762_v53 }
 0x755   : > { %v3764_v11 = vadd.f32 %v4925_v59, %v3763_v61 }
 0x757   : > { %v3765_v48 = vadd.f32 %v4927_v13, %v3764_v11  ;;  %v7203_v13 = vpop.permute.xlu1 %2905 }
 0x759   : > { %v3766_v45 = vadd.f32 %v4929_v28, %v3765_v48 }
 0x75b   : > { %v3767_v9 = vadd.f32 %v4931_v10, %v3766_v45 }
 0x75d   : > { %v3768_v39 = vadd.f32 %v4933_v22, %v3767_v9 }
 0x75f   : > { %v3769_v5 = vrot.slane %v3768_v39, 4 }
 0x761   : > { %v3770_v37 = vadd.f32 %v3769_v5, %v3768_v39 }
 0x763   : > { %v3771_v3 = vrot.slane %v3770_v37, 2 }
 0x765   : > { %v3772_v41 = vadd.f32 %v3771_v3, %v3770_v37 }
 0x767   : > { %v3773_v46 = vrot.slane %v3772_v41, 1 }
 0x769   : > { %v3774_v25 = vadd.f32 %v3773_v46, %v3772_v41 }
 0x76b   : > { %4934 = vrcp.f32 %v3774_v25 }
 0x778   : > { %v4935_v21 = vpop.eup %4934 }
 0x779   : > { %v3824_v54 = vmul.f32 %v4935_v21, %v3807_v62  ;;  %v3825_v47 = vmul.f32 %v4935_v21, %v3808_v20  ;;  %v3826_v52 = vmul.f32 %v4935_v21, %v3809_v6  ;;  %v3827_v38 = vmul.f32 %v4935_v21, %v3810_v60 }
 0x77a   : > { %v3822_v19 = vmul.f32 %v4935_v21, %v3805_v18  ;;  %v3823_v36 = vmul.f32 %v4935_v21, %v3806_v33  ;;  %v3820_v4 = vmul.f32 %v4935_v21, %v3803_v1  ;;  %v3821_v35 = vmul.f32 %v4935_v21, %v3804_v16 }
 0x77b   : > { %v3835_v32 = vpack.c.bf16 %v3825_v47, %v3824_v54  ;;  %v3836_v12 = vpack.c.bf16 %v3827_v38, %v3826_v52  ;;  %v3818_v29 = vmul.f32 %v4935_v21, %v3801_v14  ;;  %v3819_v2 = vmul.f32 %v4935_v21, %v3802_v27  ;;  %v7769_v52 = vld [vmem:[#allocation27_spill] sm:$0xff] }
 0x77c   : > { %v3834_v53 = vpack.c.bf16 %v3823_v36, %v3822_v19  ;;  %v3833_v17 = vpack.c.bf16 %v3821_v35, %v3820_v4  ;;  %v3816_v24 = vmul.f32 %v4935_v21, %v7141_v8  ;;  %v3817_v61 = vmul.f32 %v4935_v21, %v7146_v42 }
 0x77d   : > { %4739 = vmatpush3.bf16.msra.mxu0 %v3836_v12  ;;  %v3832_v44 = vpack.c.bf16 %v3819_v2, %v3818_v29  ;;  %v3814_v63 = vmul.f32 %v4935_v21, %v7127_v31  ;;  %v3815_v59 = vmul.f32 %v4935_v21, %v7134_v50  ;;  %v3812_v11 = vmul.f32 %v4935_v21, %v7115_v15  ;;  %v7768_v15 = vld [vmem:[#allocation28_spill] sm:$0xff]  ;;  %v7195_v31 = vpop.permute.xlu0 %2900  ;;  %v7772_v12 = vld [vmem:[#allocation45_spill] sm:$0xff] }
 0x77e   : > { %4740 = vmatprep.subr.bf16.mxu0 %v7594_v23  ;;  %v3831_v1 = vpack.c.bf16 %v3817_v61, %v3816_v24  ;;  %v3813_v14 = vmul.f32 %v4935_v21, %v7122_v49  ;;  %v3828_v49 = vpack.c.bf16 %v7768_v15, %v7768_v15 }
 0x77f   : > { %v3830_v27 = vpack.c.bf16 %v3815_v59, %v3814_v63 }
 0x780   : > { %v3829_v16 = vpack.c.bf16 %v3813_v14, %v3812_v11 }
 0x781   : > { %4741 = vmatpush3.bf16.msra.mxu0 %v3835_v32  ;;  %v7771_v32 = vld [vmem:[#allocation5_spill] sm:$0xff] }
 0x782   : > { %4742 = vmatprep.subr.bf16.mxu0 %v7594_v23 }
 0x785   : > { %4743 = vmatpush3.bf16.msra.mxu0 %v3834_v53 }
 0x786   : > { %4744 = vmatprep.subr.bf16.mxu0 %v7594_v23 }
 0x789   : > { %4745 = vmatpush3.bf16.msra.mxu0 %v3833_v17 }
 0x78a   : > { %4746 = vmatprep.subr.bf16.mxu0 %v7594_v23 }
 0x78d   : > { %4747 = vmatpush3.bf16.msra.mxu0 %v3832_v44  ;;  %v7773_v44 = vld [vmem:[#allocation38_spill] sm:$0xff] }
 0x78e   : > { %4748 = vmatprep.subr.bf16.mxu0 %v7594_v23 }
 0x791   : > { %4749 = vmatpush3.bf16.msra.mxu0 %v3831_v1 }
 0x792   : > { %4750 = vmatprep.subr.bf16.mxu0 %v7594_v23 }
 0x795   : > { %4751 = vmatpush3.bf16.msra.mxu0 %v3830_v27 }
 0x796   : > { %4752 = vmatprep.subr.bf16.mxu0 %v7594_v23 }
 0x799   : > { %4753 = vmatpush3.bf16.msra.mxu0 %v3829_v16 }
 0x79c   : > { %4755 = vmatmul.mubr.bf16.vlgmr.msra.gmra.mxu0 %v3828_v49 }
 0x7b9   : > { %v2950_v50 = vpop.f32.mrf.mxu1 }
 0x7ba   : > { %v2951_v8 = vadd.f32 %v2950_v50, %v7195_v31 }
 0x7bb   : > { %v4680_v42 = vpop.f32.mrf.mxu1 }
 0x7bc   : > { %2957 = vst [vmem:[%s7200_s16] sm:$0xff] %v2951_v8 }
 0x7bd   : > { %v2953_v48 = vpop.f32.mrf.mxu1 }
 0x7be   : > { %v2954_v28 = vadd.f32 %v2953_v48, %v7203_v13 }
 0x7bf   : > { %v4681_v45 = vpop.f32.mrf.mxu1 }
 0x7c0   : > { %2958 = vst [vmem:[%s7200_s16 + $0x8] sm:$0xff] %v2954_v28 }
 0x7c1   : > { %v7208_v10 = vpop.f32.mrf.mxu1 }
 0x7c2   : > { %vm3322_vm4 = vcmp.gt.f32.partialorder %v7208_v10, %v6478_v51 }
 0x7c3   : > { %v7212_v9 = vpop.f32.mrf.mxu1 }
 0x7c4   : > { %vm3320_vm8 = vcmp.gt.f32.partialorder %v7212_v9, %v6478_v51 }
 0x7c5   : > { %v7216_v22 = vpop.f32.mrf.mxu1 }
 0x7c6   : > { %vm3323_vm10 = vcmp.gt.f32.partialorder %v7216_v22, %v6478_v51  ;;  %v3213_v62 = vadd.f32 %v6932_v0, %v7216_v22  ;;  %v3212_v0 = vadd.f32 %v6985_v26, %v7208_v10 }
 0x7c7   : > { %v7220_v39 = vpop.f32.mrf.mxu1 }
 0x7c8   : > { %vm3321_vm13 = vcmp.gt.f32.partialorder %v7220_v39, %v6478_v51 }
 0x7c9   : > { %v7224_v5 = vpop.f32.mrf.mxu1 }
 0x7ca   : > { %vm3326_vm14 = vcmp.gt.f32.partialorder %v7224_v5, %v6478_v51  ;;  %v3216_v20 = vadd.f32 %v6947_v30, %v7224_v5  ;;  %v3210_v30 = vadd.f32 %v6994_v55, %v7212_v9 }
 0x7cb   : > { %v7228_v37 = vpop.f32.mrf.mxu1 }
 0x7cc   : > { %vm3324_vm11 = vcmp.gt.f32.partialorder %v7228_v37, %v6478_v51  ;;  %v3214_v6 = vadd.f32 %v6956_v58, %v7228_v37  ;;  %v3211_v58 = vadd.f32 %v7001_v34, %v7220_v39  ;;  %v3228_v55 = vmax.f32 %v3212_v0, %v3216_v20 }
 0x7cd   : > { %v7232_v3 = vpop.f32.mrf.mxu1 }
 0x7ce   : > { %vm3327_vm5 = vcmp.gt.f32.partialorder %v7232_v3, %v6478_v51  ;;  %v7254_v33 = vadd.f32 %v6917_v7, %v7232_v3  ;;  %v3226_v19 = vmax.f32 %v3210_v30, %v3214_v6 }
 0x7cf   : > { %v7236_v41 = vpop.f32.mrf.mxu1 }
 0x7d0   : > { %vm3325_vm0 = vcmp.gt.f32.partialorder %v7236_v41, %v6478_v51  ;;  %v3215_v60 = vadd.f32 %v6965_v43, %v7236_v41  ;;  %v3229_v43 = vmax.f32 %v3213_v62, %v7254_v33 }
 0x7d1   : > { %v7240_v46 = vpop.f32.mrf.mxu1 }
 0x7d2   : > { %vm3330_vm12 = vcmp.gt.f32.partialorder %v7240_v46, %v6478_v51  ;;  %v3227_v34 = vmax.f32 %v3211_v58, %v3215_v60 }
 0x7d3   : > { %v7244_v25 = vpop.f32.mrf.mxu1 }
 0x7d4   : > { %vm3328_vm9 = vcmp.gt.f32.partialorder %v7244_v25, %v6478_v51  ;;  %v3218_v26 = vadd.f32 %v7021_v40, %v7244_v25 }
 0x7d5   : > { %v7248_v18 = vpop.f32.mrf.mxu1 }
 0x7d6   : > { %vm3331_vm15 = vcmp.gt.f32.partialorder %v7248_v18, %v6478_v51  ;;  %v7270_v7 = vadd.f32 %v6974_v56, %v7248_v18  ;;  %v7285_v56 = vadd.f32 %v7010_v57, %v7240_v46  ;;  %v7770_v57 = vld [vmem:[#allocation2_spill] sm:$0xff]  ;;  %v3230_v17 = vmax.f32 %v3226_v19, %v3218_v26 }
 0x7d7   : > { %v7256_v21 = vpop.f32.mrf.mxu1 }
 0x7d8   : > { %vm3329_vm7 = vcmp.gt.f32.partialorder %v7256_v21, %v6478_v51  ;;  %v3219_v38 = vadd.f32 %v7769_v52, %v7256_v21  ;;  %v3233_v36 = vmax.f32 %v3229_v43, %v7270_v7  ;;  %v3232_v2 = vmax.f32 %v3228_v55, %v7285_v56 }
 0x7d9   : > { %v7272_v54 = vpop.f32.mrf.mxu1 }
 0x7da   : > { %vm3334_vm6 = vcmp.gt.f32.partialorder %v7272_v54, %v6478_v51  ;;  %v7300_v35 = vadd.f32 %v7770_v57, %v7272_v54  ;;  %v3231_v24 = vmax.f32 %v3227_v34, %v3219_v38 }
 0x7db   : > { %v7287_v47 = vpop.f32.mrf.mxu1 }
 0x7dc   : > { %vm3332_vm2 = vcmp.gt.f32.partialorder %v7287_v47, %v6478_v51  ;;  %v7304_v40 = vadd.f32 %v7771_v32, %v7287_v47  ;;  %v3236_v59 = vmax.f32 %v3232_v2, %v7300_v35 }
 0x7dd   : > { %v7296_v4 = vpop.f32.mrf.mxu1 }
 0x7de   : > { %v7308_v29 = vadd.f32 %v7772_v12, %v7296_v4  ;;  %vm3335_vm3 = vcmp.gt.f32.partialorder %v7296_v4, %v6478_v51  ;;  %v3234_v11 = vmax.f32 %v3230_v17, %v7304_v40 }
 0x7df   : > { %v7313_v53 = vpop.f32.mrf.mxu1 }
 0x7e0   : > { %v3237_v61 = vmax.f32 %v3233_v36, %v7308_v29  ;;  %v7318_v63 = vadd.f32 %v7773_v44, %v7313_v53 }
 0x7e2   : > { %v3235_v1 = vmax.f32 %v3231_v24, %v7318_v63  ;;  %v3239_v14 = vmax.f32 %v3236_v59, %v3237_v61 }
 0x7e4   : > { %v3238_v27 = vmax.f32 %v3234_v11, %v3235_v1 }
 0x7e6   : > { %v3240_v16 = vmax.f32 %v3238_v27, %v3239_v14 }
 0x7e8   : > { %v3241_v15 = vrot.slane %v3240_v16, 4 }
 0x7ea   : > { %v3242_v49 = vmax.f32 %v3240_v16, %v3241_v15 }
 0x7ec   : > { %v3243_v50 = vrot.slane %v3242_v49, 2 }
 0x7ee   : > { %v3244_v8 = vmax.f32 %v3242_v49, %v3243_v50 }
 0x7f0   : > { %v3245_v42 = vrot.slane %v3244_v8, 1 }
 0x7f2   : > { %v7323_v48 = vmax.f32 %v3244_v8, %v3245_v42 }
 0x7f4   : > { %v3247_v28 = vsub.f32 %v3210_v30, %v7323_v48  ;;  %v3248_v45 = vsub.f32 %v3211_v58, %v7323_v48  ;;  %v3249_v43 = vsub.f32 %v3212_v0, %v7323_v48  ;;  %v3250_v52 = vsub.f32 %v3213_v62, %v7323_v48 }
 0x7f5   : > { %v3251_v55 = vsub.f32 %v3214_v6, %v7323_v48  ;;  %v3252_v19 = vsub.f32 %v3215_v60, %v7323_v48  ;;  %v3253_v34 = vsub.f32 %v3216_v20, %v7323_v48  ;;  %v3254_v12 = vsub.f32 %v7254_v33, %v7323_v48 }
 0x7f6   : > { %v3263_v36 = vmul.f32 1.442695, %v3247_v28  ;;  %v3265_v57 = vmul.f32 1.442695, %v3248_v45  ;;  %v3267_v32 = vmul.f32 1.442695, %v3249_v43  ;;  %v3255_v30 = vsub.f32 %v3218_v26, %v7323_v48 }
 0x7f7   : > { %v3269_v2 = vmul.f32 1.442695, %v3250_v52  ;;  %v3271_v58 = vmul.f32 1.442695, %v3251_v55  ;;  %v3256_v0 = vsub.f32 %v3219_v38, %v7323_v48  ;;  %v3273_v62 = vmul.f32 1.442695, %v3252_v19 }
 0x7f8   : > { %4936 = vpow2.f32 %v3263_v36  ;;  %v3275_v6 = vmul.f32 1.442695, %v3253_v34  ;;  %v3277_v60 = vmul.f32 1.442695, %v3254_v12  ;;  %v3279_v20 = vmul.f32 1.442695, %v3255_v30 }
 0x7f9   : > { %4938 = vpow2.f32 %v3265_v57  ;;  %v3281_v17 = vmul.f32 1.442695, %v3256_v0  ;;  %v3257_v33 = vsub.f32 %v7285_v56, %v7323_v48  ;;  %v3258_v38 = vsub.f32 %v7270_v7, %v7323_v48 }
 0x7fa   : > { %4940 = vpow2.f32 %v3267_v32  ;;  %v3259_v59 = vsub.f32 %v7304_v40, %v7323_v48  ;;  %v3260_v27 = vsub.f32 %v7318_v63, %v7323_v48  ;;  %v3261_v49 = vsub.f32 %v7300_v35, %v7323_v48 }
 0x7fb   : > { %4942 = vpow2.f32 %v3269_v2  ;;  %v3283_v11 = vmul.f32 1.442695, %v3257_v33  ;;  %v3285_v16 = vmul.f32 1.442695, %v3258_v38  ;;  %v3262_v28 = vsub.f32 %v7308_v29, %v7323_v48 }
 0x7fc   : > { %4944 = vpow2.f32 %v3271_v58  ;;  %v3287_v8 = vmul.f32 1.442695, %v3259_v59  ;;  %v3289_v45 = vmul.f32 1.442695, %v3260_v27  ;;  %v3291_v19 = vmul.f32 1.442695, %v3261_v49 }
 0x7fd   : > { %4946 = vpow2.f32 %v3273_v62  ;;  %v3293_v48 = vmul.f32 1.442695, %v3262_v28 }
 0x7fe   : > { %4948 = vpow2.f32 %v3275_v6 }
 0x7ff   : > { %4950 = vpow2.f32 %v3277_v60 }
 0x800   : > { %4952 = vpow2.f32 %v3279_v20 }
 0x801   : > { %4954 = vpow2.f32 %v3281_v17 }
 0x802   : > { %4956 = vpow2.f32 %v3283_v11 }
 0x803   : > { %4958 = vpow2.f32 %v3285_v16 }
 0x804   : > { %4960 = vpow2.f32 %v3287_v8 }
 0x805   : > { %v4937_v26 = vpop.eup %4936  ;;  %4962 = vpow2.f32 %v3289_v45 }
 0x806   : > { %v4939_v24 = vpop.eup %4938  ;;  %v7343_v61 = vsel %vm3320_vm8, %v4937_v26, 0.0  ;;  %4964 = vpow2.f32 %v3291_v19  ;;  %vm7776_vm8 = vcmask 130048  }
 0x807   : > { %v4941_v44 = vpop.eup %4940  ;;  %v3295_v1 = vadd.f32 %v4939_v24, %v4937_v26  ;;  %v7350_v56 = vsel %vm3321_vm13, %v4939_v24, 0.0  ;;  %4966 = vpow2.f32 %v3293_v48 }
 0x808   : > { %v4943_v14 = vpop.eup %4942  ;;  %v7355_v7 = vsel %vm3322_vm4, %v4941_v44, 0.0  ;;  %vm3333_vm4 = vcmp.gt.f32.partialorder %v7313_v53, %v6478_v51 }
 0x809   : > { %v4945_v9 = vpop.eup %4944  ;;  %v3296_v15 = vadd.f32 %v4941_v44, %v3295_v1  ;;  %v7362_v40 = vsel %vm3323_vm10, %v4943_v14, 0.0 }
 0x80a   : > { %v4947_v39 = vpop.eup %4946  ;;  %v7369_v10 = vsel %vm3324_vm11, %v4945_v9, 0.0 }
 0x80b   : > { %v4949_v50 = vpop.eup %4948  ;;  %v3297_v63 = vadd.f32 %v4943_v14, %v3296_v15  ;;  %v7374_v42 = vsel %vm3325_vm0, %v4947_v39, 0.0 }
 0x80c   : > { %v4951_v22 = vpop.eup %4950  ;;  %v3342_v35 = vsel %vm3326_vm14, %v4949_v50, 0.0 }
 0x80d   : > { %v4953_v37 = vpop.eup %4952  ;;  %v3298_v43 = vadd.f32 %v4945_v9, %v3297_v63  ;;  %v3343_v52 = vsel %vm3327_vm5, %v4951_v22, 0.0 }
 0x80e   : > { %v4955_v55 = vpop.eup %4954  ;;  %v3344_v41 = vsel %vm3328_vm9, %v4953_v37, 0.0 }
 0x80f   : > { %v3299_v29 = vadd.f32 %v4947_v39, %v3298_v43  ;;  %v3345_v5 = vsel %vm3329_vm7, %v4955_v55, 0.0  ;;  %v4957_v32 = vpop.eup %4956 }
 0x810   : > { %v4959_v2 = vpop.eup %4958  ;;  %v3346_v59 = vsel %vm3330_vm12, %v4957_v32, 0.0 }
 0x811   : > { %v3300_v34 = vadd.f32 %v4949_v50, %v3299_v29  ;;  %v4961_v30 = vpop.eup %4960  ;;  %v3347_v11 = vsel %vm3331_vm15, %v4959_v2, 0.0 }
 0x812   : > { %v4963_v0 = vpop.eup %4962  ;;  %v3348_v14 = vsel %vm3332_vm2, %v4961_v30, 0.0 }
 0x813   : > { %v3301_v36 = vadd.f32 %v4951_v22, %v3300_v34  ;;  %v4965_v6 = vpop.eup %4964  ;;  %v3349_v9 = vsel %vm3333_vm4, %v4963_v0, 0.0 }
 0x814   : > { %v4967_v21 = vpop.eup %4966  ;;  %v3350_v27 = vsel %vm3334_vm6, %v4965_v6, 0.0 }
 0x815   : > { %v3302_v3 = vadd.f32 %v4953_v37, %v3301_v36  ;;  %v3351_v53 = vsel %vm3335_vm3, %v4967_v21, 0.0 }
 0x817   : > { %v3303_v57 = vadd.f32 %v4955_v55, %v3302_v3 }
 0x819   : > { %v3304_v12 = vadd.f32 %v4957_v32, %v3303_v57  ;;  %v7775_v57 = vld [vmem:[#allocation43_spill] sm:$0xff] }
 0x81b   : > { %v3305_v25 = vadd.f32 %v4959_v2, %v3304_v12 }
 0x81d   : > { %v3306_v58 = vadd.f32 %v4961_v30, %v3305_v25 }
 0x81f   : > { %v3307_v62 = vadd.f32 %v4963_v0, %v3306_v58 }
 0x821   : > { %v3308_v60 = vadd.f32 %v4965_v6, %v3307_v62 }
 0x823   : > { %v3309_v20 = vadd.f32 %v4967_v21, %v3308_v60 }
 0x825   : > { %v3310_v17 = vrot.slane %v3309_v20, 4 }
 0x827   : > { %v3311_v33 = vadd.f32 %v3310_v17, %v3309_v20 }
 0x829   : > { %v3312_v26 = vrot.slane %v3311_v33, 2 }
 0x82b   : > { %v3313_v38 = vadd.f32 %v3312_v26, %v3311_v33 }
 0x82d   : > { %v3314_v24 = vrot.slane %v3313_v38, 1 }
 0x82f   : > { %v3315_v44 = vadd.f32 %v3314_v24, %v3313_v38 }
 0x831   : > { %4968 = vrcp.f32 %v3315_v44 }
 0x83e   : > { %v4969_v1 = vpop.eup %4968 }
 0x83f   : > { %v3365_v46 = vmul.f32 %v4969_v1, %v3348_v14  ;;  %v3366_v16 = vmul.f32 %v4969_v1, %v3349_v9  ;;  %v3367_v15 = vmul.f32 %v4969_v1, %v3350_v27  ;;  %v3368_v39 = vmul.f32 %v4969_v1, %v3351_v53 }
 0x840   : > { %v3363_v18 = vmul.f32 %v4969_v1, %v3346_v59  ;;  %v3364_v49 = vmul.f32 %v4969_v1, %v3347_v11  ;;  %v3361_v50 = vmul.f32 %v4969_v1, %v3344_v41  ;;  %v3362_v8 = vmul.f32 %v4969_v1, %v3345_v5 }
 0x841   : > { %v3376_v63 = vpack.c.bf16 %v3366_v16, %v3365_v46  ;;  %v3377_v47 = vpack.c.bf16 %v3368_v39, %v3367_v15  ;;  %v3359_v22 = vmul.f32 %v4969_v1, %v3342_v35  ;;  %v3360_v28 = vmul.f32 %v4969_v1, %v3343_v52 }
 0x842   : > { %v3375_v37 = vpack.c.bf16 %v3364_v49, %v3363_v18  ;;  %v3374_v45 = vpack.c.bf16 %v3362_v8, %v3361_v50  ;;  %v3357_v54 = vmul.f32 %v4969_v1, %v7369_v10  ;;  %v3358_v43 = vmul.f32 %v4969_v1, %v7374_v42 }
 0x843   : > { %4701 = vmatpush3.bf16.msra.mxu1 %v3377_v47  ;;  %v3373_v51 = vpack.c.bf16 %v3360_v28, %v3359_v22  ;;  %v3355_v4 = vmul.f32 %v4969_v1, %v7355_v7  ;;  %v3356_v55 = vmul.f32 %v4969_v1, %v7362_v40  ;;  %v3353_v19 = vmul.f32 %v4969_v1, %v7343_v61  ;;  %v7774_v7 = vld [vmem:[#allocation26_spill] sm:$0xff] }
 0x844   : > { %4702 = vmatprep.subr.bf16.mxu1 %v7594_v23  ;;  %v3372_v41 = vpack.c.bf16 %v3358_v43, %v3357_v54  ;;  %v3354_v35 = vmul.f32 %v4969_v1, %v7350_v56  ;;  %v3369_v40 = vpack.c.bf16 %v7774_v7, %v7774_v7 }
 0x845   : > { %v3371_v52 = vpack.c.bf16 %v3356_v55, %v3355_v4 }
 0x846   : > { %v3370_v29 = vpack.c.bf16 %v3354_v35, %v3353_v19 }
 0x847   : > { %4703 = vmatpush3.bf16.msra.mxu1 %v3376_v63 }
 0x848   : > { %4704 = vmatprep.subr.bf16.mxu1 %v7594_v23 }
 0x84b   : > { %4705 = vmatpush3.bf16.msra.mxu1 %v3375_v37 }
 0x84c   : > { %4706 = vmatprep.subr.bf16.mxu1 %v7594_v23 }
 0x84f   : > { %4707 = vmatpush3.bf16.msra.mxu1 %v3374_v45 }
 0x850   : > { %4708 = vmatprep.subr.bf16.mxu1 %v7594_v23 }
 0x853   : > { %4709 = vmatpush3.bf16.msra.mxu1 %v3373_v51 }
 0x854   : > { %4710 = vmatprep.subr.bf16.mxu1 %v7594_v23 }
 0x857   : > { %4711 = vmatpush3.bf16.msra.mxu1 %v3372_v41 }
 0x858   : > { %4712 = vmatprep.subr.bf16.mxu1 %v7594_v23 }
 0x85b   : > { %4713 = vmatpush3.bf16.msra.mxu1 %v3371_v52 }
 0x85c   : > { %v3871_v61 = vpop.f32.mrf.mxu0  ;;  %4714 = vmatprep.subr.bf16.mxu1 %v7594_v23 }
 0x85e   : > { %v4756_v56 = vpop.f32.mrf.mxu0 }
 0x85f   : > { %4715 = vmatpush3.bf16.msra.mxu1 %v3370_v29 }
 0x860   : > { %v3874_v10 = vpop.f32.mrf.mxu0  ;;  %4758 = vmatprep.subr.bf16.mxu1 %v7594_v23 }
 0x862   : > { %4717 = vmatmul.mubr.bf16.vlgmr.msra.gmra.mxu1 %v3369_v40  ;;  %v4757_v42 = vpop.f32.mrf.mxu0 }
 0x863   : > { %4760 = vmatprep.mubr.msk.bf16.mxu1 %vm5011_vm1, %v7594_v23 }
 0x922   : > { %v3412_v5 = vpop.f32.mrf.mxu1 }
 0x923   : > { %v3877_v48 = vpack.c.bf16 %v3871_v61, %v3412_v5 }
 0x924   : > { %v4718_v34 = vpop.f32.mrf.mxu1 }
 0x925   : > { %4759 = vmatpush3.bf16.msra.mxu1 %v3877_v48 }
 0x926   : > { %v3415_v36 = vpop.f32.mrf.mxu1 }
 0x928   : > { %v4719_v3 = vpop.f32.mrf.mxu1  ;;  %4761 = vmatmul.mubr.msk.bf16.vlgmr.msra.gmra.mxu1 %vm7776_vm8, %v7775_v57 }
 0x9e8   : > { %v3912_v32 = vpop.f32.mrf.mxu1 }
 0x9e9   : > { %v3913_v12 = vadd.f32 %v3912_v32, %v7195_v31 }
 0x9ea   : > { %v4762_v2 = vpop.f32.mrf.mxu1 }
 0x9eb   : > { %4166 = vst [vmem:[%s7200_s16 + $0x10] sm:$0xff] %v3913_v12 }
 0x9ec   : > { %v3915_v25 = vpop.f32.mrf.mxu1 }
 0x9ed   : > { %v3916_v30 = vadd.f32 %v3915_v25, %v7203_v13 }
 0x9ee   : > { %v4763_v58 = vpop.f32.mrf.mxu1 }
 0x9ef   : > { %4167 = vst [vmem:[%s7200_s16 + $0x18] sm:$0xff] %v3916_v30 }
 0x9f0 PF: > { %s18_s27 = sadd.s32 1, %s5008_s27  }
 0x9f1   : > { %p15_p4 = scmp.ge.s32.totalorder %s18_s27, 4  }
 0x9f3   :  { %17 = sbr.rel (!%p15_p4) target bundleno = 1 (0x1), region = 85 }

</bundles_post_ra>
